<compile_context>
chip_gen: v7x
topology: tpu7x:2x2x1
jax: 0.10.0
libtpu: 0.0.40
codegen_flags: <defaults>
</compile_context>

<pallas_src>
import math

import jax
import jax.numpy as jnp
import numpy as np
from jax.experimental import pallas as pl
from jax.experimental.pallas import tpu as pltpu


# ----------------------------------------------------------------------------
# Config (small shapes consistent with the module; concat_feat=False)
# ----------------------------------------------------------------------------
B = 2           # batch
S = 128         # sample_num (query grasps per batch element)
DIM = 3         # query point dimension
C_FEAT = 32     # c_dim of the conditioning feature handed to the decoder
T_DIM = 16      # t_dim of the time embedding
HID = 64        # hidden_size
N_BLOCKS = 5    # ResnetBlockFC blocks
OUT_DIM = 1
T_BLK = 128     # lane tile over the flattened B*S point axis


def get_3d_pts():
    # Canonical gripper-style keypoints (deterministic stand-in, see TODO above).
    return np.array(
        [[0.00, 0.00, 0.00],
         [0.00, 0.00, 0.06],
         [0.04, 0.00, 0.06],
         [-0.04, 0.00, 0.06],
         [0.04, 0.00, 0.10],
         [-0.04, 0.00, 0.10]], dtype=np.float32)


def _build_proj(points):
    """proj (N_pts*3, 9) with p_ref_flat = proj @ vec(R); R flattened row-major."""
    npts = points.shape[0]
    proj = np.zeros((npts * 3, 9), np.float32)
    for n in range(npts):
        for i in range(3):
            proj[n * 3 + i, i * 3:i * 3 + 3] = points[n]
    return proj


POINTS = get_3d_pts()                 # (N_PTS, 3) -- registered buffer in PyTorch
N_PTS = POINTS.shape[0]
NP3 = N_PTS * 3
C_TOTAL = NP3 + C_FEAT + T_DIM        # fc_c input width
PROJ = _build_proj(POINTS)            # (NP3, 9)


# ----------------------------------------------------------------------------
# Pallas kernel: one lane-tile (T_BLK points) of the full decoder forward.
# All tensors inside are feature-major: (features, points).
# ----------------------------------------------------------------------------
def _decoder_kernel(p_ref, rc_ref, emb_ref,
                    tw1_ref, tb1_ref, tw2_ref, tb2_ref,
                    wp_ref, bp_ref,
                    wcrc_ref, wct_ref, bc_ref,
                    w0_ref, b0_ref, w1_ref, b1_ref,
                    wout_ref, bout_ref,
                    o_ref):
    f32, bf16 = jnp.float32, jnp.bfloat16

    # ---- time_mlp tail: Linear -> Mish -> Linear   (y = W @ x + b, transposed) ----
    h_t = jnp.dot(tw1_ref[...], emb_ref[...],
                  preferred_element_type=f32) + tb1_ref[...]          # (2*T_DIM, TB)
    sp = jnp.maximum(h_t, 0.0) + jnp.log(1.0 + jnp.exp(-jnp.abs(h_t)))  # stable softplus
    mish = h_t * jnp.tanh(sp)
    t_emb = jnp.dot(tw2_ref[...], mish.astype(bf16),
                    preferred_element_type=f32) + tb2_ref[...]        # (T_DIM, TB)
    t_emb_bf = t_emb.astype(bf16)
    rc = rc_ref[...]                                                  # (9+C_FEAT, TB) bf16

    # ---- fc_p on the VPU (a K=3 matmul is a degenerate MXU shape) ----
    p_t = p_ref[...]                                                  # (3, TB) f32
    wp = wp_ref[...]                                                  # (HID, 3) f32
    net = (wp[:, 0:1] * p_t[0:1, :]
           + wp[:, 1:2] * p_t[1:2, :]
           + wp[:, 2:3] * p_t[2:3, :]
           + bp_ref[...])                                             # (HID, TB) f32

    # ---- n_blocks x (fc_c add + ResnetBlockFC) on (HID, TB) lane-dense tiles ----
    for i in range(N_BLOCKS):
        # fc_c[i](cat([p_ref, c, t])): the canonical-point rotation projection is
        # folded into wcrc's rotation columns, so no concat / gather in-kernel.
        net = net + (jnp.dot(wcrc_ref[i], rc, preferred_element_type=f32)
                     + jnp.dot(wct_ref[i], t_emb_bf, preferred_element_type=f32)
                     + bc_ref[i])
        h = jnp.dot(w0_ref[i], jnp.maximum(net, 0.0).astype(bf16),
                    preferred_element_type=f32) + b0_ref[i]
        dx = jnp.dot(w1_ref[i], jnp.maximum(h, 0.0).astype(bf16),
                     preferred_element_type=f32) + b1_ref[i]
        net = net + dx                                                # identity shortcut

    # ---- fc_out (out_dim=1) on the VPU + sublane reduce -> lane-dense (1, TB) row ----
    out_row = (jnp.sum(jnp.maximum(net, 0.0) * wout_ref[...], axis=0, keepdims=True)
               + bout_ref[...])
    o_ref[...] = out_row


# ----------------------------------------------------------------------------
# Wrapper: layout plumbing + weight packing + pallas_call.
# ----------------------------------------------------------------------------
def so3_time_local_decoder_forward(H_th, p, c_feat, t_in, params):
    f32, bf16 = jnp.float32, jnp.bfloat16
    bsz, s = t_in.shape
    n = bsz * s
    assert n % T_BLK == 0, (n, T_BLK)
    n_tiles = n // T_BLK

    # --- per-point inputs, flattened and transposed to (features, B*S) ---
    p_t = p.reshape(n, DIM).T.astype(f32)                              # (3, N)
    r_t = H_th.reshape(n, 9).T                                         # (9, N)  vec(R) row-major
    c_t = c_feat.reshape(n, C_FEAT).T                                  # (C_FEAT, N)
    rc_t = jnp.concatenate([r_t, c_t], axis=0).astype(bf16)            # (9+C_FEAT, N)

    # SinusoidalPosEmb (sin/cos kept in the wrapper; everything else in-kernel)
    half = T_DIM // 2
    freqs = jnp.exp(jnp.arange(half, dtype=f32) * (-math.log(10000.0) / (half - 1)))
    ang = freqs[:, None] * t_in.reshape(1, n).astype(f32)              # (half, N)
    emb_t = jnp.concatenate([jnp.sin(ang), jnp.cos(ang)], axis=0).astype(bf16)  # (T_DIM, N)

    # --- weight packing (PyTorch (out, in) layout is used directly: y = W @ x) ---
    wc = params["wc"]                                                  # (NB, HID, C_TOTAL)
    wc_r = jnp.einsum("bhk,kr->bhr", wc[:, :, :NP3], jnp.asarray(PROJ))  # fold point proj
    wc_rc = jnp.concatenate([wc_r, wc[:, :, NP3:NP3 + C_FEAT]], axis=-1).astype(bf16)
    wc_t = wc[:, :, NP3 + C_FEAT:].astype(bf16)                        # (NB, HID, T_DIM)
    bc = params["bc"][..., None].astype(f32)                           # (NB, HID, 1)

    tw1 = params["time_w1"].astype(bf16)
    tb1 = params["time_b1"].reshape(-1, 1).astype(f32)
    tw2 = params["time_w2"].astype(bf16)
    tb2 = params["time_b2"].reshape(-1, 1).astype(f32)
    wp = params["wp"].astype(f32)
    bp = params["bp"].reshape(-1, 1).astype(f32)
    w0 = params["w0"].astype(bf16)
    b0 = params["b0"][..., None].astype(f32)
    w1 = params["w1"].astype(bf16)
    b1 = params["b1"][..., None].astype(f32)
    wout = params["wout"].T.astype(f32)                                # (HID, 1)
    bout = params["bout"].reshape(1, 1).astype(f32)

    data_spec = lambda rows: pl.BlockSpec((rows, T_BLK), lambda i: (0, i))
    full = lambda shape: pl.BlockSpec(tuple(shape), lambda i, _s=len(shape): (0,) * _s)

    args = (p_t, rc_t, emb_t, tw1, tb1, tw2, tb2, wp, bp,
            wc_rc, wc_t, bc, w0, b0, w1, b1, wout, bout)

    bytes_accessed = int(sum(int(np.prod(a.shape)) * a.dtype.itemsize for a in args) + n * 4)
    flops = int(n * (2 * T_DIM * 2 * T_DIM * 2
                     + N_BLOCKS * 2 * HID * (9 + C_FEAT + T_DIM)
                     + N_BLOCKS * 2 * 2 * HID * HID
                     + 2 * HID * DIM + 2 * HID))
    transcendentals = int(n * 3 * 2 * T_DIM)   # exp / log / tanh in Mish

    out = pl.pallas_call(
        _decoder_kernel,
        out_shape=jax.ShapeDtypeStruct((1, n), f32),
        grid=(n_tiles,),
        in_specs=[
            data_spec(DIM),                 # p_t
            data_spec(9 + C_FEAT),          # rc_t (rotation + feature, bf16)
            data_spec(T_DIM),               # sinusoidal embedding (bf16)
            full(tw1.shape), full(tb1.shape),
            full(tw2.shape), full(tb2.shape),
            full(wp.shape), full(bp.shape),
            full(wc_rc.shape), full(wc_t.shape), full(bc.shape),
            full(w0.shape), full(b0.shape),
            full(w1.shape), full(b1.shape),
            full(wout.shape), full(bout.shape),
        ],
        out_specs=pl.BlockSpec((1, T_BLK), lambda i: (0, i)),          # lane-dense output
        compiler_params=pltpu.CompilerParams(dimension_semantics=("parallel",)),
        cost_estimate=pl.CostEstimate(flops=flops, transcendentals=transcendentals,
                                      bytes_accessed=bytes_accessed),
    )(*args)
    return out.reshape(bsz, s)


# ----------------------------------------------------------------------------
# Pure-JAX reference (same math; mirrors the kernel's bf16-on-MXU precision so
# the assert is tight -- the f32 PyTorch module deviates only by bf16 rounding).
# ----------------------------------------------------------------------------
def reference_forward(H_th, p, c_feat, t_in, params):
    f32, bf16 = jnp.float32, jnp.bfloat16
    bsz, s = t_in.shape
    points = jnp.asarray(POINTS)

    # 4x4 homogeneous padding adds zero translation -> p_ref = R @ points
    p_ref = jnp.einsum("bsij,nj->bsni", H_th, points).reshape(bsz, s, NP3)

    half = T_DIM // 2
    freqs = jnp.exp(jnp.arange(half, dtype=f32) * (-math.log(10000.0) / (half - 1)))
    ang = t_in.reshape(-1)[:, None] * freqs[None, :]
    emb = jnp.concatenate([jnp.sin(ang), jnp.cos(ang)], axis=-1)       # (B*S, T_DIM)

    def lin(x, w, b):   # nn.Linear with bf16 operands / f32 accumulation
        return jnp.dot(x.astype(bf16), w.T.astype(bf16),
                       preferred_element_type=f32) + b

    h = lin(emb, params["time_w1"], params["time_b1"])
    sp = jnp.maximum(h, 0.0) + jnp.log(1.0 + jnp.exp(-jnp.abs(h)))
    t_emb = lin(h * jnp.tanh(sp), params["time_w2"], params["time_b2"])
    t_emb = t_emb.reshape(bsz, s, T_DIM)

    c_full = jnp.concatenate([p_ref, c_feat.astype(f32), t_emb], axis=-1)   # (B,S,C_TOTAL)

    net = jnp.einsum("bsd,hd->bsh", p.astype(f32), params["wp"]) + params["bp"]
    for i in range(N_BLOCKS):
        net = net + lin(c_full, params["wc"][i], params["bc"][i])
        hb = lin(jnp.maximum(net, 0.0), params["w0"][i], params["b0"][i])
        dx = lin(jnp.maximum(hb, 0.0), params["w1"][i], params["b1"][i])
        net = net + dx
    out = jnp.einsum("bsh,oh->bso", jnp.maximum(net, 0.0), params["wout"]) + params["bout"]
    return out[..., 0]


# ----------------------------------------------------------------------------
# Deterministic parameter init (synthetic; PyTorch (out, in) weight layout).
# ----------------------------------------------------------------------------
def init_params(key):
    ks = jax.random.split(key, 14)
    sc = 0.1
    nrm = lambda k, shp: sc * jax.random.normal(k, shp, jnp.float32)
    return {
        "time_w1": nrm(ks[0], (2 * T_DIM, T_DIM)),
        "time_b1": nrm(ks[1], (2 * T_DIM,)),
        "time_w2": nrm(ks[2], (T_DIM, 2 * T_DIM)),
        "time_b2": nrm(ks[3], (T_DIM,)),
        "wp":   nrm(ks[4], (HID, DIM)),
        "bp":   nrm(ks[5], (HID,)),
        "wc":   nrm(ks[6], (N_BLOCKS, HID, C_TOTAL)),
        "bc":   nrm(ks[7], (N_BLOCKS, HID)),
        "w0":   nrm(ks[8], (N_BLOCKS, HID, HID)),
        "b0":   nrm(ks[9], (N_BLOCKS, HID)),
        "w1":   nrm(ks[10], (N_BLOCKS, HID, HID)),
        "b1":   nrm(ks[11], (N_BLOCKS, HID)),
        "wout": nrm(ks[12], (OUT_DIM, HID)),
        "bout": nrm(ks[13], (OUT_DIM,)),
    }


if __name__ == "__main__":
    key = jax.random.PRNGKey(0)
    k_r, k_p, k_c, k_t, k_par = jax.random.split(key, 5)

    # Random SO(3) rotations per sample via unit quaternions: H_th (B, S, 3, 3)
    q = jax.random.normal(k_r, (B, S, 4), jnp.float32)
    q = q / jnp.linalg.norm(q, axis=-1, keepdims=True)
    qw, qx, qy, qz = q[..., 0], q[..., 1], q[..., 2], q[..., 3]
    H_th = jnp.stack([
        jnp.stack([1 - 2 * (qy * qy + qz * qz), 2 * (qx * qy - qw * qz),
                   2 * (qx * qz + qw * qy)], axis=-1),
        jnp.stack([2 * (qx * qy + qw * qz), 1 - 2 * (qx * qx + qz * qz),
                   2 * (qy * qz - qw * qx)], axis=-1),
        jnp.stack([2 * (qx * qz - qw * qy), 2 * (qy * qz + qw * qx),
                   1 - 2 * (qx * qx + qy * qy)], axis=-1),
    ], axis=-2)

    p = jax.random.uniform(k_p, (B, S, DIM), jnp.float32, -0.5, 0.5)      # query points
    c_feat = jax.random.normal(k_c, (B, S, C_FEAT), jnp.float32)          # conditioning feature
    t_in = jax.random.uniform(k_t, (B, S), jnp.float32, 0.0, 1.0)         # diffusion time
    params = init_params(k_par)

    fwd = jax.jit(so3_time_local_decoder_forward)
    out = jax.block_until_ready(fwd(H_th, p, c_feat, t_in, params))
    assert out.shape == (B, S), out.shape

    ref = jax.block_until_ready(reference_forward(H_th, p, c_feat, t_in, params))
    np.testing.assert_allclose(np.asarray(out), np.asarray(ref), rtol=2e-2, atol=2e-2)
    print("KERNEL_OK")
</pallas_src>

<mosaic_0001>
module attributes {stable_mosaic.version = 11 : i64} {
  func.func @_decoder_kernel(%arg0: i32, %arg1: memref<3x128xf32, #tpu.memory_space<vmem>>, %arg2: memref<41x128xbf16, #tpu.memory_space<vmem>>, %arg3: memref<16x128xbf16, #tpu.memory_space<vmem>>, %arg4: memref<32x16xbf16, #tpu.memory_space<vmem>>, %arg5: memref<32x1xf32, #tpu.memory_space<vmem>>, %arg6: memref<16x32xbf16, #tpu.memory_space<vmem>>, %arg7: memref<16x1xf32, #tpu.memory_space<vmem>>, %arg8: memref<64x3xf32, #tpu.memory_space<vmem>>, %arg9: memref<64x1xf32, #tpu.memory_space<vmem>>, %arg10: memref<5x64x41xbf16, #tpu.memory_space<vmem>>, %arg11: memref<5x64x16xbf16, #tpu.memory_space<vmem>>, %arg12: memref<5x64x1xf32, #tpu.memory_space<vmem>>, %arg13: memref<5x64x64xbf16, #tpu.memory_space<vmem>>, %arg14: memref<5x64x1xf32, #tpu.memory_space<vmem>>, %arg15: memref<5x64x64xbf16, #tpu.memory_space<vmem>>, %arg16: memref<5x64x1xf32, #tpu.memory_space<vmem>>, %arg17: memref<64x1xf32, #tpu.memory_space<vmem>>, %arg18: memref<1x1xf32, #tpu.memory_space<vmem>>, %arg19: memref<1x128xf32, #tpu.memory_space<vmem>>) attributes {dimension_semantics = [#tpu.dimension_semantics<parallel>], iteration_bounds = array<i64: 2>, scalar_prefetch = 0 : i64, scratch_operands = 0 : i64, tpu.core_type = #tpu.core_type<tc>, window_params = [{transform_indices = @transform_0, window_bounds = array<i64: 3, 128>}, {transform_indices = @transform_1, window_bounds = array<i64: 41, 128>}, {transform_indices = @transform_2, window_bounds = array<i64: 16, 128>}, {pipeline_mode = #tpu.pipeline_mode<synchronous>, transform_indices = @transform_3, window_bounds = array<i64: 32, 16>}, {pipeline_mode = #tpu.pipeline_mode<synchronous>, transform_indices = @transform_4, window_bounds = array<i64: 32, 1>}, {pipeline_mode = #tpu.pipeline_mode<synchronous>, transform_indices = @transform_5, window_bounds = array<i64: 16, 32>}, {pipeline_mode = #tpu.pipeline_mode<synchronous>, transform_indices = @transform_6, window_bounds = array<i64: 16, 1>}, {pipeline_mode = #tpu.pipeline_mode<synchronous>, transform_indices = @transform_7, window_bounds = array<i64: 64, 3>}, {pipeline_mode = #tpu.pipeline_mode<synchronous>, transform_indices = @transform_8, window_bounds = array<i64: 64, 1>}, {pipeline_mode = #tpu.pipeline_mode<synchronous>, transform_indices = @transform_9, window_bounds = array<i64: 5, 64, 41>}, {pipeline_mode = #tpu.pipeline_mode<synchronous>, transform_indices = @transform_10, window_bounds = array<i64: 5, 64, 16>}, {pipeline_mode = #tpu.pipeline_mode<synchronous>, transform_indices = @transform_11, window_bounds = array<i64: 5, 64, 1>}, {pipeline_mode = #tpu.pipeline_mode<synchronous>, transform_indices = @transform_12, window_bounds = array<i64: 5, 64, 64>}, {pipeline_mode = #tpu.pipeline_mode<synchronous>, transform_indices = @transform_13, window_bounds = array<i64: 5, 64, 1>}, {pipeline_mode = #tpu.pipeline_mode<synchronous>, transform_indices = @transform_14, window_bounds = array<i64: 5, 64, 64>}, {pipeline_mode = #tpu.pipeline_mode<synchronous>, transform_indices = @transform_15, window_bounds = array<i64: 5, 64, 1>}, {pipeline_mode = #tpu.pipeline_mode<synchronous>, transform_indices = @transform_16, window_bounds = array<i64: 64, 1>}, {pipeline_mode = #tpu.pipeline_mode<synchronous>, transform_indices = @transform_17, window_bounds = array<i64: 1, 1>}, {transform_indices = @transform_18, window_bounds = array<i64: 1, 128>}]} {
    %c0 = arith.constant 0 : index
    %c0_0 = arith.constant 0 : index
    %0 = vector.load %arg4[%c0, %c0_0] : memref<32x16xbf16, #tpu.memory_space<vmem>>, vector<32x16xbf16>
    %c0_1 = arith.constant 0 : index
    %c0_2 = arith.constant 0 : index
    %1 = vector.load %arg3[%c0_1, %c0_2] : memref<16x128xbf16, #tpu.memory_space<vmem>>, vector<16x128xbf16>
    %cst = arith.constant dense<0.000000e+00> : vector<32x128xf32>
    %2 = tpu.matmul %0, %1, %cst {dimension_numbers = #tpu.dot_dimension_numbers<[1], [0], [0], [1], [0, 0, 1, 1], [], []>} : vector<32x16xbf16>, vector<16x128xbf16>, vector<32x128xf32> -> vector<32x128xf32>
    %c0_3 = arith.constant 0 : index
    %c0_4 = arith.constant 0 : index
    %3 = vector.load %arg5[%c0_3, %c0_4] : memref<32x1xf32, #tpu.memory_space<vmem>>, vector<32x1xf32>
    %4 = vector.broadcast %3 : vector<32x1xf32> to vector<32x128xf32>
    %5 = arith.addf %2, %4 : vector<32x128xf32>
    %cst_5 = arith.constant 0.000000e+00 : f32
    %6 = vector.broadcast %cst_5 : f32 to vector<32x128xf32>
    %7 = arith.maximumf %5, %6 : vector<32x128xf32>
    %8 = math.absf %5 : vector<32x128xf32>
    %cst_6 = arith.constant 0.000000e+00 : f32
    %9 = vector.broadcast %cst_6 : f32 to vector<32x128xf32>
    %10 = arith.subf %9, %8 : vector<32x128xf32>
    %11 = math.exp %10 : vector<32x128xf32>
    %cst_7 = arith.constant 1.000000e+00 : f32
    %12 = vector.broadcast %cst_7 : f32 to vector<32x128xf32>
    %13 = arith.addf %12, %11 : vector<32x128xf32>
    %14 = math.log %13 : vector<32x128xf32>
    %15 = arith.addf %7, %14 : vector<32x128xf32>
    %16 = math.tanh %15 : vector<32x128xf32>
    %17 = arith.mulf %5, %16 : vector<32x128xf32>
    %c0_8 = arith.constant 0 : index
    %c0_9 = arith.constant 0 : index
    %18 = vector.load %arg6[%c0_8, %c0_9] : memref<16x32xbf16, #tpu.memory_space<vmem>>, vector<16x32xbf16>
    %19 = arith.truncf %17 : vector<32x128xf32> to vector<32x128xbf16>
    %cst_10 = arith.constant dense<0.000000e+00> : vector<16x128xf32>
    %20 = tpu.matmul %18, %19, %cst_10 {dimension_numbers = #tpu.dot_dimension_numbers<[1], [0], [0], [1], [0, 0, 1, 1], [], []>} : vector<16x32xbf16>, vector<32x128xbf16>, vector<16x128xf32> -> vector<16x128xf32>
    %c0_11 = arith.constant 0 : index
    %c0_12 = arith.constant 0 : index
    %21 = vector.load %arg7[%c0_11, %c0_12] : memref<16x1xf32, #tpu.memory_space<vmem>>, vector<16x1xf32>
    %22 = vector.broadcast %21 : vector<16x1xf32> to vector<16x128xf32>
    %23 = arith.addf %20, %22 : vector<16x128xf32>
    %24 = arith.truncf %23 : vector<16x128xf32> to vector<16x128xbf16>
    %c0_13 = arith.constant 0 : index
    %c0_14 = arith.constant 0 : index
    %25 = vector.load %arg2[%c0_13, %c0_14] : memref<41x128xbf16, #tpu.memory_space<vmem>>, vector<41x128xbf16>
    %c0_15 = arith.constant 0 : index
    %c0_16 = arith.constant 0 : index
    %26 = vector.load %arg1[%c0_15, %c0_16] : memref<3x128xf32, #tpu.memory_space<vmem>>, vector<3x128xf32>
    %c0_17 = arith.constant 0 : index
    %c0_18 = arith.constant 0 : index
    %27 = vector.load %arg8[%c0_17, %c0_18] : memref<64x3xf32, #tpu.memory_space<vmem>>, vector<64x3xf32>
    %28 = vector.extract_strided_slice %27 {offsets = [0, 0], sizes = [64, 1], strides = [1, 1]} : vector<64x3xf32> to vector<64x1xf32>
    %29 = vector.extract_strided_slice %26 {offsets = [0, 0], sizes = [1, 128], strides = [1, 1]} : vector<3x128xf32> to vector<1x128xf32>
    %30 = vector.broadcast %28 : vector<64x1xf32> to vector<64x128xf32>
    %31 = vector.broadcast %29 : vector<1x128xf32> to vector<64x128xf32>
    %32 = arith.mulf %30, %31 : vector<64x128xf32>
    %33 = vector.extract_strided_slice %27 {offsets = [0, 1], sizes = [64, 1], strides = [1, 1]} : vector<64x3xf32> to vector<64x1xf32>
    %34 = vector.extract_strided_slice %26 {offsets = [1, 0], sizes = [1, 128], strides = [1, 1]} : vector<3x128xf32> to vector<1x128xf32>
    %35 = vector.broadcast %33 : vector<64x1xf32> to vector<64x128xf32>
    %36 = vector.broadcast %34 : vector<1x128xf32> to vector<64x128xf32>
    %37 = arith.mulf %35, %36 : vector<64x128xf32>
    %38 = arith.addf %32, %37 : vector<64x128xf32>
    %39 = vector.extract_strided_slice %27 {offsets = [0, 2], sizes = [64, 1], strides = [1, 1]} : vector<64x3xf32> to vector<64x1xf32>
    %40 = vector.extract_strided_slice %26 {offsets = [2, 0], sizes = [1, 128], strides = [1, 1]} : vector<3x128xf32> to vector<1x128xf32>
    %41 = vector.broadcast %39 : vector<64x1xf32> to vector<64x128xf32>
    %42 = vector.broadcast %40 : vector<1x128xf32> to vector<64x128xf32>
    %43 = arith.mulf %41, %42 : vector<64x128xf32>
    %44 = arith.addf %38, %43 : vector<64x128xf32>
    %c0_19 = arith.constant 0 : index
    %c0_20 = arith.constant 0 : index
    %45 = vector.load %arg9[%c0_19, %c0_20] : memref<64x1xf32, #tpu.memory_space<vmem>>, vector<64x1xf32>
    %46 = vector.broadcast %45 : vector<64x1xf32> to vector<64x128xf32>
    %47 = arith.addf %44, %46 : vector<64x128xf32>
    %c0_21 = arith.constant 0 : index
    %c0_22 = arith.constant 0 : index
    %c0_23 = arith.constant 0 : index
    %48 = vector.load %arg10[%c0_21, %c0_22, %c0_23] : memref<5x64x41xbf16, #tpu.memory_space<vmem>>, vector<1x64x41xbf16>
    %49 = vector.shape_cast %48 : vector<1x64x41xbf16> to vector<64x41xbf16>
    %cst_24 = arith.constant dense<0.000000e+00> : vector<64x128xf32>
    %50 = tpu.matmul %49, %25, %cst_24 {dimension_numbers = #tpu.dot_dimension_numbers<[1], [0], [0], [1], [0, 0, 1, 1], [], []>} : vector<64x41xbf16>, vector<41x128xbf16>, vector<64x128xf32> -> vector<64x128xf32>
    %c0_25 = arith.constant 0 : index
    %c0_26 = arith.constant 0 : index
    %c0_27 = arith.constant 0 : index
    %51 = vector.load %arg11[%c0_25, %c0_26, %c0_27] : memref<5x64x16xbf16, #tpu.memory_space<vmem>>, vector<1x64x16xbf16>
    %52 = vector.shape_cast %51 : vector<1x64x16xbf16> to vector<64x16xbf16>
    %cst_28 = arith.constant dense<0.000000e+00> : vector<64x128xf32>
    %53 = tpu.matmul %52, %24, %cst_28 {dimension_numbers = #tpu.dot_dimension_numbers<[1], [0], [0], [1], [0, 0, 1, 1], [], []>} : vector<64x16xbf16>, vector<16x128xbf16>, vector<64x128xf32> -> vector<64x128xf32>
    %54 = arith.addf %50, %53 : vector<64x128xf32>
    %c0_29 = arith.constant 0 : index
    %c0_30 = arith.constant 0 : index
    %c0_31 = arith.constant 0 : index
    %55 = vector.load %arg12[%c0_29, %c0_30, %c0_31] : memref<5x64x1xf32, #tpu.memory_space<vmem>>, vector<1x64x1xf32>
    %56 = vector.shape_cast %55 : vector<1x64x1xf32> to vector<64x1xf32>
    %57 = vector.broadcast %56 : vector<64x1xf32> to vector<64x128xf32>
    %58 = arith.addf %54, %57 : vector<64x128xf32>
    %59 = arith.addf %47, %58 : vector<64x128xf32>
    %c0_32 = arith.constant 0 : index
    %c0_33 = arith.constant 0 : index
    %c0_34 = arith.constant 0 : index
    %60 = vector.load %arg13[%c0_32, %c0_33, %c0_34] : memref<5x64x64xbf16, #tpu.memory_space<vmem>>, vector<1x64x64xbf16>
    %61 = vector.shape_cast %60 : vector<1x64x64xbf16> to vector<64x64xbf16>
    %cst_35 = arith.constant 0.000000e+00 : f32
    %62 = vector.broadcast %cst_35 : f32 to vector<64x128xf32>
    %63 = arith.maximumf %59, %62 : vector<64x128xf32>
    %64 = arith.truncf %63 : vector<64x128xf32> to vector<64x128xbf16>
    %cst_36 = arith.constant dense<0.000000e+00> : vector<64x128xf32>
    %65 = tpu.matmul %61, %64, %cst_36 {dimension_numbers = #tpu.dot_dimension_numbers<[1], [0], [0], [1], [0, 0, 1, 1], [], []>} : vector<64x64xbf16>, vector<64x128xbf16>, vector<64x128xf32> -> vector<64x128xf32>
    %c0_37 = arith.constant 0 : index
    %c0_38 = arith.constant 0 : index
    %c0_39 = arith.constant 0 : index
    %66 = vector.load %arg14[%c0_37, %c0_38, %c0_39] : memref<5x64x1xf32, #tpu.memory_space<vmem>>, vector<1x64x1xf32>
    %67 = vector.shape_cast %66 : vector<1x64x1xf32> to vector<64x1xf32>
    %68 = vector.broadcast %67 : vector<64x1xf32> to vector<64x128xf32>
    %69 = arith.addf %65, %68 : vector<64x128xf32>
    %c0_40 = arith.constant 0 : index
    %c0_41 = arith.constant 0 : index
    %c0_42 = arith.constant 0 : index
    %70 = vector.load %arg15[%c0_40, %c0_41, %c0_42] : memref<5x64x64xbf16, #tpu.memory_space<vmem>>, vector<1x64x64xbf16>
    %71 = vector.shape_cast %70 : vector<1x64x64xbf16> to vector<64x64xbf16>
    %cst_43 = arith.constant 0.000000e+00 : f32
    %72 = vector.broadcast %cst_43 : f32 to vector<64x128xf32>
    %73 = arith.maximumf %69, %72 : vector<64x128xf32>
    %74 = arith.truncf %73 : vector<64x128xf32> to vector<64x128xbf16>
    %cst_44 = arith.constant dense<0.000000e+00> : vector<64x128xf32>
    %75 = tpu.matmul %71, %74, %cst_44 {dimension_numbers = #tpu.dot_dimension_numbers<[1], [0], [0], [1], [0, 0, 1, 1], [], []>} : vector<64x64xbf16>, vector<64x128xbf16>, vector<64x128xf32> -> vector<64x128xf32>
    %c0_45 = arith.constant 0 : index
    %c0_46 = arith.constant 0 : index
    %c0_47 = arith.constant 0 : index
    %76 = vector.load %arg16[%c0_45, %c0_46, %c0_47] : memref<5x64x1xf32, #tpu.memory_space<vmem>>, vector<1x64x1xf32>
    %77 = vector.shape_cast %76 : vector<1x64x1xf32> to vector<64x1xf32>
    %78 = vector.broadcast %77 : vector<64x1xf32> to vector<64x128xf32>
    %79 = arith.addf %75, %78 : vector<64x128xf32>
    %80 = arith.addf %59, %79 : vector<64x128xf32>
    %c1 = arith.constant 1 : index
    %c0_48 = arith.constant 0 : index
    %c0_49 = arith.constant 0 : index
    %81 = vector.load %arg10[%c1, %c0_48, %c0_49] : memref<5x64x41xbf16, #tpu.memory_space<vmem>>, vector<1x64x41xbf16>
    %82 = vector.shape_cast %81 : vector<1x64x41xbf16> to vector<64x41xbf16>
    %cst_50 = arith.constant dense<0.000000e+00> : vector<64x128xf32>
    %83 = tpu.matmul %82, %25, %cst_50 {dimension_numbers = #tpu.dot_dimension_numbers<[1], [0], [0], [1], [0, 0, 1, 1], [], []>} : vector<64x41xbf16>, vector<41x128xbf16>, vector<64x128xf32> -> vector<64x128xf32>
    %c1_51 = arith.constant 1 : index
    %c0_52 = arith.constant 0 : index
    %c0_53 = arith.constant 0 : index
    %84 = vector.load %arg11[%c1_51, %c0_52, %c0_53] : memref<5x64x16xbf16, #tpu.memory_space<vmem>>, vector<1x64x16xbf16>
    %85 = vector.shape_cast %84 : vector<1x64x16xbf16> to vector<64x16xbf16>
    %cst_54 = arith.constant dense<0.000000e+00> : vector<64x128xf32>
    %86 = tpu.matmul %85, %24, %cst_54 {dimension_numbers = #tpu.dot_dimension_numbers<[1], [0], [0], [1], [0, 0, 1, 1], [], []>} : vector<64x16xbf16>, vector<16x128xbf16>, vector<64x128xf32> -> vector<64x128xf32>
    %87 = arith.addf %83, %86 : vector<64x128xf32>
    %c1_55 = arith.constant 1 : index
    %c0_56 = arith.constant 0 : index
    %c0_57 = arith.constant 0 : index
    %88 = vector.load %arg12[%c1_55, %c0_56, %c0_57] : memref<5x64x1xf32, #tpu.memory_space<vmem>>, vector<1x64x1xf32>
    %89 = vector.shape_cast %88 : vector<1x64x1xf32> to vector<64x1xf32>
    %90 = vector.broadcast %89 : vector<64x1xf32> to vector<64x128xf32>
    %91 = arith.addf %87, %90 : vector<64x128xf32>
    %92 = arith.addf %80, %91 : vector<64x128xf32>
    %c1_58 = arith.constant 1 : index
    %c0_59 = arith.constant 0 : index
    %c0_60 = arith.constant 0 : index
    %93 = vector.load %arg13[%c1_58, %c0_59, %c0_60] : memref<5x64x64xbf16, #tpu.memory_space<vmem>>, vector<1x64x64xbf16>
    %94 = vector.shape_cast %93 : vector<1x64x64xbf16> to vector<64x64xbf16>
    %cst_61 = arith.constant 0.000000e+00 : f32
    %95 = vector.broadcast %cst_61 : f32 to vector<64x128xf32>
    %96 = arith.maximumf %92, %95 : vector<64x128xf32>
    %97 = arith.truncf %96 : vector<64x128xf32> to vector<64x128xbf16>
    %cst_62 = arith.constant dense<0.000000e+00> : vector<64x128xf32>
    %98 = tpu.matmul %94, %97, %cst_62 {dimension_numbers = #tpu.dot_dimension_numbers<[1], [0], [0], [1], [0, 0, 1, 1], [], []>} : vector<64x64xbf16>, vector<64x128xbf16>, vector<64x128xf32> -> vector<64x128xf32>
    %c1_63 = arith.constant 1 : index
    %c0_64 = arith.constant 0 : index
    %c0_65 = arith.constant 0 : index
    %99 = vector.load %arg14[%c1_63, %c0_64, %c0_65] : memref<5x64x1xf32, #tpu.memory_space<vmem>>, vector<1x64x1xf32>
    %100 = vector.shape_cast %99 : vector<1x64x1xf32> to vector<64x1xf32>
    %101 = vector.broadcast %100 : vector<64x1xf32> to vector<64x128xf32>
    %102 = arith.addf %98, %101 : vector<64x128xf32>
    %c1_66 = arith.constant 1 : index
    %c0_67 = arith.constant 0 : index
    %c0_68 = arith.constant 0 : index
    %103 = vector.load %arg15[%c1_66, %c0_67, %c0_68] : memref<5x64x64xbf16, #tpu.memory_space<vmem>>, vector<1x64x64xbf16>
    %104 = vector.shape_cast %103 : vector<1x64x64xbf16> to vector<64x64xbf16>
    %cst_69 = arith.constant 0.000000e+00 : f32
    %105 = vector.broadcast %cst_69 : f32 to vector<64x128xf32>
    %106 = arith.maximumf %102, %105 : vector<64x128xf32>
    %107 = arith.truncf %106 : vector<64x128xf32> to vector<64x128xbf16>
    %cst_70 = arith.constant dense<0.000000e+00> : vector<64x128xf32>
    %108 = tpu.matmul %104, %107, %cst_70 {dimension_numbers = #tpu.dot_dimension_numbers<[1], [0], [0], [1], [0, 0, 1, 1], [], []>} : vector<64x64xbf16>, vector<64x128xbf16>, vector<64x128xf32> -> vector<64x128xf32>
    %c1_71 = arith.constant 1 : index
    %c0_72 = arith.constant 0 : index
    %c0_73 = arith.constant 0 : index
    %109 = vector.load %arg16[%c1_71, %c0_72, %c0_73] : memref<5x64x1xf32, #tpu.memory_space<vmem>>, vector<1x64x1xf32>
    %110 = vector.shape_cast %109 : vector<1x64x1xf32> to vector<64x1xf32>
    %111 = vector.broadcast %110 : vector<64x1xf32> to vector<64x128xf32>
    %112 = arith.addf %108, %111 : vector<64x128xf32>
    %113 = arith.addf %92, %112 : vector<64x128xf32>
    %c2 = arith.constant 2 : index
    %c0_74 = arith.constant 0 : index
    %c0_75 = arith.constant 0 : index
    %114 = vector.load %arg10[%c2, %c0_74, %c0_75] : memref<5x64x41xbf16, #tpu.memory_space<vmem>>, vector<1x64x41xbf16>
    %115 = vector.shape_cast %114 : vector<1x64x41xbf16> to vector<64x41xbf16>
    %cst_76 = arith.constant dense<0.000000e+00> : vector<64x128xf32>
    %116 = tpu.matmul %115, %25, %cst_76 {dimension_numbers = #tpu.dot_dimension_numbers<[1], [0], [0], [1], [0, 0, 1, 1], [], []>} : vector<64x41xbf16>, vector<41x128xbf16>, vector<64x128xf32> -> vector<64x128xf32>
    %c2_77 = arith.constant 2 : index
    %c0_78 = arith.constant 0 : index
    %c0_79 = arith.constant 0 : index
    %117 = vector.load %arg11[%c2_77, %c0_78, %c0_79] : memref<5x64x16xbf16, #tpu.memory_space<vmem>>, vector<1x64x16xbf16>
    %118 = vector.shape_cast %117 : vector<1x64x16xbf16> to vector<64x16xbf16>
    %cst_80 = arith.constant dense<0.000000e+00> : vector<64x128xf32>
    %119 = tpu.matmul %118, %24, %cst_80 {dimension_numbers = #tpu.dot_dimension_numbers<[1], [0], [0], [1], [0, 0, 1, 1], [], []>} : vector<64x16xbf16>, vector<16x128xbf16>, vector<64x128xf32> -> vector<64x128xf32>
    %120 = arith.addf %116, %119 : vector<64x128xf32>
    %c2_81 = arith.constant 2 : index
    %c0_82 = arith.constant 0 : index
    %c0_83 = arith.constant 0 : index
    %121 = vector.load %arg12[%c2_81, %c0_82, %c0_83] : memref<5x64x1xf32, #tpu.memory_space<vmem>>, vector<1x64x1xf32>
    %122 = vector.shape_cast %121 : vector<1x64x1xf32> to vector<64x1xf32>
    %123 = vector.broadcast %122 : vector<64x1xf32> to vector<64x128xf32>
    %124 = arith.addf %120, %123 : vector<64x128xf32>
    %125 = arith.addf %113, %124 : vector<64x128xf32>
    %c2_84 = arith.constant 2 : index
    %c0_85 = arith.constant 0 : index
    %c0_86 = arith.constant 0 : index
    %126 = vector.load %arg13[%c2_84, %c0_85, %c0_86] : memref<5x64x64xbf16, #tpu.memory_space<vmem>>, vector<1x64x64xbf16>
    %127 = vector.shape_cast %126 : vector<1x64x64xbf16> to vector<64x64xbf16>
    %cst_87 = arith.constant 0.000000e+00 : f32
    %128 = vector.broadcast %cst_87 : f32 to vector<64x128xf32>
    %129 = arith.maximumf %125, %128 : vector<64x128xf32>
    %130 = arith.truncf %129 : vector<64x128xf32> to vector<64x128xbf16>
    %cst_88 = arith.constant dense<0.000000e+00> : vector<64x128xf32>
    %131 = tpu.matmul %127, %130, %cst_88 {dimension_numbers = #tpu.dot_dimension_numbers<[1], [0], [0], [1], [0, 0, 1, 1], [], []>} : vector<64x64xbf16>, vector<64x128xbf16>, vector<64x128xf32> -> vector<64x128xf32>
    %c2_89 = arith.constant 2 : index
    %c0_90 = arith.constant 0 : index
    %c0_91 = arith.constant 0 : index
    %132 = vector.load %arg14[%c2_89, %c0_90, %c0_91] : memref<5x64x1xf32, #tpu.memory_space<vmem>>, vector<1x64x1xf32>
    %133 = vector.shape_cast %132 : vector<1x64x1xf32> to vector<64x1xf32>
    %134 = vector.broadcast %133 : vector<64x1xf32> to vector<64x128xf32>
    %135 = arith.addf %131, %134 : vector<64x128xf32>
    %c2_92 = arith.constant 2 : index
    %c0_93 = arith.constant 0 : index
    %c0_94 = arith.constant 0 : index
    %136 = vector.load %arg15[%c2_92, %c0_93, %c0_94] : memref<5x64x64xbf16, #tpu.memory_space<vmem>>, vector<1x64x64xbf16>
    %137 = vector.shape_cast %136 : vector<1x64x64xbf16> to vector<64x64xbf16>
    %cst_95 = arith.constant 0.000000e+00 : f32
    %138 = vector.broadcast %cst_95 : f32 to vector<64x128xf32>
    %139 = arith.maximumf %135, %138 : vector<64x128xf32>
    %140 = arith.truncf %139 : vector<64x128xf32> to vector<64x128xbf16>
    %cst_96 = arith.constant dense<0.000000e+00> : vector<64x128xf32>
    %141 = tpu.matmul %137, %140, %cst_96 {dimension_numbers = #tpu.dot_dimension_numbers<[1], [0], [0], [1], [0, 0, 1, 1], [], []>} : vector<64x64xbf16>, vector<64x128xbf16>, vector<64x128xf32> -> vector<64x128xf32>
    %c2_97 = arith.constant 2 : index
    %c0_98 = arith.constant 0 : index
    %c0_99 = arith.constant 0 : index
    %142 = vector.load %arg16[%c2_97, %c0_98, %c0_99] : memref<5x64x1xf32, #tpu.memory_space<vmem>>, vector<1x64x1xf32>
    %143 = vector.shape_cast %142 : vector<1x64x1xf32> to vector<64x1xf32>
    %144 = vector.broadcast %143 : vector<64x1xf32> to vector<64x128xf32>
    %145 = arith.addf %141, %144 : vector<64x128xf32>
    %146 = arith.addf %125, %145 : vector<64x128xf32>
    %c3 = arith.constant 3 : index
    %c0_100 = arith.constant 0 : index
    %c0_101 = arith.constant 0 : index
    %147 = vector.load %arg10[%c3, %c0_100, %c0_101] : memref<5x64x41xbf16, #tpu.memory_space<vmem>>, vector<1x64x41xbf16>
    %148 = vector.shape_cast %147 : vector<1x64x41xbf16> to vector<64x41xbf16>
    %cst_102 = arith.constant dense<0.000000e+00> : vector<64x128xf32>
    %149 = tpu.matmul %148, %25, %cst_102 {dimension_numbers = #tpu.dot_dimension_numbers<[1], [0], [0], [1], [0, 0, 1, 1], [], []>} : vector<64x41xbf16>, vector<41x128xbf16>, vector<64x128xf32> -> vector<64x128xf32>
    %c3_103 = arith.constant 3 : index
    %c0_104 = arith.constant 0 : index
    %c0_105 = arith.constant 0 : index
    %150 = vector.load %arg11[%c3_103, %c0_104, %c0_105] : memref<5x64x16xbf16, #tpu.memory_space<vmem>>, vector<1x64x16xbf16>
    %151 = vector.shape_cast %150 : vector<1x64x16xbf16> to vector<64x16xbf16>
    %cst_106 = arith.constant dense<0.000000e+00> : vector<64x128xf32>
    %152 = tpu.matmul %151, %24, %cst_106 {dimension_numbers = #tpu.dot_dimension_numbers<[1], [0], [0], [1], [0, 0, 1, 1], [], []>} : vector<64x16xbf16>, vector<16x128xbf16>, vector<64x128xf32> -> vector<64x128xf32>
    %153 = arith.addf %149, %152 : vector<64x128xf32>
    %c3_107 = arith.constant 3 : index
    %c0_108 = arith.constant 0 : index
    %c0_109 = arith.constant 0 : index
    %154 = vector.load %arg12[%c3_107, %c0_108, %c0_109] : memref<5x64x1xf32, #tpu.memory_space<vmem>>, vector<1x64x1xf32>
    %155 = vector.shape_cast %154 : vector<1x64x1xf32> to vector<64x1xf32>
    %156 = vector.broadcast %155 : vector<64x1xf32> to vector<64x128xf32>
    %157 = arith.addf %153, %156 : vector<64x128xf32>
    %158 = arith.addf %146, %157 : vector<64x128xf32>
    %c3_110 = arith.constant 3 : index
    %c0_111 = arith.constant 0 : index
    %c0_112 = arith.constant 0 : index
    %159 = vector.load %arg13[%c3_110, %c0_111, %c0_112] : memref<5x64x64xbf16, #tpu.memory_space<vmem>>, vector<1x64x64xbf16>
    %160 = vector.shape_cast %159 : vector<1x64x64xbf16> to vector<64x64xbf16>
    %cst_113 = arith.constant 0.000000e+00 : f32
    %161 = vector.broadcast %cst_113 : f32 to vector<64x128xf32>
    %162 = arith.maximumf %158, %161 : vector<64x128xf32>
    %163 = arith.truncf %162 : vector<64x128xf32> to vector<64x128xbf16>
    %cst_114 = arith.constant dense<0.000000e+00> : vector<64x128xf32>
    %164 = tpu.matmul %160, %163, %cst_114 {dimension_numbers = #tpu.dot_dimension_numbers<[1], [0], [0], [1], [0, 0, 1, 1], [], []>} : vector<64x64xbf16>, vector<64x128xbf16>, vector<64x128xf32> -> vector<64x128xf32>
    %c3_115 = arith.constant 3 : index
    %c0_116 = arith.constant 0 : index
    %c0_117 = arith.constant 0 : index
    %165 = vector.load %arg14[%c3_115, %c0_116, %c0_117] : memref<5x64x1xf32, #tpu.memory_space<vmem>>, vector<1x64x1xf32>
    %166 = vector.shape_cast %165 : vector<1x64x1xf32> to vector<64x1xf32>
    %167 = vector.broadcast %166 : vector<64x1xf32> to vector<64x128xf32>
    %168 = arith.addf %164, %167 : vector<64x128xf32>
    %c3_118 = arith.constant 3 : index
    %c0_119 = arith.constant 0 : index
    %c0_120 = arith.constant 0 : index
    %169 = vector.load %arg15[%c3_118, %c0_119, %c0_120] : memref<5x64x64xbf16, #tpu.memory_space<vmem>>, vector<1x64x64xbf16>
    %170 = vector.shape_cast %169 : vector<1x64x64xbf16> to vector<64x64xbf16>
    %cst_121 = arith.constant 0.000000e+00 : f32
    %171 = vector.broadcast %cst_121 : f32 to vector<64x128xf32>
    %172 = arith.maximumf %168, %171 : vector<64x128xf32>
    %173 = arith.truncf %172 : vector<64x128xf32> to vector<64x128xbf16>
    %cst_122 = arith.constant dense<0.000000e+00> : vector<64x128xf32>
    %174 = tpu.matmul %170, %173, %cst_122 {dimension_numbers = #tpu.dot_dimension_numbers<[1], [0], [0], [1], [0, 0, 1, 1], [], []>} : vector<64x64xbf16>, vector<64x128xbf16>, vector<64x128xf32> -> vector<64x128xf32>
    %c3_123 = arith.constant 3 : index
    %c0_124 = arith.constant 0 : index
    %c0_125 = arith.constant 0 : index
    %175 = vector.load %arg16[%c3_123, %c0_124, %c0_125] : memref<5x64x1xf32, #tpu.memory_space<vmem>>, vector<1x64x1xf32>
    %176 = vector.shape_cast %175 : vector<1x64x1xf32> to vector<64x1xf32>
    %177 = vector.broadcast %176 : vector<64x1xf32> to vector<64x128xf32>
    %178 = arith.addf %174, %177 : vector<64x128xf32>
    %179 = arith.addf %158, %178 : vector<64x128xf32>
    %c4 = arith.constant 4 : index
    %c0_126 = arith.constant 0 : index
    %c0_127 = arith.constant 0 : index
    %180 = vector.load %arg10[%c4, %c0_126, %c0_127] : memref<5x64x41xbf16, #tpu.memory_space<vmem>>, vector<1x64x41xbf16>
    %181 = vector.shape_cast %180 : vector<1x64x41xbf16> to vector<64x41xbf16>
    %cst_128 = arith.constant dense<0.000000e+00> : vector<64x128xf32>
    %182 = tpu.matmul %181, %25, %cst_128 {dimension_numbers = #tpu.dot_dimension_numbers<[1], [0], [0], [1], [0, 0, 1, 1], [], []>} : vector<64x41xbf16>, vector<41x128xbf16>, vector<64x128xf32> -> vector<64x128xf32>
    %c4_129 = arith.constant 4 : index
    %c0_130 = arith.constant 0 : index
    %c0_131 = arith.constant 0 : index
    %183 = vector.load %arg11[%c4_129, %c0_130, %c0_131] : memref<5x64x16xbf16, #tpu.memory_space<vmem>>, vector<1x64x16xbf16>
    %184 = vector.shape_cast %183 : vector<1x64x16xbf16> to vector<64x16xbf16>
    %cst_132 = arith.constant dense<0.000000e+00> : vector<64x128xf32>
    %185 = tpu.matmul %184, %24, %cst_132 {dimension_numbers = #tpu.dot_dimension_numbers<[1], [0], [0], [1], [0, 0, 1, 1], [], []>} : vector<64x16xbf16>, vector<16x128xbf16>, vector<64x128xf32> -> vector<64x128xf32>
    %186 = arith.addf %182, %185 : vector<64x128xf32>
    %c4_133 = arith.constant 4 : index
    %c0_134 = arith.constant 0 : index
    %c0_135 = arith.constant 0 : index
    %187 = vector.load %arg12[%c4_133, %c0_134, %c0_135] : memref<5x64x1xf32, #tpu.memory_space<vmem>>, vector<1x64x1xf32>
    %188 = vector.shape_cast %187 : vector<1x64x1xf32> to vector<64x1xf32>
    %189 = vector.broadcast %188 : vector<64x1xf32> to vector<64x128xf32>
    %190 = arith.addf %186, %189 : vector<64x128xf32>
    %191 = arith.addf %179, %190 : vector<64x128xf32>
    %c4_136 = arith.constant 4 : index
    %c0_137 = arith.constant 0 : index
    %c0_138 = arith.constant 0 : index
    %192 = vector.load %arg13[%c4_136, %c0_137, %c0_138] : memref<5x64x64xbf16, #tpu.memory_space<vmem>>, vector<1x64x64xbf16>
    %193 = vector.shape_cast %192 : vector<1x64x64xbf16> to vector<64x64xbf16>
    %cst_139 = arith.constant 0.000000e+00 : f32
    %194 = vector.broadcast %cst_139 : f32 to vector<64x128xf32>
    %195 = arith.maximumf %191, %194 : vector<64x128xf32>
    %196 = arith.truncf %195 : vector<64x128xf32> to vector<64x128xbf16>
    %cst_140 = arith.constant dense<0.000000e+00> : vector<64x128xf32>
    %197 = tpu.matmul %193, %196, %cst_140 {dimension_numbers = #tpu.dot_dimension_numbers<[1], [0], [0], [1], [0, 0, 1, 1], [], []>} : vector<64x64xbf16>, vector<64x128xbf16>, vector<64x128xf32> -> vector<64x128xf32>
    %c4_141 = arith.constant 4 : index
    %c0_142 = arith.constant 0 : index
    %c0_143 = arith.constant 0 : index
    %198 = vector.load %arg14[%c4_141, %c0_142, %c0_143] : memref<5x64x1xf32, #tpu.memory_space<vmem>>, vector<1x64x1xf32>
    %199 = vector.shape_cast %198 : vector<1x64x1xf32> to vector<64x1xf32>
    %200 = vector.broadcast %199 : vector<64x1xf32> to vector<64x128xf32>
    %201 = arith.addf %197, %200 : vector<64x128xf32>
    %c4_144 = arith.constant 4 : index
    %c0_145 = arith.constant 0 : index
    %c0_146 = arith.constant 0 : index
    %202 = vector.load %arg15[%c4_144, %c0_145, %c0_146] : memref<5x64x64xbf16, #tpu.memory_space<vmem>>, vector<1x64x64xbf16>
    %203 = vector.shape_cast %202 : vector<1x64x64xbf16> to vector<64x64xbf16>
    %cst_147 = arith.constant 0.000000e+00 : f32
    %204 = vector.broadcast %cst_147 : f32 to vector<64x128xf32>
    %205 = arith.maximumf %201, %204 : vector<64x128xf32>
    %206 = arith.truncf %205 : vector<64x128xf32> to vector<64x128xbf16>
    %cst_148 = arith.constant dense<0.000000e+00> : vector<64x128xf32>
    %207 = tpu.matmul %203, %206, %cst_148 {dimension_numbers = #tpu.dot_dimension_numbers<[1], [0], [0], [1], [0, 0, 1, 1], [], []>} : vector<64x64xbf16>, vector<64x128xbf16>, vector<64x128xf32> -> vector<64x128xf32>
    %c4_149 = arith.constant 4 : index
    %c0_150 = arith.constant 0 : index
    %c0_151 = arith.constant 0 : index
    %208 = vector.load %arg16[%c4_149, %c0_150, %c0_151] : memref<5x64x1xf32, #tpu.memory_space<vmem>>, vector<1x64x1xf32>
    %209 = vector.shape_cast %208 : vector<1x64x1xf32> to vector<64x1xf32>
    %210 = vector.broadcast %209 : vector<64x1xf32> to vector<64x128xf32>
    %211 = arith.addf %207, %210 : vector<64x128xf32>
    %212 = arith.addf %191, %211 : vector<64x128xf32>
    %cst_152 = arith.constant 0.000000e+00 : f32
    %213 = vector.broadcast %cst_152 : f32 to vector<64x128xf32>
    %214 = arith.maximumf %212, %213 : vector<64x128xf32>
    %c0_153 = arith.constant 0 : index
    %c0_154 = arith.constant 0 : index
    %215 = vector.load %arg17[%c0_153, %c0_154] : memref<64x1xf32, #tpu.memory_space<vmem>>, vector<64x1xf32>
    %216 = vector.broadcast %215 : vector<64x1xf32> to vector<64x128xf32>
    %217 = arith.mulf %214, %216 : vector<64x128xf32>
    %cst_155 = arith.constant dense<0.000000e+00> : vector<128xf32>
    %218 = vector.multi_reduction <add>, %217, %cst_155 [0] : vector<64x128xf32> to vector<128xf32>
    %219 = vector.shape_cast %218 : vector<128xf32> to vector<1x128xf32>
    %c0_156 = arith.constant 0 : index
    %c0_157 = arith.constant 0 : index
    %220 = vector.load %arg18[%c0_156, %c0_157] : memref<1x1xf32, #tpu.memory_space<vmem>>, vector<1x1xf32>
    %221 = vector.broadcast %220 : vector<1x1xf32> to vector<1x128xf32>
    %222 = arith.addf %219, %221 : vector<1x128xf32>
    %c0_158 = arith.constant 0 : index
    %c0_159 = arith.constant 0 : index
    %223 = vector.load %arg19[%c0_158, %c0_159] : memref<1x128xf32, #tpu.memory_space<vmem>>, vector<1x128xf32>
    tpu.vector_store %arg19[%c0_158, %c0_159], %222 {strides = array<i32>} : memref<1x128xf32, #tpu.memory_space<vmem>>, vector<1x128xf32>,
    return
  }
  func.func @transform_0(%arg0: i32) -> (i32, i32) {
    %c0_i32 = arith.constant 0 : i32
    %c0_i32_0 = arith.constant 0 : i32
    return %c0_i32, %arg0 : i32, i32
  }
  func.func @transform_1(%arg0: i32) -> (i32, i32) {
    %c0_i32 = arith.constant 0 : i32
    %c0_i32_0 = arith.constant 0 : i32
    return %c0_i32, %arg0 : i32, i32
  }
  func.func @transform_2(%arg0: i32) -> (i32, i32) {
    %c0_i32 = arith.constant 0 : i32
    %c0_i32_0 = arith.constant 0 : i32
    return %c0_i32, %arg0 : i32, i32
  }
  func.func @transform_3(%arg0: i32) -> (i32, i32) {
    %c0_i32 = arith.constant 0 : i32
    %c0_i32_0 = arith.constant 0 : i32
    %c0_i32_1 = arith.constant 0 : i32
    return %c0_i32, %c0_i32_0 : i32, i32
  }
  func.func @transform_4(%arg0: i32) -> (i32, i32) {
    %c0_i32 = arith.constant 0 : i32
    %c0_i32_0 = arith.constant 0 : i32
    %c0_i32_1 = arith.constant 0 : i32
    return %c0_i32, %c0_i32_0 : i32, i32
  }
  func.func @transform_5(%arg0: i32) -> (i32, i32) {
    %c0_i32 = arith.constant 0 : i32
    %c0_i32_0 = arith.constant 0 : i32
    %c0_i32_1 = arith.constant 0 : i32
    return %c0_i32, %c0_i32_0 : i32, i32
  }
  func.func @transform_6(%arg0: i32) -> (i32, i32) {
    %c0_i32 = arith.constant 0 : i32
    %c0_i32_0 = arith.constant 0 : i32
    %c0_i32_1 = arith.constant 0 : i32
    return %c0_i32, %c0_i32_0 : i32, i32
  }
  func.func @transform_7(%arg0: i32) -> (i32, i32) {
    %c0_i32 = arith.constant 0 : i32
    %c0_i32_0 = arith.constant 0 : i32
    %c0_i32_1 = arith.constant 0 : i32
    return %c0_i32, %c0_i32_0 : i32, i32
  }
  func.func @transform_8(%arg0: i32) -> (i32, i32) {
    %c0_i32 = arith.constant 0 : i32
    %c0_i32_0 = arith.constant 0 : i32
    %c0_i32_1 = arith.constant 0 : i32
    return %c0_i32, %c0_i32_0 : i32, i32
  }
  func.func @transform_9(%arg0: i32) -> (i32, i32, i32) {
    %c0_i32 = arith.constant 0 : i32
    %c0_i32_0 = arith.constant 0 : i32
    %c0_i32_1 = arith.constant 0 : i32
    %c0_i32_2 = arith.constant 0 : i32
    return %c0_i32, %c0_i32_0, %c0_i32_1 : i32, i32, i32
  }
  func.func @transform_10(%arg0: i32) -> (i32, i32, i32) {
    %c0_i32 = arith.constant 0 : i32
    %c0_i32_0 = arith.constant 0 : i32
    %c0_i32_1 = arith.constant 0 : i32
    %c0_i32_2 = arith.constant 0 : i32
    return %c0_i32, %c0_i32_0, %c0_i32_1 : i32, i32, i32
  }
  func.func @transform_11(%arg0: i32) -> (i32, i32, i32) {
    %c0_i32 = arith.constant 0 : i32
    %c0_i32_0 = arith.constant 0 : i32
    %c0_i32_1 = arith.constant 0 : i32
    %c0_i32_2 = arith.constant 0 : i32
    return %c0_i32, %c0_i32_0, %c0_i32_1 : i32, i32, i32
  }
  func.func @transform_12(%arg0: i32) -> (i32, i32, i32) {
    %c0_i32 = arith.constant 0 : i32
    %c0_i32_0 = arith.constant 0 : i32
    %c0_i32_1 = arith.constant 0 : i32
    %c0_i32_2 = arith.constant 0 : i32
    return %c0_i32, %c0_i32_0, %c0_i32_1 : i32, i32, i32
  }
  func.func @transform_13(%arg0: i32) -> (i32, i32, i32) {
    %c0_i32 = arith.constant 0 : i32
    %c0_i32_0 = arith.constant 0 : i32
    %c0_i32_1 = arith.constant 0 : i32
    %c0_i32_2 = arith.constant 0 : i32
    return %c0_i32, %c0_i32_0, %c0_i32_1 : i32, i32, i32
  }
  func.func @transform_14(%arg0: i32) -> (i32, i32, i32) {
    %c0_i32 = arith.constant 0 : i32
    %c0_i32_0 = arith.constant 0 : i32
    %c0_i32_1 = arith.constant 0 : i32
    %c0_i32_2 = arith.constant 0 : i32
    return %c0_i32, %c0_i32_0, %c0_i32_1 : i32, i32, i32
  }
  func.func @transform_15(%arg0: i32) -> (i32, i32, i32) {
    %c0_i32 = arith.constant 0 : i32
    %c0_i32_0 = arith.constant 0 : i32
    %c0_i32_1 = arith.constant 0 : i32
    %c0_i32_2 = arith.constant 0 : i32
    return %c0_i32, %c0_i32_0, %c0_i32_1 : i32, i32, i32
  }
  func.func @transform_16(%arg0: i32) -> (i32, i32) {
    %c0_i32 = arith.constant 0 : i32
    %c0_i32_0 = arith.constant 0 : i32
    %c0_i32_1 = arith.constant 0 : i32
    return %c0_i32, %c0_i32_0 : i32, i32
  }
  func.func @transform_17(%arg0: i32) -> (i32, i32) {
    %c0_i32 = arith.constant 0 : i32
    %c0_i32_0 = arith.constant 0 : i32
    %c0_i32_1 = arith.constant 0 : i32
    return %c0_i32, %c0_i32_0 : i32, i32
  }
  func.func @transform_18(%arg0: i32) -> (i32, i32) {
    %c0_i32 = arith.constant 0 : i32
    %c0_i32_0 = arith.constant 0 : i32
    return %c0_i32, %arg0 : i32, i32
  }
}

</mosaic_0001>

<bundles_post_ra>
// kernel: so3_time_local_decoder_forward.1
= control target key start
LH: loop header
LB: loop body
LE: loop exit
PB: predicated region body
PF: predicated region fallthrough
CT: control target
= control target key end

     0   :  { %s7287_s0 = inlined_call_operand.vmem [shape: f32[3,256], index: 0, kind: input, shape index: {}]   ;;  %s7288_s1 = inlined_call_operand.vmem [shape: bf16[41,256], index: 1, kind: input, shape index: {}]   ;;  %s7289_s2 = inlined_call_operand.vmem [shape: bf16[16,256], index: 2, kind: input, shape index: {}]   ;;  %s7290_s3 = inlined_call_operand.vmem [shape: bf16[32,16], index: 3, kind: input, shape index: {}]   ;;  %s7291_s4 = inlined_call_operand.vmem [shape: f32[32,1], index: 4, kind: input, shape index: {}]   ;;  %s7292_s5 = inlined_call_operand.vmem [shape: bf16[16,32], index: 5, kind: input, shape index: {}]   ;;  %s7293_s6 = inlined_call_operand.vmem [shape: f32[16,1], index: 6, kind: input, shape index: {}]   ;;  %s7294_s7 = inlined_call_operand.vmem [shape: f32[64,3], index: 7, kind: input, shape index: {}]   ;;  %s7295_s8 = inlined_call_operand.vmem [shape: f32[64,1], index: 8, kind: input, shape index: {}]   ;;  %s7296_s9 = inlined_call_operand.vmem [shape: bf16[5,64,41], index: 9, kind: input, shape index: {}]   ;;  %s7297_s10 = inlined_call_operand.vmem [shape: bf16[5,64,16], index: 10, kind: input, shape index: {}]   ;;  %s7298_s11 = inlined_call_operand.vmem [shape: f32[5,64,1], index: 11, kind: input, shape index: {}]   ;;  %s7299_s12 = inlined_call_operand.vmem [shape: bf16[5,64,64], index: 12, kind: input, shape index: {}]   ;;  %s7300_s13 = inlined_call_operand.vmem [shape: f32[5,64,1], index: 13, kind: input, shape index: {}]   ;;  %s7301_s14 = inlined_call_operand.vmem [shape: bf16[5,64,64], index: 14, kind: input, shape index: {}]   ;;  %s7302_s15 = inlined_call_operand.vmem [shape: f32[5,64,1], index: 15, kind: input, shape index: {}]   ;;  %s7303_s16 = inlined_call_operand.vmem [shape: f32[64,1], index: 16, kind: input, shape index: {}]   ;;  %s7304_s17 = inlined_call_operand.<no memory space> [shape: f32[1,1], index: 17, kind: input, shape index: {}]   ;;  %s7305_s18 = inlined_call_operand.hbm [shape: f32[1,256], index: 18, kind: output, shape index: {}]  }
   0x1   :  { %7335 = sst [smem:[#allocation32_spill]] %s7287_s0  ;;  %v23_v0 = vstv %s7304_s17 }
   0x2   :  { %7336 = sst [smem:[#allocation33_spill]] %s7288_s1  ;;  %24 = vst [vmem:[#allocation2] sm:$0x1] %v23_v0 }
   0x3   :  { %7337 = sst [smem:[#allocation34_spill]] %s7289_s2 }
   0x4   :  { %7338 = sst [smem:[#allocation35_spill]] %s7290_s3 }
   0x5   :  { %25 = vsyncpa [#allocation6], 0 }
   0x6   :  { %27 = vsyncpa [#allocation6 + $0x1], 0  ;;  %s5826_s29 = smov 0   ;;  %s5828_s30 = smov 0  }
   0x7   :  { %s5830_s0 = smov 0   ;;  %s5832_s19 = smov 0  }
   0x8 LB: > { %7339 = sst [smem:[#allocation8_spill]] %s5707_s29  ;;  %s5847_s17 = sadd.s32 4294967295, %s5719_s19   ;;  %s5719_s19 = sphi %s5832_s19, %s7393_s19   ;;  %s5715_s0 = sphi %s5830_s0, %s7397_s0   ;;  %s5711_s30 = sphi %s5828_s30, %s7396_s30   ;;  %s5707_s29 = sphi %s5826_s29, %s7395_s29  }
   0x9   : > { %s4466_s1 = sadd.s32 4294967294, %s5719_s19   ;;  %s5851_s20 = sadd.s32 1, %s5719_s19  }
   0xa   : > { %7340 = sst [smem:[#allocation9_spill]] %s5851_s20  ;;  %s66_s21 = sadd.s32 1, %s5715_s0 }
   0xb   : > { %s63_s22 = ssub.s32 %s5719_s19, %s5851_s20  ;;  %p73_p0 = scmp.ne.s32.totalorder %s5715_s0, %s5711_s30 }
   0xc   : > { %p64_p1 = scmp.eq.s32.totalorder %s63_s22, 0  ;;  %p74_p2 = scmp.eq.s32.totalorder %s5719_s19, 0 }
   0xd   : > { %p444_p3 = scmp.eq.s32.totalorder %s5847_s17, 1  ;;  %p449_p4 = scmp.ne.s32.totalorder %s5711_s30, %s5707_s29 }
   0xe   : > { %s5863_s2 = scalar_select %p64_p1, %s5715_s0, %s66_s21  }
   0xf   : > { %p5865_p5 = por %p74_p2, %p73_p0  ;;  %p5869_p6 = por %p444_p3, %p73_p0 }
  0x10   : > { %7341 = sst [smem:[#allocation10_spill]] %s5863_s2  ;;  %p450_p7 = scmp.eq.s32.totalorder %s4466_s1, 1 }
  0x11   : > { %p4468_p9 = scmp.ge.s32.totalorder %s5719_s19, 2 }
  0x12   : > { %p5873_p8 = por %p450_p7, %p449_p4 }
  0x13   : > { %511 = sbr.rel (%p4468_p9) target bundleno = 51 (0x33), region = 76 }
  0x14   : > { %s7344_s25 = scalar_select %p5873_p8, 1, 0 }
  0x16   : > { %7345 = sst [smem:[#allocation11_spill]] %s7344_s25 }
  0x1a   : > { %521 = sbr.rel (!%p5865_p5) target bundleno = 40 (0x28), region = 84  ;;  %s523_s26 = sand.u32 (%p5865_p5), 1, %s5715_s0  }
  0x1b   : > { %s4469_s27 = sshll.u32 (%p5865_p5), %s5719_s19, 2  ;;  %s5480_s28 = smul.u32 (%p5865_p5), 24, %s523_s26 }
  0x1c   : > { %s7346_s1 = sld [smem:[#allocation33_spill]] (%p5865_p5) }
  0x1d   : > { %s525_s20 = scalar_lea.vmem (%p5865_p5), [#allocation3], %s5480_s28 }
  0x22   : > { %s527_s2 = scalar_lea.vmem %s7346_s1, %s4469_s27 }
  0x23   : > { %v543_v1 = vld [vmem:[%s527_s2] sm:$0xf]  ;;  %v545_v2 = vld [vmem:[%s527_s2 + $0x8] sm:$0xf]  ;;  %v547_v3 = vld [vmem:[%s527_s2 + $0x10] sm:$0xf] }
  0x24   : > { %v549_v4 = vld [vmem:[%s527_s2 + $0x18] sm:$0xf]  ;;  %v551_v5 = vld [vmem:[%s527_s2 + $0x20] sm:$0xf]  ;;  %544 = vst [vmem:[%s525_s20] sm:$0xf] %v543_v1 }
  0x25   : > { %546 = vst [vmem:[%s525_s20 + $0x4] sm:$0xf] %v545_v2  ;;  %548 = vst [vmem:[%s525_s20 + $0x8] sm:$0xf] %v547_v3  ;;  %v553_v6 = vld [vmem:[%s527_s2 + $0x28] sm:$0xf] }
  0x26   : > { %550 = vst [vmem:[%s525_s20 + $0xc] sm:$0xf] %v549_v4  ;;  %552 = vst [vmem:[%s525_s20 + $0x10] sm:$0xf] %v551_v5 }
  0x27   : > { %554 = vst [vmem:[%s525_s20 + $0x14] sm:$0xf] %v553_v6 }
  0x28 PF: > { %589 = sbr.rel (!%p5865_p5) target bundleno = 51 (0x33), region = 125  ;;  %s591_s26 = sand.u32 (%p5865_p5), 1, %s5715_s0  }
  0x29   : > { %s4471_s27 = sshll.u32 (%p5865_p5), %s5719_s19, 2  ;;  %s4470_s21 = sshll.u32 (%p5865_p5), %s591_s26, 3 }
  0x2a   : > { %s7347_s25 = sld [smem:[#allocation34_spill]] (%p5865_p5)  ;;  %s593_s29 = scalar_lea.vmem (%p5865_p5), [#allocation4], %s4470_s21 }
  0x30   : > { %s595_s28 = scalar_lea.vmem %s7347_s25, %s4471_s27 }
  0x31   : > { %v611_v7 = vld [vmem:[%s595_s28] sm:$0xf]  ;;  %v613_v8 = vld [vmem:[%s595_s28 + $0x8] sm:$0xf] }
  0x32   : > { %612 = vst [vmem:[%s593_s29] sm:$0xf] %v611_v7  ;;  %614 = vst [vmem:[%s593_s29 + $0x4] sm:$0xf] %v613_v8 }
  0x33 PF: > { %p4472_p10 = scmp.ge.s32.totalorder %s5719_s19, 1  ;;  %p640_p11 = scmp.lt.s32.totalorder %s5719_s19, 3 }
  0x35   : > { %p641_p12 = pnand %p4472_p10, %p640_p11 }
  0x37   : > { %644 = sbr.rel (%p641_p12) target bundleno = 3354 (0xd1a), region = 166 }
  0x3e   : > { %s5897_s20 = sand.u32 1, %s5711_s30   ;;  %s7348_s3 = sld [smem:[#allocation35_spill]]  ;;  %vm765_vm0 = vcmask 130048   ;;  %v5721_v12 = vmov 0   ;;  %v727_v13 = vld [vmem:[%s7291_s4 + $0x10] sm:$0xff]  ;;  %v728_v14 = vld [vmem:[%s7291_s4 + $0x18] sm:$0xff] }
  0x3f   : > { %s5481_s2 = smul.u32 24, %s5897_s20  ;;  %s4473_s23 = sshll.u32 %s5897_s20, 3  ;;  %5528 = vset.pattern.permute.xlu1 %v5721_v12  ;;  %5527 = vset.pattern.permute.xlu0 %v5721_v12  ;;  %v725_v15 = vld [vmem:[%s7291_s4] sm:$0xff]  ;;  %v870_v16 = vld [vmem:[%s7293_s6 + $0x8] sm:$0xff]  ;;  %v5722_v20 = vmov 2   ;;  %v5723_v21 = vmov 1  }
  0x40   : > { %s656_s29 = scalar_lea.vmem [#allocation4], %s4473_s23  ;;  %741 = vperm.xlu1 %5528, %v727_v13   ;;  %731 = vperm.xlu0 %5527, %v725_v15   ;;  %v726_v17 = vld [vmem:[%s7291_s4 + $0x8] sm:$0xff]  ;;  %v869_v18 = vld [vmem:[%s7293_s6] sm:$0xff]  ;;  %v942_v22 = vld [vmem:[%s7294_s7 + $0x18] sm:$0xff]  ;;  %v5724_v27 = vmov 0.0   ;;  %vm5725_vm1 = vmmov 0  }
  0x41   : > { %v5544_v10 = vld [vmem:[%s656_s29] sm:$0xff]   ;;  %s5908_s22 = scalar_lea.vmem [#allocation3], %s5481_s2  ;;  %v940_v19 = vld [vmem:[%s7294_s7 + $0x8] sm:$0xff]  ;;  %vm886_vm2 = vcmask 261120   ;;  %vm1322_vm3 = vcmask 1043456   ;;  %vm1323_vm4 = vcmask 1044480  }
  0x42   : > { %5018 = vmatprep.subr.bf16.mxu0 %v5544_v10  ;;  %v939_v23 = vld [vmem:[%s7294_s7] sm:$0xff]  ;;  %v941_v24 = vld [vmem:[%s7294_s7 + $0x10] sm:$0xff]  ;;  %v1104_v26 = vld [vmem:[%s7295_s8 + $0x8] sm:$0xff]  ;;  %vm1309_vm5 = vcmask 334848   ;;  %vm1546_vm6 = vcmask 523264   ;;  %p714_p13 = scmp.lt.s32.totalorder %s5847_s17, 1 }
  0x43   : > { %5019 = vmatpush3.bf16.msra.mxu0 %v5544_v10  ;;  %v1103_v25 = vld [vmem:[%s7295_s8] sm:$0xff]  ;;  %v944_v28 = vld [vmem:[%s7294_s7 + $0x28] sm:$0xff]  ;;  %v946_v30 = vld [vmem:[%s7294_s7 + $0x38] sm:$0xff]  ;;  %s7369_s2 = sld [smem:[#allocation32_spill]]  ;;  %s4869_s25 = sshll.u32 %s5847_s17, 4 }
  0x44   : > { %v5548_v9 = vld [vmem:[%s7348_s3] sm:$0xff]   ;;  %v5549_v11 = vld [vmem:[%s7348_s3 + $0x8] sm:$0xff]   ;;  %746 = vperm.xlu1 %5528, %v728_v14   ;;  %736 = vperm.xlu0 %5527, %v726_v17   ;;  %v1105_v33 = vld [vmem:[%s7295_s8 + $0x10] sm:$0xff]  ;;  %s715_s1 = scalar_select %p714_p13, %s5847_s17, 1 }
  0x45   : > { %5020 = vmatprep.mubr.msk.bf16.mxu0 %vm765_vm0, %v5548_v9  ;;  %5024 = vmatprep.subr.bf16.mxu0 %v5724_v27  ;;  %v1395_v29 = vld [vmem:[%s7298_s11 + $0x8] sm:$0xff]  ;;  %v943_v31 = vld [vmem:[%s7294_s7 + $0x20] sm:$0xff]  ;;  %v1106_v34 = vld [vmem:[%s7295_s8 + $0x18] sm:$0xff]  ;;  %s7243_s29 = scalar_lea.hbm %s7305_s18, %s4869_s25  ;;  %s4363_s27 = scalar_lea.sflag [#allocation6], %s5897_s20 }
  0x46   : > { %5021 = vmatmul.mubr.msk.bf16.vlgmr.msra.gmra.mrb[0].mxu0 %vm765_vm0, %v5549_v11  ;;  %v1394_v32 = vld [vmem:[%s7298_s11] sm:$0xff]  ;;  %v1397_v35 = vld [vmem:[%s7298_s11 + $0x18] sm:$0xff]  ;;  %v1396_v36 = vld [vmem:[%s7298_s11 + $0x10] sm:$0xff]  ;;  %s4474_s28 = sshll.u32 %s715_s1, 2  ;;  %s5727_s21 = smov [#allocation5]  }
  0x47   : > { %5028 = vmatprep.mubr.msk.bf16.mxu0 %vm5725_vm1, %v5724_v27  ;;  %v945_v37 = vld [vmem:[%s7294_s7 + $0x30] sm:$0xff]  ;;  %v1107_v38 = vld [vmem:[%s7295_s8 + $0x20] sm:$0xff]  ;;  %v1399_v39 = vld [vmem:[%s7298_s11 + $0x28] sm:$0xff]  ;;  %s5661_s1 = sshll.u32 %s5727_s21, 4  ;;  %s5662_s1 = int_to_ptr.vmem [resolvable:$false] %s5661_s1 }
  0x48   : > { %878 = vperm.xlu1 %5528, %v870_v16   ;;  %873 = vperm.xlu0 %5527, %v869_v18   ;;  %v1110_v40 = vld [vmem:[%s7295_s8 + $0x38] sm:$0xff]  ;;  %v1479_v42 = vld [vmem:[%s7300_s13 + $0x8] sm:$0xff]  ;;  %v1398_v45 = vld [vmem:[%s7298_s11 + $0x20] sm:$0xff] }
  0x49   : > { %v1401_v41 = vld [vmem:[%s7298_s11 + $0x38] sm:$0xff]  ;;  %v1108_v43 = vld [vmem:[%s7295_s8 + $0x28] sm:$0xff]  ;;  %v1109_v47 = vld [vmem:[%s7295_s8 + $0x30] sm:$0xff]  ;;  %s717_s26 = scalar_lea.vmem %s7369_s2, %s4474_s28  ;;  %s5663_s28 = scalar_lea.vmem %s5662_s1, 32 }
  0x4a   : > { %v1481_v44 = vld [vmem:[%s7300_s13 + $0x18] sm:$0xff]  ;;  %v1483_v46 = vld [vmem:[%s7300_s13 + $0x28] sm:$0xff]  ;;  %v1400_v49 = vld [vmem:[%s7298_s11 + $0x30] sm:$0xff] }
  0x4b   : > { %v1485_v48 = vld [vmem:[%s7300_s13 + $0x38] sm:$0xff]  ;;  %v1645_v52 = vld [vmem:[%s7302_s15 + $0x8] sm:$0xff]  ;;  %v1478_v53 = vld [vmem:[%s7300_s13] sm:$0xff] }
  0x4c   : > { %954 = vperm.xlu1 %5528, %v940_v19   ;;  %5531 = vset.pattern.permute.xlu0 %v5722_v20  ;;  %v1647_v57 = vld [vmem:[%s7302_s15 + $0x18] sm:$0xff]  ;;  %v1480_v61 = vld [vmem:[%s7300_s13 + $0x10] sm:$0xff]  ;;  %v4550_v6 = vld [vmem:[%s7298_s11 + $0x48] sm:$0xff] }
  0x4d   : > { %1056 = vperm.xlu0 %5531, %v940_v19   ;;  %v1482_v9 = vld [vmem:[%s7300_s13 + $0x20] sm:$0xff]  ;;  %v1649_v15 = vld [vmem:[%s7302_s15 + $0x28] sm:$0xff]  ;;  %v1484_v17 = vld [vmem:[%s7300_s13 + $0x30] sm:$0xff] }
  0x4e   : > { %v4552_v18 = vld [vmem:[%s7298_s11 + $0x58] sm:$0xff] }
  0x50   : > { %5529 = vset.pattern.permute.xlu1 %v5723_v21 }
  0x51   : > { %1004 = vperm.xlu1 %5529, %v940_v19   ;;  %1064 = vperm.xlu0 %5531, %v942_v22   ;;  %v1644_v19 = vld [vmem:[%s7302_s15] sm:$0xff] }
  0x55   : > { %5530 = vset.pattern.permute.xlu1 %v5722_v20  ;;  %5535 = vset.pattern.permute.xlu0 %v5723_v21 }
  0x56   : > { %1052 = vperm.xlu1 %5530, %v939_v23   ;;  %1000 = vperm.xlu0 %5535, %v939_v23  }
  0x5a   : > { %5532 = vset.pattern.permute.xlu1 %v5721_v12  ;;  %1008 = vperm.xlu0 %5535, %v941_v24  }
  0x5b   : > { %959 = vperm.xlu1 %5532, %v941_v24  }
  0x5e   : > { %1020 = vperm.xlu0 %5535, %v944_v28  }
  0x5f   : > { %964 = vperm.xlu1 %5532, %v942_v22  }
  0x62   : > { %1028 = vperm.xlu0 %5535, %v946_v30  }
  0x63   : > { %5533 = vset.pattern.permute.xlu1 %v5723_v21 }
  0x64   : > { %1012 = vperm.xlu1 %5533, %v942_v22  }
  0x66   : > { %5541 = vset.pattern.permute.xlu0 %v5721_v12 }
  0x67   : > { %949 = vperm.xlu0 %5541, %v939_v23  }
  0x68   : > { %5534 = vset.pattern.permute.xlu1 %v5722_v20 }
  0x69   : > { %1060 = vperm.xlu1 %5534, %v941_v24  }
  0x6b   : > { %1404 = vperm.xlu0 %5541, %v1394_v32  }
  0x6d   : > { %5536 = vset.pattern.permute.xlu1 %v5721_v12 }
  0x6e   : > { %1113 = vperm.xlu1 %5536, %v1103_v25  }
  0x6f   : > { %974 = vperm.xlu0 %5541, %v944_v28  }
  0x72   : > { %1118 = vperm.xlu1 %5536, %v1104_v26  }
  0x73   : > { %1123 = vperm.xlu0 %5541, %v1105_v33   ;;  %v4556_v33 = vld [vmem:[%s7298_s11 + $0x78] sm:$0xff] }
  0x76   : > { %1409 = vperm.xlu1 %5536, %v1395_v29  }
  0x77   : > { %1419 = vperm.xlu0 %5541, %v1397_v35   ;;  %v4566_v35 = vld [vmem:[%s7300_s13 + $0x48] sm:$0xff] }
  0x7a   : > { %969 = vperm.xlu1 %5536, %v943_v31  }
  0x7b   : > { %984 = vperm.xlu0 %5541, %v946_v30  }
  0x7e   : > { %5537 = vset.pattern.permute.xlu1 %v5723_v21 }
  0x7f   : > { %1016 = vperm.xlu1 %5537, %v943_v31   ;;  %1133 = vperm.xlu0 %5541, %v1107_v38  }
  0x83   : > { %5538 = vset.pattern.permute.xlu1 %v5722_v20  ;;  %1429 = vperm.xlu0 %5541, %v1399_v39  }
  0x84   : > { %1068 = vperm.xlu1 %5538, %v943_v31   ;;  %v4549_v31 = vld [vmem:[%s7298_s11 + $0x40] sm:$0xff] }
  0x87   : > { %1148 = vperm.xlu0 %5541, %v1110_v40  }
  0x88   : > { %1072 = vperm.xlu1 %5538, %v944_v28   ;;  %v4554_v28 = vld [vmem:[%s7298_s11 + $0x68] sm:$0xff] }
  0x8b   : > { %1439 = vperm.xlu0 %5541, %v1401_v41   ;;  %v4568_v41 = vld [vmem:[%s7300_s13 + $0x58] sm:$0xff] }
  0x8c   : > { %5539 = vset.pattern.permute.xlu1 %v5721_v12 }
  0x8d   : > { %1128 = vperm.xlu1 %5539, %v1106_v34   ;;  %v1648_v34 = vld [vmem:[%s7302_s15 + $0x20] sm:$0xff] }
  0x8f   : > { %1493 = vperm.xlu0 %5541, %v1479_v42  }
  0x91   : > { %1414 = vperm.xlu1 %5539, %v1396_v36   ;;  %v4551_v36 = vld [vmem:[%s7298_s11 + $0x50] sm:$0xff] }
  0x93   : > { %1503 = vperm.xlu0 %5541, %v1481_v44  }
  0x95   : > { %979 = vperm.xlu1 %5539, %v945_v37  }
  0x97   : > { %1513 = vperm.xlu0 %5541, %v1483_v46  }
  0x99   : > { %5540 = vset.pattern.permute.xlu1 %v5723_v21  ;;  %v1646_v21 = vld [vmem:[%s7302_s15 + $0x10] sm:$0xff] }
  0x9a   : > { %1024 = vperm.xlu1 %5540, %v945_v37  }
  0x9b   : > { %1523 = vperm.xlu0 %5541, %v1485_v48  }
  0x9e   : > { %5542 = vset.pattern.permute.xlu1 %v5722_v20  ;;  %v1651_v20 = vld [vmem:[%s7302_s15 + $0x38] sm:$0xff] }
  0x9f   : > { %1076 = vperm.xlu1 %5542, %v945_v37   ;;  %1659 = vperm.xlu0 %5541, %v1645_v52  }
  0xa3   : > { %1080 = vperm.xlu1 %5542, %v946_v30   ;;  %1669 = vperm.xlu0 %5541, %v1647_v57   ;;  %v4553_v57 = vld [vmem:[%s7298_s11 + $0x60] sm:$0xff] }
  0xa7   : > { %5543 = vset.pattern.permute.xlu1 %v5721_v12  ;;  %2025 = vperm.xlu0 %5541, %v4550_v6  }
  0xa8   : > { %1138 = vperm.xlu1 %5543, %v1108_v43  }
  0xab   : > { %1679 = vperm.xlu0 %5541, %v1649_v15  }
  0xac   : > { %1424 = vperm.xlu1 %5543, %v1398_v45   ;;  %v1650_v45 = vld [vmem:[%s7302_s15 + $0x30] sm:$0xff] }
  0xaf   : > { %2035 = vperm.xlu0 %5541, %v4552_v18  }
  0xb0   : > { %1143 = vperm.xlu1 %5543, %v1109_v47  }
  0xb3   : > { %1689 = vperm.xlu0 %5541, %v1651_v20   ;;  %v4591_v20 = vld [vmem:[%s7302_s15 + $0x50] sm:$0xff] }
  0xb4   : > { %1434 = vperm.xlu1 %5543, %v1400_v49  }
  0xb7   : > { %2045 = vperm.xlu0 %5541, %v4554_v28   ;;  %v4654_v28 = vld [vmem:[%s7300_s13 + $0x88] sm:$0xff] }
  0xb8   : > { %1488 = vperm.xlu1 %5543, %v1478_v53  }
  0xbb   : > { %2055 = vperm.xlu0 %5541, %v4556_v33  }
  0xbc   : > { %1498 = vperm.xlu1 %5543, %v1480_v61  }
  0xbf   : > { %v742_v50 = vpop.permute.xlu1 %741  ;;  %v732_v51 = vpop.permute.xlu0 %731  ;;  %2111 = vperm.xlu0 %5541, %v4566_v35   ;;  %v4658_v35 = vld [vmem:[%s7300_s13 + $0xa8] sm:$0xff] }
  0xc0   : > { %1508 = vperm.xlu1 %5543, %v1482_v9   ;;  %v4567_v9 = vld [vmem:[%s7300_s13 + $0x50] sm:$0xff] }
  0xc3   : > { %v747_v58 = vpop.permute.xlu1 %746  ;;  %v737_v62 = vpop.permute.xlu0 %736  ;;  %2121 = vperm.xlu0 %5541, %v4568_v41  }
  0xc4   : > { %1518 = vperm.xlu1 %5543, %v1484_v17   ;;  %v4589_v17 = vld [vmem:[%s7302_s15 + $0x40] sm:$0xff] }
  0xc7   : > { %v6115_v61 = vpop.permute.xlu1 %878 }
  0xc8   : > { %1654 = vperm.xlu1 %5543, %v1644_v19   ;;  %v4596_v19 = vld [vmem:[%s7302_s15 + $0x78] sm:$0xff] }
  0xcc   : > { %1664 = vperm.xlu1 %5543, %v1646_v21  }
  0xd0   : > { %2020 = vperm.xlu1 %5543, %v4549_v31  }
  0xd4   : > { %1674 = vperm.xlu1 %5543, %v1648_v34   ;;  %v4595_v34 = vld [vmem:[%s7302_s15 + $0x70] sm:$0xff] }
  0xd8   : > { %2030 = vperm.xlu1 %5543, %v4551_v36  }
  0xdc   : > { %1684 = vperm.xlu1 %5543, %v1650_v45   ;;  %v4680_v45 = vld [vmem:[%s7302_s15 + $0x98] sm:$0xff] }
  0xe0   : > { %2040 = vperm.xlu1 %5543, %v4553_v57   ;;  %v4728_v57 = vld [vmem:[%s7298_s11 + $0xd8] sm:$0xff] }
 0x119   : > { %v5022_v54 = vpop.f32.mrb[0].mxu0 }
 0x11a   : > { %v6033_v55 = vadd.f32 %v5022_v54, %v742_v50  ;;  %v806_v56 = vpop.f32.mrb[1].mxu0  ;;  %v4570_v54 = vld [vmem:[%s7300_s13 + $0x68] sm:$0xff] }
 0x11b   : > { %v6038_v59 = vadd.f32 %v806_v56, %v732_v51  ;;  %v5023_v60 = vpop.f32.mrb[2].mxu0  ;;  %2131 = vperm.xlu0 %5541, %v4570_v54   ;;  %v4659_v54 = vld [vmem:[%s7300_s13 + $0xb0] sm:$0xff] }
 0x11c   : > { %v827_v63 = vand.u32 2147483647, %v6033_v55  ;;  %v6044_v0 = vadd.f32 %v5023_v60, %v747_v58  ;;  %v809_v1 = vpop.f32.mrb[3].mxu0  ;;  %v823_v39 = vmax.f32 %v6033_v55, 0.0  ;;  %v4572_v58 = vld [vmem:[%s7300_s13 + $0x78] sm:$0xff]  ;;  %v4555_v60 = vld [vmem:[%s7298_s11 + $0x70] sm:$0xff] }
 0x11d   : > { %v825_v2 = vand.u32 2147483647, %v6038_v59  ;;  %v6047_v3 = vadd.f32 %v809_v1, %v737_v62  ;;  %v821_v43 = vmax.f32 %v6038_v59, 0.0  ;;  %2050 = vperm.xlu1 %5543, %v4555_v60   ;;  %v4590_v62 = vld [vmem:[%s7302_s15 + $0x48] sm:$0xff]  ;;  %v4677_v60 = vld [vmem:[%s7302_s15 + $0x80] sm:$0xff] }
 0x11e   : > { %v831_v4 = vsub.f32 0.0, %v827_v63  ;;  %v828_v5 = vand.u32 2147483647, %v6044_v0  ;;  %v824_v48 = vmax.f32 %v6044_v0, 0.0  ;;  %v4565_v63 = vld [vmem:[%s7300_s13 + $0x40] sm:$0xff] }
 0x11f   : > { %v829_v7 = vsub.f32 0.0, %v825_v2  ;;  %v826_v8 = vand.u32 2147483647, %v6047_v3  ;;  %v822_v51 = vmax.f32 %v6047_v3, 0.0  ;;  %2141 = vperm.xlu0 %5541, %v4572_v58  }
 0x120   : > { %v837_v10 = vmul.f32 1.442695, %v831_v4  ;;  %v832_v11 = vsub.f32 0.0, %v828_v5  ;;  %v4592_v5 = vld [vmem:[%s7302_s15 + $0x58] sm:$0xff] }
 0x121   : > { %v833_v12 = vmul.f32 1.442695, %v829_v7  ;;  %v830_v13 = vsub.f32 0.0, %v826_v8  ;;  %2106 = vperm.xlu1 %5543, %v4565_v63   ;;  %v4679_v63 = vld [vmem:[%s7302_s15 + $0x90] sm:$0xff] }
 0x122   : > { %5631 = vpow2.f32 %v837_v10  ;;  %v839_v14 = vmul.f32 1.442695, %v832_v11  ;;  %v6131_v10 = vpop.permute.xlu1 %954 }
 0x123   : > { %5633 = vpow2.f32 %v833_v12  ;;  %v835_v16 = vmul.f32 1.442695, %v830_v13  ;;  %2278 = vperm.xlu0 %5541, %v4590_v62   ;;  %v4684_v62 = vld [vmem:[%s7302_s15 + $0xb8] sm:$0xff] }
 0x124   : > { %5635 = vpow2.f32 %v839_v14 }
 0x125   : > { %5637 = vpow2.f32 %v835_v16  ;;  %2116 = vperm.xlu1 %5543, %v4567_v9   ;;  %v4571_v16 = vld [vmem:[%s7300_s13 + $0x70] sm:$0xff] }
 0x126   : > { %v6142_v15 = vpop.permute.xlu1 %1004 }
 0x127   : > { %2288 = vperm.xlu0 %5541, %v4592_v5   ;;  %v4725_v5 = vld [vmem:[%s7298_s11 + $0xc0] sm:$0xff] }
 0x12a   : > { %v6159_v18 = vpop.permute.xlu1 %1052 }
 0x12c   : > { %v5632_v22 = vpop.eup %5631 }
 0x12d   : > { %v5634_v23 = vpop.eup %5633  ;;  %v843_v24 = vadd.f32 1.0, %v5632_v22  ;;  %v4642_v22 = vld [vmem:[%s7298_s11 + $0xa8] sm:$0xff] }
 0x12e   : > { %v5636_v25 = vpop.eup %5635  ;;  %v841_v26 = vadd.f32 1.0, %v5634_v23  ;;  %v6167_v21 = vpop.permute.xlu1 %959  ;;  %v4637_v23 = vld [vmem:[%s7298_s11 + $0x80] sm:$0xff] }
 0x12f   : > { %v5638_v29 = vpop.eup %5637  ;;  %5639 = vlog2.f32 %v843_v24  ;;  %v844_v30 = vadd.f32 1.0, %v5636_v25  ;;  %v4644_v24 = vld [vmem:[%s7298_s11 + $0xb8] sm:$0xff]  ;;  %v4593_v25 = vld [vmem:[%s7302_s15 + $0x60] sm:$0xff] }
 0x130   : > { %5641 = vlog2.f32 %v841_v26  ;;  %v842_v32 = vadd.f32 1.0, %v5638_v29  ;;  %v6186_v29 = vpop.permute.xlu0 %873 }
 0x131   : > { %5643 = vlog2.f32 %v844_v30  ;;  %v4639_v30 = vld [vmem:[%s7298_s11 + $0x90] sm:$0xff] }
 0x132   : > { %5645 = vlog2.f32 %v842_v32  ;;  %v6181_v26 = vpop.permute.xlu1 %964  ;;  %v4656_v32 = vld [vmem:[%s7300_s13 + $0x98] sm:$0xff] }
 0x134   : > { %v6196_v33 = vpop.permute.xlu0 %1056 }
 0x136   : > { %v6191_v31 = vpop.permute.xlu1 %1012 }
 0x138   : > { %v6204_v36 = vpop.permute.xlu0 %1064 }
 0x139   : > { %v5640_v37 = vpop.eup %5639 }
 0x13a   : > { %v5642_v38 = vpop.eup %5641  ;;  %v850_v40 = vmul.f32 0.6931472, %v5640_v37  ;;  %v4641_v37 = vld [vmem:[%s7298_s11 + $0xa0] sm:$0xff] }
 0x13b   : > { %v5644_v42 = vpop.eup %5643  ;;  %v846_v44 = vmul.f32 0.6931472, %v5642_v38  ;;  %v6209_v38 = vpop.permute.xlu1 %1060 }
 0x13c   : > { %v5646_v46 = vpop.eup %5645  ;;  %v855_v47 = vadd.f32 %v850_v40, %v823_v39  ;;  %v852_v49 = vmul.f32 0.6931472, %v5644_v42  ;;  %v4660_v39 = vld [vmem:[%s7300_s13 + $0xb8] sm:$0xff]  ;;  %v4643_v40 = vld [vmem:[%s7298_s11 + $0xb0] sm:$0xff]  ;;  %v6217_v41 = vpop.permute.xlu0 %1000 }
 0x13d   : > { %v853_v50 = vadd.f32 %v846_v44, %v821_v43  ;;  %v848_v52 = vmul.f32 0.6931472, %v5646_v46  ;;  %v4678_v43 = vld [vmem:[%s7302_s15 + $0x88] sm:$0xff]  ;;  %v4653_v44 = vld [vmem:[%s7300_s13 + $0x80] sm:$0xff] }
 0x13e   : > { %5647 = vtanh.f32 %v855_v47  ;;  %v856_v53 = vadd.f32 %v852_v49, %v824_v48  ;;  %v4655_v47 = vld [vmem:[%s7300_s13 + $0x90] sm:$0xff]  ;;  %v4726_v49 = vld [vmem:[%s7298_s11 + $0xc8] sm:$0xff] }
 0x13f   : > { %5649 = vtanh.f32 %v853_v50  ;;  %v854_v56 = vadd.f32 %v848_v52, %v822_v51  ;;  %v6219_v42 = vpop.permute.xlu1 %1113  ;;  %v4657_v50 = vld [vmem:[%s7300_s13 + $0xa0] sm:$0xff] }
 0x140   : > { %5651 = vtanh.f32 %v856_v53  ;;  %v6230_v46 = vpop.permute.xlu0 %1008  ;;  %v4682_v53 = vld [vmem:[%s7302_s15 + $0xa8] sm:$0xff] }
 0x141   : > { %5653 = vtanh.f32 %v854_v56 }
 0x143   : > { %v6235_v48 = vpop.permute.xlu1 %1118 }
 0x144   : > { %v6245_v52 = vpop.permute.xlu0 %1020 }
 0x147   : > { %v6243_v51 = vpop.permute.xlu1 %1409 }
 0x148   : > { %v5648_v1 = vpop.eup %5647  ;;  %v6258_v58 = vpop.permute.xlu0 %1028 }
 0x149   : > { %v5650_v2 = vpop.eup %5649  ;;  %v863_v7 = vmul.f32 %v5648_v1, %v6033_v55  ;;  %v4638_v55 = vld [vmem:[%s7298_s11 + $0x88] sm:$0xff] }
 0x14a   : > { %v5652_v4 = vpop.eup %5651  ;;  %v861_v11 = vmul.f32 %v5650_v2, %v6038_v59  ;;  %2644 = vperm.xlu0 %5541, %v4638_v55   ;;  %v4594_v59 = vld [vmem:[%s7302_s15 + $0x68] sm:$0xff] }
 0x14b   : > { %v5654_v6 = vpop.eup %5653  ;;  %v864_v8 = vmul.f32 %v5652_v4, %v6044_v0  ;;  %v4569_v0 = vld [vmem:[%s7300_s13 + $0x60] sm:$0xff]  ;;  %v6253_v56 = vpop.permute.xlu1 %969  ;;  %v4730_v4 = vld [vmem:[%s7298_s11 + $0xe8] sm:$0xff] }
 0x14c   : > { %v862_v12 = vmul.f32 %v5654_v6, %v6047_v3  ;;  %2126 = vperm.xlu1 %5543, %v4569_v0   ;;  %v5550_v3 = vld [vmem:[%s7292_s5] sm:$0xff]   ;;  %v6271_v2 = vpop.permute.xlu0 %949 }
 0x14d   : > { %v868_v13 = vpack.c.bf16 %v864_v8, %v863_v7  ;;  %v4732_v7 = vld [vmem:[%s7298_s11 + $0xf8] sm:$0xff]  ;;  %v4681_v0 = vld [vmem:[%s7302_s15 + $0xa0] sm:$0xff] }
 0x14e   : > { %v867_v14 = vpack.c.bf16 %v862_v12, %v861_v11  ;;  %2298 = vperm.xlu0 %5541, %v4594_v59   ;;  %v4742_v59 = vld [vmem:[%s7300_s13 + $0xc8] sm:$0xff] }
 0x14f   : > { %v6269_v1 = vpop.permute.xlu1 %1016 }
 0x150   : > { %5025 = vmatpush3.bf16.msra.mxu0 %v867_v14  ;;  %2136 = vperm.xlu1 %5543, %v4571_v16   ;;  %v6284_v8 = vpop.permute.xlu0 %1404 }
 0x151   : > { %5026 = vmatprep.subr.bf16.mxu0 %v5724_v27  ;;  %v4640_v27 = vld [vmem:[%s7298_s11 + $0x98] sm:$0xff] }
 0x152   : > { %2654 = vperm.xlu0 %5541, %v4640_v27   ;;  %v4727_v27 = vld [vmem:[%s7298_s11 + $0xd0] sm:$0xff] }
 0x153   : > { %v6279_v6 = vpop.permute.xlu1 %1068 }
 0x154   : > { %5027 = vmatpush3.bf16.msra.mxu0 %v868_v13  ;;  %2273 = vperm.xlu1 %5543, %v4589_v17   ;;  %v6288_v11 = vpop.permute.xlu0 %974  ;;  %v4744_v17 = vld [vmem:[%s7300_s13 + $0xd8] sm:$0xff] }
 0x156   : > { %2308 = vperm.xlu0 %5541, %v4596_v19   ;;  %v4683_v19 = vld [vmem:[%s7302_s15 + $0xb0] sm:$0xff] }
 0x157   : > { %5029 = vmatmul.mubr.msk.bf16.vlgmr.msra.gmra.mrb[4].mxu0 %vm886_vm2, %v5550_v3  ;;  %v6286_v9 = vpop.permute.xlu1 %1072 }
 0x158   : > { %2283 = vperm.xlu1 %5543, %v4591_v20   ;;  %v6292_v13 = vpop.permute.xlu0 %1123  ;;  %v4746_v20 = vld [vmem:[%s7300_s13 + $0xe8] sm:$0xff] }
 0x15a   : > { %2664 = vperm.xlu0 %5541, %v4642_v22  }
 0x15b   : > { %v6290_v12 = vpop.permute.xlu1 %1128 }
 0x15c   : > { %2639 = vperm.xlu1 %5543, %v4637_v23   ;;  %v6296_v55 = vpop.permute.xlu0 %1419 }
 0x15e   : > { %2674 = vperm.xlu0 %5541, %v4644_v24   ;;  %v5551_v24 = vld [vmem:[%s7297_s10] sm:$0xff]  }
 0x15f   : > { %v6294_v14 = vpop.permute.xlu1 %1414  ;;  %5034 = vmatprep.mubr.msk.bf16.mxu0 %vm765_vm0, %v5551_v24  ;;  %v4769_v24 = vld [vmem:[%s7302_s15 + $0xe0] sm:$0xff] }
 0x160   : > { %2293 = vperm.xlu1 %5543, %v4593_v25   ;;  %v6306_v16 = vpop.permute.xlu0 %984  ;;  %v4729_v25 = vld [vmem:[%s7298_s11 + $0xe0] sm:$0xff] }
 0x162   : > { %2730 = vperm.xlu0 %5541, %v4654_v28   ;;  %v4748_v28 = vld [vmem:[%s7300_s13 + $0xf8] sm:$0xff] }
 0x163   : > { %v6304_v3 = vpop.permute.xlu1 %979 }
 0x164   : > { %2649 = vperm.xlu1 %5543, %v4639_v30   ;;  %v6322_v23 = vpop.permute.xlu0 %1133 }
 0x166   : > { %2740 = vperm.xlu0 %5541, %v4656_v32   ;;  %v4731_v32 = vld [vmem:[%s7298_s11 + $0xf0] sm:$0xff] }
 0x167   : > { %v6320_v22 = vpop.permute.xlu1 %1024 }
 0x168   : > { %2303 = vperm.xlu1 %5543, %v4595_v34   ;;  %v4766_v34 = vld [vmem:[%s7302_s15 + $0xc8] sm:$0xff] }
 0x16a   : > { %2750 = vperm.xlu0 %5541, %v4658_v35   ;;  %v6342_v35 = vpop.permute.xlu0 %1429 }
 0x16b   : > { %v6334_v30 = vpop.permute.xlu1 %1076 }
 0x16c   : > { %2659 = vperm.xlu1 %5543, %v4641_v37   ;;  %v4741_v37 = vld [vmem:[%s7300_s13 + $0xc0] sm:$0xff] }
 0x16e   : > { %2760 = vperm.xlu0 %5541, %v4660_v39   ;;  %v4768_v39 = vld [vmem:[%s7302_s15 + $0xd8] sm:$0xff] }
 0x170   : > { %2669 = vperm.xlu1 %5543, %v4643_v40   ;;  %v6350_v40 = vpop.permute.xlu1 %1080 }
 0x172   : > { %2897 = vperm.xlu0 %5541, %v4678_v43   ;;  %v6352_v43 = vpop.permute.xlu0 %1148 }
 0x174   : > { %2725 = vperm.xlu1 %5543, %v4653_v44   ;;  %v4743_v44 = vld [vmem:[%s7300_s13 + $0xd0] sm:$0xff] }
 0x176   : > { %2907 = vperm.xlu0 %5541, %v4680_v45   ;;  %v4814_v45 = vld [vmem:[%s7298_s11 + $0x108] sm:$0xff] }
 0x178   : > { %2735 = vperm.xlu1 %5543, %v4655_v47   ;;  %v6360_v47 = vpop.permute.xlu1 %1138 }
 0x17a   : > { %3263 = vperm.xlu0 %5541, %v4726_v49   ;;  %v6362_v49 = vpop.permute.xlu0 %1439 }
 0x17c   : > { %2745 = vperm.xlu1 %5543, %v4657_v50   ;;  %v4745_v50 = vld [vmem:[%s7300_s13 + $0xe0] sm:$0xff] }
 0x17e   : > { %2917 = vperm.xlu0 %5541, %v4682_v53   ;;  %v4770_v53 = vld [vmem:[%s7302_s15 + $0xe8] sm:$0xff] }
 0x180   : > { %2755 = vperm.xlu1 %5543, %v4659_v54   ;;  %v4747_v54 = vld [vmem:[%s7300_s13 + $0xf0] sm:$0xff] }
 0x182   : > { %3273 = vperm.xlu0 %5541, %v4728_v57   ;;  %v4816_v57 = vld [vmem:[%s7298_s11 + $0x118] sm:$0xff] }
 0x184   : > { %2892 = vperm.xlu1 %5543, %v4677_v60   ;;  %v6376_v60 = vpop.permute.xlu1 %1424 }
 0x186   : > { %2927 = vperm.xlu0 %5541, %v4684_v62   ;;  %v6378_v62 = vpop.permute.xlu0 %1493 }
 0x188   : > { %2902 = vperm.xlu1 %5543, %v4679_v63   ;;  %v4765_v63 = vld [vmem:[%s7302_s15 + $0xc0] sm:$0xff] }
 0x18a   : > { %3283 = vperm.xlu0 %5541, %v4730_v4   ;;  %v4772_v4 = vld [vmem:[%s7302_s15 + $0xf8] sm:$0xff] }
 0x18c   : > { %3258 = vperm.xlu1 %5543, %v4725_v5   ;;  %v4767_v5 = vld [vmem:[%s7302_s15 + $0xd0] sm:$0xff] }
 0x18e   : > { %3293 = vperm.xlu0 %5541, %v4732_v7   ;;  %v6389_v7 = vpop.permute.xlu1 %1143 }
 0x190   : > { %2912 = vperm.xlu1 %5543, %v4681_v0   ;;  %v4818_v0 = vld [vmem:[%s7298_s11 + $0x128] sm:$0xff] }
 0x192   : > { %3349 = vperm.xlu0 %5541, %v4742_v59   ;;  %v6394_v59 = vpop.permute.xlu0 %1503 }
 0x194   : > { %3268 = vperm.xlu1 %5543, %v4727_v27   ;;  %v4813_v27 = vld [vmem:[%s7298_s11 + $0x100] sm:$0xff] }
 0x196   : > { %3359 = vperm.xlu0 %5541, %v4744_v17   ;;  %v4820_v17 = vld [vmem:[%s7298_s11 + $0x138] sm:$0xff] }
 0x198   : > { %2922 = vperm.xlu1 %5543, %v4683_v19   ;;  %v6402_v19 = vpop.permute.xlu1 %1434 }
 0x19a   : > { %3369 = vperm.xlu0 %5541, %v4746_v20   ;;  %v6404_v20 = vpop.permute.xlu0 %1513 }
 0x19c   : > { %3278 = vperm.xlu1 %5543, %v4729_v25   ;;  %v4830_v25 = vld [vmem:[%s7300_s13 + $0x108] sm:$0xff] }
 0x19e   : > { %3379 = vperm.xlu0 %5541, %v4748_v28   ;;  %v4815_v28 = vld [vmem:[%s7298_s11 + $0x110] sm:$0xff] }
 0x1a0   : > { %3288 = vperm.xlu1 %5543, %v4731_v32   ;;  %v6415_v32 = vpop.permute.xlu1 %1488 }
 0x1a2   : > { %3516 = vperm.xlu0 %5541, %v4766_v34   ;;  %v4832_v34 = vld [vmem:[%s7300_s13 + $0x118] sm:$0xff] }
 0x1a4   : > { %3344 = vperm.xlu1 %5543, %v4741_v37   ;;  %v6420_v37 = vpop.permute.xlu0 %1523 }
 0x1a6   : > { %3526 = vperm.xlu0 %5541, %v4768_v39   ;;  %v4771_v39 = vld [vmem:[%s7302_s15 + $0xf0] sm:$0xff] }
 0x1a8   : > { %3354 = vperm.xlu1 %5543, %v4743_v44   ;;  %v4834_v44 = vld [vmem:[%s7300_s13 + $0x128] sm:$0xff] }
 0x1aa   : > { %3882 = vperm.xlu0 %5541, %v4814_v45   ;;  %v6428_v45 = vpop.permute.xlu1 %1498 }
 0x1ac   : > { %3364 = vperm.xlu1 %5543, %v4745_v50   ;;  %v6430_v50 = vpop.permute.xlu0 %1659 }
 0x1ad   : > { %7349 = vst [vmem:[#allocation12_spill] sm:$0xff] %v6430_v50 }
 0x1ae   : > { %3536 = vperm.xlu0 %5541, %v4770_v53   ;;  %v4817_v53 = vld [vmem:[%s7298_s11 + $0x120] sm:$0xff] }
 0x1b0   : > { %3374 = vperm.xlu1 %5543, %v4747_v54   ;;  %v4836_v54 = vld [vmem:[%s7300_s13 + $0x138] sm:$0xff] }
 0x1b2   : > { %3892 = vperm.xlu0 %5541, %v4816_v57   ;;  %v4819_v57 = vld [vmem:[%s7298_s11 + $0x130] sm:$0xff] }
 0x1b4   : > { %3511 = vperm.xlu1 %5543, %v4765_v63   ;;  %v6441_v63 = vpop.permute.xlu1 %1508 }
 0x1b6   : > { %3546 = vperm.xlu0 %5541, %v4772_v4   ;;  %v4854_v4 = vld [vmem:[%s7302_s15 + $0x108] sm:$0xff] }
 0x1b8   : > { %3521 = vperm.xlu1 %5543, %v4767_v5   ;;  %v6446_v5 = vpop.permute.xlu0 %1669 }
 0x1b9   : > { %7350 = vst [vmem:[#allocation13_spill] sm:$0xff] %v6446_v5  ;;  %v6536_v5 = vld [vmem:[%s5908_s22] sm:$0xff]  }
 0x1ba   : > { %3902 = vperm.xlu0 %5541, %v4818_v0   ;;  %v4829_v0 = vld [vmem:[%s7300_s13 + $0x100] sm:$0xff]  ;;  %7364 = vst [vmem:[#allocation27_spill] sm:$0xff] %v6536_v5 }
 0x1bc   : > { %3877 = vperm.xlu1 %5543, %v4813_v27   ;;  %v4856_v27 = vld [vmem:[%s7302_s15 + $0x118] sm:$0xff] }
 0x1be   : > { %3912 = vperm.xlu0 %5541, %v4820_v17   ;;  %v6454_v17 = vpop.permute.xlu1 %1518 }
 0x1c0   : > { %3531 = vperm.xlu1 %5543, %v4769_v24   ;;  %v6456_v24 = vpop.permute.xlu0 %2025 }
 0x1c1   : > { %7351 = vst [vmem:[#allocation14_spill] sm:$0xff] %v6456_v24  ;;  %v4284_v24 = vld [vmem:[%s7303_s16 + $0x18] sm:$0xff] }
 0x1c2   : > { %3968 = vperm.xlu0 %5541, %v4830_v25   ;;  %v4831_v25 = vld [vmem:[%s7300_s13 + $0x110] sm:$0xff] }
 0x1c4   : > { %3887 = vperm.xlu1 %5543, %v4815_v28   ;;  %v4281_v28 = vld [vmem:[%s7303_s16] sm:$0xff] }
 0x1c6   : > { %3978 = vperm.xlu0 %5541, %v4832_v34   ;;  %v4833_v34 = vld [vmem:[%s7300_s13 + $0x120] sm:$0xff] }
 0x1c8   : > { %3541 = vperm.xlu1 %5543, %v4771_v39   ;;  %v6467_v39 = vpop.permute.xlu1 %1654 }
 0x1c9   : > { %7352 = vst [vmem:[#allocation15_spill] sm:$0xff] %v6467_v39 }
 0x1ca   : > { %3988 = vperm.xlu0 %5541, %v4834_v44   ;;  %v4858_v44 = vld [vmem:[%s7302_s15 + $0x128] sm:$0xff] }
 0x1cc   : > { %3897 = vperm.xlu1 %5543, %v4817_v53   ;;  %v6472_v53 = vpop.permute.xlu0 %1679 }
 0x1cd   : > { %7353 = vst [vmem:[#allocation16_spill] sm:$0xff] %v6472_v53 }
 0x1ce   : > { %3998 = vperm.xlu0 %5541, %v4836_v54   ;;  %v4835_v54 = vld [vmem:[%s7300_s13 + $0x130] sm:$0xff] }
 0x1d0   : > { %3907 = vperm.xlu1 %5543, %v4819_v57   ;;  %v4859_v57 = vld [vmem:[%s7302_s15 + $0x130] sm:$0xff] }
 0x1d2   : > { %4135 = vperm.xlu0 %5541, %v4854_v4   ;;  %v6480_v4 = vpop.permute.xlu1 %1664 }
 0x1d3   : > { %7354 = vst [vmem:[#allocation17_spill] sm:$0xff] %v6480_v4 }
 0x1d4   : > { %3963 = vperm.xlu1 %5543, %v4829_v0   ;;  %v6482_v0 = vpop.permute.xlu0 %2035 }
 0x1d5   : > { %7355 = vst [vmem:[#allocation18_spill] sm:$0xff] %v6482_v0 }
 0x1d6   : > { %4145 = vperm.xlu0 %5541, %v4856_v27   ;;  %v4853_v27 = vld [vmem:[%s7302_s15 + $0x100] sm:$0xff] }
 0x1d8   : > { %3973 = vperm.xlu1 %5543, %v4831_v25   ;;  %v4860_v25 = vld [vmem:[%s7302_s15 + $0x138] sm:$0xff] }
 0x1da   : > { %4291 = vperm.xlu0 %5541, %v4281_v28   ;;  %v4855_v28 = vld [vmem:[%s7302_s15 + $0x110] sm:$0xff] }
 0x1dc   : > { %3983 = vperm.xlu1 %5543, %v4833_v34   ;;  %v6493_v34 = vpop.permute.xlu1 %2020 }
 0x1dd   : > { %7356 = vst [vmem:[#allocation19_spill] sm:$0xff] %v6493_v34 }
 0x1de   : > { %4155 = vperm.xlu0 %5541, %v4858_v44   ;;  %v4286_v44 = vld [vmem:[%s7303_s16 + $0x28] sm:$0xff] }
 0x1e0   : > { %3993 = vperm.xlu1 %5543, %v4835_v54   ;;  %v6498_v54 = vpop.permute.xlu0 %1689 }
 0x1e1   : > { %7357 = vst [vmem:[#allocation20_spill] sm:$0xff] %v6498_v54  ;;  %v4282_v54 = vld [vmem:[%s7303_s16 + $0x8] sm:$0xff] }
 0x1e2   : > { %4160 = vperm.xlu0 %5541, %v4859_v57   ;;  %v4857_v57 = vld [vmem:[%s7302_s15 + $0x120] sm:$0xff] }
 0x1e4   : > { %4130 = vperm.xlu1 %5543, %v4853_v27   ;;  %v4288_v27 = vld [vmem:[%s7303_s16 + $0x38] sm:$0xff]  ;;  %v6508_v53 = vpop.permute.xlu0 %2045 }
 0x1e5   : > { %7359 = vst [vmem:[#allocation22_spill] sm:$0xff] %v6508_v53 }
 0x1e6   : > { %4165 = vperm.xlu0 %5541, %v4860_v25   ;;  %v6506_v25 = vpop.permute.xlu1 %1674 }
 0x1e7   : > { %7358 = vst [vmem:[#allocation21_spill] sm:$0xff] %v6506_v25 }
 0x1e8   : > { %4140 = vperm.xlu1 %5543, %v4855_v28   ;;  %v4283_v28 = vld [vmem:[%s7303_s16 + $0x10] sm:$0xff] }
 0x1ea   : > { %4316 = vperm.xlu0 %5541, %v4286_v44   ;;  %v6516_v44 = vpop.permute.xlu1 %2030 }
 0x1eb   : > { %7360 = vst [vmem:[#allocation23_spill] sm:$0xff] %v6516_v44 }
 0x1ec   : > { %4150 = vperm.xlu1 %5543, %v4857_v57  }
 0x1ee   : > { %4326 = vperm.xlu0 %5541, %v4288_v27   ;;  %v6521_v57 = vpop.permute.xlu1 %1684  ;;  %v4285_v27 = vld [vmem:[%s7303_s16 + $0x20] sm:$0xff] }
 0x1ef   : > { %7361 = vst [vmem:[#allocation24_spill] sm:$0xff] %v6521_v57 }
 0x1f0   : > { %4296 = vperm.xlu1 %5543, %v4282_v54   ;;  %v4287_v54 = vld [vmem:[%s7303_s16 + $0x30] sm:$0xff] }
 0x1f2   : > { %v6529_v53 = vpop.permute.xlu1 %2040 }
 0x1f3   : > { %7362 = vst [vmem:[#allocation25_spill] sm:$0xff] %v6529_v53 }
 0x1f4   : > { %4301 = vperm.xlu1 %5543, %v4283_v28   ;;  %v4350_v28 = vld [vmem:[#allocation2] sm:$0x1] }
 0x1f6   : > { %v6531_v0 = vpop.permute.xlu1 %2050 }
 0x1f7   : > { %7363 = vst [vmem:[#allocation26_spill] sm:$0xff] %v6531_v0 }
 0x1f8   : > { %4306 = vperm.xlu1 %5543, %v4284_v24  }
 0x1fc   : > { %4311 = vperm.xlu1 %5543, %v4285_v27  }
 0x200   : > { %4321 = vperm.xlu1 %5543, %v4287_v54   ;;  %v5726_v54 = vmov 65535  }
 0x201   : > { %v1324_v53 = vsel %vm1322_vm3, 4294967295, %v5726_v54  ;;  %v5558_v54 = vld [vmem:[%s7296_s9 + $0x18] sm:$0xff]  }
 0x204   : > { %4353 = vperm.xlu1 %5543, %v4350_v28   ;;  %v5552_v28 = vld [vmem:[%s7297_s10 + $0x8] sm:$0xff]  }
 0x22a   : > { %v924_v34 = vpop.f32.mrb[4].mxu0 }
 0x22b   : > { %v5030_v24 = vpop.f32.mrb[5].mxu0  ;;  %v925_v57 = vadd.f32 %v924_v34, %v6186_v29  ;;  %v6549_v29 = vld [vmem:[%s5908_s22 + $0x8] sm:$0xff]   ;;  %v5547_v34 = vld [vmem:[%s5908_s22 + $0x10] sm:$0x1f]  }
 0x22c   : > { %v927_v44 = vpop.f32.mrb[6].mxu0  ;;  %7366 = vst [vmem:[#allocation29_spill] sm:$0xff] %v6549_v29  ;;  %v5556_v24 = vld [vmem:[%s7296_s9 + $0x8] sm:$0xff]  }
 0x22d   : > { %v928_v27 = vadd.f32 %v927_v44, %v6115_v61  ;;  %v5031_v25 = vpop.f32.mrb[7].mxu0  ;;  %v5553_v61 = vld [vmem:[%s7297_s10 + $0x10] sm:$0xff]  }
 0x22e   : > { %v1325_v25 = vsel %vm1323_vm4, %v1324_v53, 0  ;;  %v5555_v53 = vld [vmem:[%s7296_s9] sm:$0xff]  }
 0x22f   : > { %v6538_v50 = vpack.c.bf16 %v928_v27, %v925_v57  ;;  %v6556_v44 = vand.u32 %v5547_v34, %v1325_v25  ;;  %v5554_v57 = vld [vmem:[%s7297_s10 + $0x18] sm:$0xff]   ;;  %v5557_v27 = vld [vmem:[%s7296_s9 + $0x10] sm:$0xff]  }
 0x231   : > { %7365 = vst [vmem:[#allocation28_spill] sm:$0xff] %v6538_v50  ;;  %5032 = vmatprep.subr.bf16.mxu0 %v6538_v50  ;;  %7367 = vst [vmem:[#allocation30_spill] sm:$0xff] %v6556_v44 }
 0x232   : > { %5033 = vmatpush3.bf16.msra.mxu0 %v6538_v50 }
 0x233   : > { %5042 = vmatprep.subr.bf16.mxu0 %v6536_v5 }
 0x235   : > { %5035 = vmatmul.mubr.msk.bf16.vlgmr.msra.gmra.mrb[8].mxu0 %vm765_vm0, %v5552_v28  ;;  %v5559_v28 = vld [vmem:[%s7299_s12] sm:$0xff]  }
 0x236   : > { %5043 = vmatpush3.bf16.msra.mxu0 %v6536_v5  ;;  %5038 = vmatprep.mubr.msk.bf16.mxu0 %vm765_vm0, %v5553_v61  ;;  %v987_v61 = vlaneseq }
 0x237   : > { %5044 = vmatprep.subr.bf16.mxu0 %v6549_v29  ;;  %5064 = vmatprep.mubr.msk.bf16.mxu1 %vm1546_vm6, %v5559_v28 }
 0x238   : > { %v6588_v34 = vshrl.u32 %v987_v61, 7 }
 0x23a   : > { %5045 = vmatpush3.bf16.msra.mxu0 %v6549_v29  ;;  %7368 = vst [vmem:[#allocation31_spill] sm:$0xff] %v6588_v34  ;;  %v7331_v25 = vsub.s32 0, %v6588_v34 }
 0x23b   : > { %5046 = vmatprep.subr.bf16.mxu0 %v6556_v44 }
 0x23d   : > { %5039 = vmatmul.mubr.msk.bf16.gmra.mrb[12].mxu0 %vm765_vm0, %v5554_v57  ;;  %v1033_v57 = vsub.s32 1, %v6588_v34 }
 0x23e   : > { %5047 = vmatpush3.bf16.msra.mxu0 %v6556_v44  ;;  %5048 = vmatprep.mubr.msk.bf16.mxu0 %vm1309_vm5, %v5555_v53  ;;  %v938_v53 = vld [vmem:[%s717_s26] sm:$0x7] }
 0x245   : > { %5049 = vmatmul.mubr.msk.bf16.vlgmr.msra.gmra.mrb[8].mxu0 %vm1309_vm5, %v5556_v24  ;;  %v990_v24 = vrot.slane %v938_v53, %v7331_v25 }
 0x246   : > { %5052 = vmatprep.mubr.msk.bf16.mxu0 %vm1309_vm5, %v5557_v27  ;;  %v1034_v27 = vrot.slane %v938_v53, %v1033_v57 }
 0x247   : > { %v992_v28 = vmul.f32 %v990_v24, %v6131_v10  ;;  %v993_v39 = vmul.f32 %v990_v24, %v6167_v21  ;;  %v994_v44 = vmul.f32 %v990_v24, %v6181_v26  ;;  %v991_v25 = vmul.f32 %v990_v24, %v6271_v2 }
 0x248   : > { %v1036_v61 = vmul.f32 %v1034_v27, %v6142_v15  ;;  %v1037_v4 = vmul.f32 %v1034_v27, %v6230_v46  ;;  %v1038_v29 = vmul.f32 %v1034_v27, %v6191_v31  ;;  %v1035_v5 = vmul.f32 %v1034_v27, %v6217_v41 }
 0x249   : > { %v995_v26 = vmul.f32 %v990_v24, %v6253_v56  ;;  %v1039_v31 = vmul.f32 %v1034_v27, %v6269_v1  ;;  %v997_v2 = vmul.f32 %v990_v24, %v6304_v3  ;;  %v996_v56 = vmul.f32 %v990_v24, %v6288_v11 }
 0x24a   : > { %v1044_v57 = vadd.f32 %v1036_v61, %v992_v28  ;;  %v1045_v50 = vadd.f32 %v1037_v4, %v993_v39  ;;  %v1043_v46 = vadd.f32 %v1035_v5, %v991_v25  ;;  %v1041_v28 = vmul.f32 %v1034_v27, %v6320_v22 }
 0x24b   : > { %v1047_v5 = vadd.f32 %v1039_v31, %v995_v26 }
 0x24d   : > { %5053 = vmatmul.mubr.msk.bf16.gmra.mrb[12].mxu0 %vm1309_vm5, %v5558_v54  ;;  %v1085_v54 = vsub.s32 2, %v6588_v34 }
 0x24f   : > { %v1086_v0 = vrot.slane %v938_v53, %v1085_v54  ;;  %v1046_v53 = vadd.f32 %v1038_v29, %v994_v44 }
 0x251   : > { %v1088_v34 = vmul.f32 %v1086_v0, %v6196_v33  ;;  %v1089_v10 = vmul.f32 %v1086_v0, %v6209_v38  ;;  %v1087_v15 = vmul.f32 %v1086_v0, %v6159_v18  ;;  %v1090_v21 = vmul.f32 %v1086_v0, %v6204_v36 }
 0x252   : > { %v1042_v38 = vmul.f32 %v1034_v27, %v6258_v58  ;;  %v998_v18 = vmul.f32 %v990_v24, %v6306_v16  ;;  %v1040_v36 = vmul.f32 %v1034_v27, %v6245_v52  ;;  %v1093_v3 = vmul.f32 %v1086_v0, %v6334_v30 }
 0x253   : > { %v1096_v54 = vadd.f32 %v1088_v34, %v1044_v57  ;;  %v1097_v41 = vadd.f32 %v1089_v10, %v1045_v50  ;;  %v1095_v33 = vadd.f32 %v1087_v15, %v1043_v46  ;;  %v1098_v61 = vadd.f32 %v1090_v21, %v1046_v53 }
 0x254   : > { %v1049_v50 = vadd.f32 %v1041_v28, %v997_v2  ;;  %v1091_v58 = vmul.f32 %v1086_v0, %v6279_v6  ;;  %v1050_v34 = vadd.f32 %v1042_v38, %v998_v18  ;;  %v1094_v11 = vmul.f32 %v1086_v0, %v6350_v40 }
 0x255   : > { %v1152_v39 = vadd.f32 %v6235_v48, %v1096_v54  ;;  %v1153_v1 = vadd.f32 %v6292_v13, %v1097_v41  ;;  %v1154_v16 = vadd.f32 %v6290_v12, %v1098_v61  ;;  %v1151_v48 = vadd.f32 %v6219_v42, %v1095_v33 }
 0x256   : > { %v1048_v24 = vadd.f32 %v1040_v36, %v996_v56  ;;  %v1101_v12 = vadd.f32 %v1093_v3, %v1049_v50  ;;  %v1102_v10 = vadd.f32 %v1094_v11, %v1050_v34  ;;  %v5561_v56 = vld [vmem:[%s7299_s12 + $0x10] sm:$0xff]  }
 0x258   : > { %v1158_v33 = vadd.f32 %v6352_v43, %v1102_v10 }
 0x318   : > { %v5050_v4 = vpop.f32.mrb[8].mxu0 }
 0x319   : > { %v1444_v22 = vadd.f32 %v5050_v4, %v6294_v14  ;;  %v1363_v29 = vpop.f32.mrb[9].mxu0  ;;  %v1092_v14 = vmul.f32 %v1086_v0, %v6286_v9  ;;  %v1157_v0 = vadd.f32 %v6389_v7, %v1101_v12  ;;  %v5562_v4 = vld [vmem:[%s7299_s12 + $0x18] sm:$0xff]  }
 0x31a   : > { %v1442_v52 = vadd.f32 %v6284_v8, %v1363_v29  ;;  %v5051_v44 = vpop.f32.mrb[10].mxu0  ;;  %v1099_v8 = vadd.f32 %v1091_v58, %v1047_v5 }
 0x31b   : > { %v6627_v25 = vadd.f32 %v1444_v22, %v1153_v1  ;;  %v1445_v13 = vadd.f32 %v5051_v44, %v6296_v55  ;;  %v1366_v30 = vpop.f32.mrb[11].mxu0  ;;  %v1100_v55 = vadd.f32 %v1092_v14, %v1048_v24  ;;  %v5563_v1 = vld [vmem:[%s7301_s14] sm:$0xff]  }
 0x31c   : > { %v6631_v27 = vadd.f32 %v1442_v52, %v1151_v48  ;;  %v1443_v6 = vadd.f32 %v6243_v51, %v1366_v30  ;;  %v1155_v26 = vadd.f32 %v6322_v23, %v1099_v8 }
 0x31d   : > { %v6634_v42 = vadd.f32 %v1445_v13, %v1154_v16  ;;  %v1468_v40 = vmax.f32 %v6627_v25, 0.0  ;;  %v1156_v18 = vadd.f32 %v6360_v47, %v1100_v55 }
 0x31e   : > { %v6636_v57 = vadd.f32 %v1443_v6, %v1152_v39  ;;  %v1466_v21 = vmax.f32 %v6631_v27, 0.0 }
 0x31f   : > { %v1469_v15 = vmax.f32 %v6634_v42, 0.0 }
 0x320   : > { %v5054_v53 = vpop.f32.mrb[12].mxu0  ;;  %v1467_v9 = vmax.f32 %v6636_v57, 0.0 }
 0x321   : > { %v1448_v51 = vadd.f32 %v5054_v53, %v6402_v19  ;;  %v1379_v46 = vpop.f32.mrb[13].mxu0  ;;  %v1475_v54 = vpack.c.bf16 %v1469_v15, %v1468_v40 }
 0x322   : > { %v1446_v31 = vadd.f32 %v6376_v60, %v1379_v46  ;;  %v5055_v41 = vpop.f32.mrb[14].mxu0  ;;  %v1474_v2 = vpack.c.bf16 %v1467_v9, %v1466_v21  ;;  %v5566_v9 = vld [vmem:[%s7301_s14 + $0x18] sm:$0xff]   ;;  %v5569_v46 = vld [vmem:[%s7297_s10 + $0x30] sm:$0xff]  }
 0x323   : > { %v6646_v28 = vadd.f32 %v1448_v51, %v1157_v0  ;;  %v1449_v61 = vadd.f32 %v5055_v41, %v6362_v49  ;;  %v1382_v38 = vpop.f32.mrb[15].mxu0  ;;  %v5567_v0 = vld [vmem:[%s7297_s10 + $0x20] sm:$0xff]   ;;  %v5568_v51 = vld [vmem:[%s7297_s10 + $0x28] sm:$0xff]   ;;  %v7373_v41 = vld [vmem:[#allocation30_spill] sm:$0xff] }
 0x324   : > { %v6651_v7 = vadd.f32 %v1446_v31, %v1155_v26  ;;  %v1447_v19 = vadd.f32 %v6342_v35, %v1382_v38  ;;  %5056 = vmatprep.subr.bf16.mxu1 %v1474_v2  ;;  %v5560_v35 = vld [vmem:[%s7299_s12 + $0x8] sm:$0xff]   ;;  %v5570_v26 = vld [vmem:[%s7297_s10 + $0x38] sm:$0xff]   ;;  %v5571_v31 = vld [vmem:[%s7296_s9 + $0x20] sm:$0xff]  }
 0x325   : > { %v6654_v39 = vadd.f32 %v1449_v61, %v1158_v33  ;;  %5057 = vmatpush3.bf16.msra.mxu1 %v1474_v2  ;;  %v1472_v60 = vmax.f32 %v6646_v28, 0.0  ;;  %v5572_v2 = vld [vmem:[%s7296_s9 + $0x28] sm:$0xff]   ;;  %v5573_v33 = vld [vmem:[%s7296_s9 + $0x30] sm:$0xff]   ;;  %v5574_v61 = vld [vmem:[%s7296_s9 + $0x38] sm:$0xff]  }
 0x326   : > { %v6656_v23 = vadd.f32 %v1447_v19, %v1156_v18  ;;  %5058 = vmatprep.subr.bf16.mxu1 %v1475_v54  ;;  %v1470_v49 = vmax.f32 %v6651_v7, 0.0  ;;  %v5575_v38 = vld [vmem:[%s7299_s12 + $0x20] sm:$0xff]   ;;  %v7374_v18 = vld [vmem:[#allocation17_spill] sm:$0xff] }
 0x327   : > { %v1473_v43 = vmax.f32 %v6654_v39, 0.0  ;;  %5120 = vmatprep.mubr.msk.bf16.mxu0 %vm1546_vm6, %v5575_v38  ;;  %v1767_v19 = vadd.f32 nan, %v7374_v18 }
 0x328   : > { %v1471_v36 = vmax.f32 %v6656_v23, 0.0 }
 0x329   : > { %5059 = vmatpush3.bf16.msra.mxu1 %v1475_v54  ;;  %v1477_v47 = vpack.c.bf16 %v1473_v43, %v1472_v60  ;;  %v7372_v54 = vld [vmem:[#allocation29_spill] sm:$0xff]  ;;  %v7375_v60 = vld [vmem:[#allocation15_spill] sm:$0xff] }
 0x32a   : > { %v1476_v5 = vpack.c.bf16 %v1471_v36, %v1470_v49  ;;  %v1759_v43 = vadd.f32 nan, %v7375_v60  ;;  %v7376_v49 = vld [vmem:[#allocation12_spill] sm:$0xff] }
 0x32b   : > { %v1762_v36 = vadd.f32 nan, %v7376_v49 }
 0x32c   : > { %5060 = vmatprep.subr.bf16.mxu1 %v1476_v5 }
 0x32d   : > { %5061 = vmatpush3.bf16.msra.mxu1 %v1476_v5  ;;  %v7377_v5 = vld [vmem:[#allocation13_spill] sm:$0xff] }
 0x32e   : > { %5062 = vmatprep.subr.bf16.mxu1 %v1477_v47 }
 0x331   : > { %5063 = vmatpush3.bf16.msra.mxu1 %v1477_v47  ;;  %v5312_v47 = vadd.f32 %v7374_v18, %v6627_v25 }
 0x334   : > { %5065 = vmatmul.mubr.msk.bf16.vlgmr.msra.gmra.mrb[0].mxu1 %vm1546_vm6, %v5560_v35  ;;  %v1770_v35 = vadd.f32 nan, %v7377_v5 }
 0x335   : > { %5068 = vmatprep.mubr.msk.bf16.mxu1 %vm1546_vm6, %v5561_v56  ;;  %v7378_v56 = vld [vmem:[#allocation21_spill] sm:$0xff] }
 0x33c   : > { %5069 = vmatmul.mubr.msk.bf16.gmra.mrb[4].mxu1 %vm1546_vm6, %v5562_v4  ;;  %v6749_v4 = vadd.f32 nan, %v7378_v56 }
 0x33d   : > { %5080 = vmatprep.mubr.msk.bf16.mxu1 %vm1546_vm6, %v5563_v1  ;;  %v7379_v1 = vld [vmem:[#allocation24_spill] sm:$0xff] }
 0x407   : > { %v5066_v50 = vpop.f32.mrb[0].mxu1 }
 0x408   : > { %v1602_v3 = vadd.f32 %v5066_v50, %v6428_v45  ;;  %v1593_v22 = vpop.f32.mrb[1].mxu1  ;;  %v6752_v50 = vadd.f32 nan, %v7379_v1 }
 0x409   : > { %v1594_v29 = vadd.f32 %v1593_v22, %v6415_v32  ;;  %v5067_v58 = vpop.f32.mrb[2].mxu1  ;;  %v5315_v22 = vadd.f32 %v7375_v60, %v6631_v27  ;;  %v7384_v60 = vld [vmem:[#allocation20_spill] sm:$0xff] }
 0x40a   : > { %v1605_v16 = vadd.f32 %v5067_v58, %v6394_v59  ;;  %v1596_v48 = vpop.f32.mrb[3].mxu1  ;;  %v1634_v44 = vmax.f32 %v1602_v3, 0.0 }
 0x40b   : > { %v1597_v52 = vadd.f32 %v1596_v48, %v6378_v62  ;;  %v1632_v11 = vmax.f32 %v1594_v29, 0.0  ;;  %v1791_v29 = vadd.f32 %v1767_v19, %v6627_v25 }
 0x40c   : > { %v1635_v34 = vmax.f32 %v1605_v16, 0.0 }
 0x40d   : > { %v1633_v13 = vmax.f32 %v1597_v52, 0.0  ;;  %v5318_v52 = vadd.f32 %v7377_v5, %v6634_v42 }
 0x40e   : > { %v1641_v30 = vpack.c.bf16 %v1635_v34, %v1634_v44  ;;  %v1789_v44 = vadd.f32 %v1759_v43, %v6631_v27  ;;  %v5330_v43 = vadd.f32 %v7384_v60, %v6654_v39 }
 0x40f   : > { %v1640_v24 = vpack.c.bf16 %v1633_v13, %v1632_v11  ;;  %v5070_v14 = vpop.f32.mrb[4].mxu1 }
 0x410   : > { %v1618_v6 = vadd.f32 %v5070_v14, %v6454_v17  ;;  %v1609_v12 = vpop.f32.mrb[5].mxu1  ;;  %v7371_v17 = vld [vmem:[#allocation27_spill] sm:$0xff] }
 0x411   : > { %v1610_v45 = vadd.f32 %v1609_v12, %v6441_v63  ;;  %v5071_v8 = vpop.f32.mrb[6].mxu1  ;;  %5072 = vmatprep.subr.bf16.mxu1 %v1640_v24  ;;  %v5564_v63 = vld [vmem:[%s7301_s14 + $0x8] sm:$0xff]  }
 0x412   : > { %v1621_v32 = vadd.f32 %v5071_v8, %v6420_v37  ;;  %v1612_v59 = vpop.f32.mrb[7].mxu1  ;;  %5073 = vmatpush3.bf16.msra.mxu1 %v1640_v24  ;;  %v1638_v10 = vmax.f32 %v1618_v6, 0.0  ;;  %v7370_v37 = vld [vmem:[#allocation28_spill] sm:$0xff]  ;;  %v7380_v24 = vld [vmem:[#allocation23_spill] sm:$0xff] }
 0x413   : > { %v1613_v62 = vadd.f32 %v1612_v59, %v6404_v20  ;;  %5074 = vmatprep.subr.bf16.mxu1 %v1641_v30  ;;  %v1636_v15 = vmax.f32 %v1610_v45, 0.0  ;;  %v5565_v20 = vld [vmem:[%s7301_s14 + $0x10] sm:$0xff]   ;;  %v7381_v8 = vld [vmem:[#allocation19_spill] sm:$0xff] }
 0x414   : > { %v1639_v40 = vmax.f32 %v1621_v32, 0.0 }
 0x415   : > { %v1637_v55 = vmax.f32 %v1613_v62, 0.0 }
 0x416   : > { %v1643_v53 = vpack.c.bf16 %v1639_v40, %v1638_v10  ;;  %5075 = vmatpush3.bf16.msra.mxu1 %v1641_v30  ;;  %v5321_v30 = vadd.f32 %v7376_v49, %v6636_v57  ;;  %v1792_v10 = vadd.f32 %v1770_v35, %v6634_v42  ;;  %v1790_v40 = vadd.f32 %v1762_v36, %v6636_v57  ;;  %v7385_v35 = vld [vmem:[#allocation16_spill] sm:$0xff] }
 0x417   : > { %v1642_v21 = vpack.c.bf16 %v1637_v55, %v1636_v15  ;;  %v7382_v15 = vld [vmem:[#allocation18_spill] sm:$0xff] }
 0x419   : > { %5076 = vmatprep.subr.bf16.mxu1 %v1642_v21 }
 0x41a   : > { %5077 = vmatpush3.bf16.msra.mxu1 %v1642_v21  ;;  %v7383_v21 = vld [vmem:[#allocation14_spill] sm:$0xff] }
 0x41b   : > { %5078 = vmatprep.subr.bf16.mxu1 %v1643_v53 }
 0x41e   : > { %5079 = vmatpush3.bf16.msra.mxu1 %v1643_v53 }
 0x41f   : > { %5088 = vmatprep.subr.bf16.mxu1 %v7370_v37 }
 0x421   : > { %5081 = vmatmul.mubr.msk.bf16.vlgmr.msra.gmra.mrb[8].mxu1 %vm1546_vm6, %v5564_v63 }
 0x422   : > { %5089 = vmatpush3.bf16.msra.mxu1 %v7370_v37  ;;  %5084 = vmatprep.mubr.msk.bf16.mxu1 %vm1546_vm6, %v5565_v20 }
 0x423   : > { %5098 = vmatprep.subr.bf16.mxu1 %v7371_v17 }
 0x429   : > { %5085 = vmatmul.mubr.msk.bf16.gmra.mrb[12].mxu1 %vm1546_vm6, %v5566_v9  ;;  %v5324_v9 = vadd.f32 %v7379_v1, %v6646_v28 }
 0x42a   : > { %5090 = vmatprep.mubr.msk.bf16.mxu1 %vm765_vm0, %v5567_v0  ;;  %v5327_v0 = vadd.f32 %v7378_v56, %v6651_v7  ;;  %v5333_v56 = vadd.f32 %v7385_v35, %v6656_v23 }
 0x431   : > { %5091 = vmatmul.mubr.msk.bf16.vlgmr.msra.gmra.mrb[8].mxu1 %vm765_vm0, %v5568_v51 }
 0x432   : > { %5099 = vmatpush3.bf16.msra.mxu1 %v7371_v17  ;;  %5094 = vmatprep.mubr.msk.bf16.mxu1 %vm765_vm0, %v5569_v46 }
 0x433   : > { %5100 = vmatprep.subr.bf16.mxu1 %v7372_v54 }
 0x436   : > { %5101 = vmatpush3.bf16.msra.mxu1 %v7372_v54 }
 0x437   : > { %5102 = vmatprep.subr.bf16.mxu1 %v7373_v41 }
 0x439   : > { %5095 = vmatmul.mubr.msk.bf16.gmra.mrb[12].mxu1 %vm765_vm0, %v5570_v26 }
 0x43a   : > { %5103 = vmatpush3.bf16.msra.mxu1 %v7373_v41  ;;  %5104 = vmatprep.mubr.msk.bf16.mxu1 %vm1309_vm5, %v5571_v31 }
 0x441   : > { %5105 = vmatmul.mubr.msk.bf16.vlgmr.msra.gmra.mrb[8].mxu1 %vm1309_vm5, %v5572_v2 }
 0x442   : > { %5108 = vmatprep.mubr.msk.bf16.mxu1 %vm1309_vm5, %v5573_v33 }
 0x449   : > { %5109 = vmatmul.mubr.msk.bf16.gmra.mrb[12].mxu1 %vm1309_vm5, %v5574_v61 }
 0x514   : > { %v5106_v3 = vpop.f32.mrb[8].mxu1 }
 0x515   : > { %v1987_v58 = vadd.f32 nan, %v5106_v3  ;;  %v5313_v16 = vadd.f32 %v5312_v47, %v5106_v3  ;;  %v1978_v48 = vpop.f32.mrb[9].mxu1  ;;  %v7386_v3 = vld [vmem:[#allocation26_spill] sm:$0xff] }
 0x516   : > { %v1979_v34 = vadd.f32 nan, %v1978_v48  ;;  %v5316_v11 = vadd.f32 %v5315_v22, %v1978_v48  ;;  %v5107_v13 = vpop.f32.mrb[10].mxu1 }
 0x517   : > { %v2060_v14 = vadd.f32 %v7380_v24, %v1987_v58  ;;  %v6764_v6 = vadd.f32 %v5313_v16, %v7380_v24  ;;  %v1990_v25 = vadd.f32 nan, %v5107_v13  ;;  %v5319_v12 = vadd.f32 %v5318_v52, %v5107_v13  ;;  %v1981_v45 = vpop.f32.mrb[11].mxu1  ;;  %v2056_v52 = vpop.permute.xlu0 %2055 }
 0x518   : > { %v2058_v32 = vadd.f32 %v7381_v8, %v1979_v34  ;;  %v6768_v59 = vadd.f32 %v5316_v11, %v7381_v8  ;;  %v1982_v27 = vadd.f32 nan, %v1981_v45  ;;  %v5322_v62 = vadd.f32 %v5321_v30, %v1981_v45 }
 0x519   : > { %v2061_v55 = vadd.f32 %v7382_v15, %v1990_v25  ;;  %v6774_v53 = vadd.f32 %v5319_v12, %v7382_v15  ;;  %v2085_v42 = vmax.f32 %v6764_v6, 0.0  ;;  %v6786_v51 = vadd.f32 %v2060_v14, %v1791_v29 }
 0x51a   : > { %v2059_v63 = vadd.f32 %v7383_v21, %v1982_v27  ;;  %v6778_v20 = vadd.f32 %v5322_v62, %v7383_v21  ;;  %v6788_v46 = vadd.f32 %v2058_v32, %v1789_v44  ;;  %v2083_v26 = vmax.f32 %v6768_v59, 0.0  ;;  %v7387_v44 = vld [vmem:[#allocation25_spill] sm:$0xff]  ;;  %v7388_v32 = vld [vmem:[#allocation22_spill] sm:$0xff] }
 0x51b   : > { %v2086_v57 = vmax.f32 %v6774_v53, 0.0  ;;  %v6792_v33 = vadd.f32 %v2061_v55, %v1792_v10  ;;  %v1778_v24 = vadd.f32 nan, %v7385_v35  ;;  %v1786_v14 = vadd.f32 nan, %v7384_v60 }
 0x51c   : > { %v2084_v31 = vmax.f32 %v6778_v20, 0.0  ;;  %v5110_v2 = vpop.f32.mrb[12].mxu1  ;;  %v6794_v61 = vadd.f32 %v2059_v63, %v1790_v40  ;;  %v1795_v45 = vadd.f32 %v6752_v50, %v6646_v28  ;;  %v1793_v8 = vadd.f32 %v6749_v4, %v6651_v7 }
 0x51d   : > { %v2003_v38 = vadd.f32 nan, %v5110_v2  ;;  %v5325_v18 = vadd.f32 %v5324_v9, %v5110_v2  ;;  %v1994_v19 = vpop.f32.mrb[13].mxu1  ;;  %v2092_v49 = vpack.c.bf16 %v2086_v57, %v2085_v42  ;;  %v1796_v10 = vadd.f32 %v1786_v14, %v6654_v39  ;;  %v5578_v42 = vld [vmem:[%s7299_s12 + $0x38] sm:$0xff]   ;;  %v5579_v57 = vld [vmem:[%s7301_s14 + $0x20] sm:$0xff]  }
 0x51e   : > { %v1995_v36 = vadd.f32 nan, %v1994_v19  ;;  %v5328_v47 = vadd.f32 %v5327_v0, %v1994_v19  ;;  %v5111_v5 = vpop.f32.mrb[14].mxu1  ;;  %v2091_v1 = vpack.c.bf16 %v2084_v31, %v2083_v26  ;;  %v1794_v40 = vadd.f32 %v1778_v24, %v6656_v23  ;;  %v5576_v23 = vld [vmem:[%s7299_s12 + $0x28] sm:$0xff]   ;;  %v5577_v0 = vld [vmem:[%s7299_s12 + $0x30] sm:$0xff]   ;;  %v2107_v26 = vpop.permute.xlu1 %2106 }
 0x51f   : > { %v2064_v22 = vadd.f32 %v7386_v3, %v2003_v38  ;;  %v6802_v29 = vadd.f32 %v5325_v18, %v7386_v3  ;;  %v2006_v58 = vadd.f32 nan, %v5111_v5  ;;  %v5331_v16 = vadd.f32 %v5330_v43, %v5111_v5  ;;  %v1997_v48 = vpop.f32.mrb[15].mxu1  ;;  %v2112_v31 = vpop.permute.xlu0 %2111 }
 0x520   : > { %v2062_v34 = vadd.f32 %v7387_v44, %v1995_v36  ;;  %v6806_v11 = vadd.f32 %v5328_v47, %v7387_v44  ;;  %v1998_v13 = vadd.f32 nan, %v1997_v48  ;;  %v5334_v30 = vadd.f32 %v5333_v56, %v1997_v48  ;;  %5112 = vmatprep.subr.bf16.mxu0 %v2091_v1 }
 0x521   : > { %v2065_v25 = vadd.f32 %v2056_v52, %v2006_v58  ;;  %v6810_v12 = vadd.f32 %v5331_v16, %v2056_v52  ;;  %5113 = vmatpush3.bf16.msra.mxu0 %v2091_v1  ;;  %v2089_v15 = vmax.f32 %v6802_v29, 0.0  ;;  %v6826_v50 = vadd.f32 %v2064_v22, %v1795_v45 }
 0x522   : > { %v2063_v27 = vadd.f32 %v7388_v32, %v1998_v13  ;;  %v6818_v62 = vadd.f32 %v5334_v30, %v7388_v32  ;;  %5114 = vmatprep.subr.bf16.mxu0 %v2092_v49  ;;  %v2087_v21 = vmax.f32 %v6806_v11, 0.0  ;;  %v6828_v7 = vadd.f32 %v2062_v34, %v1793_v8  ;;  %v2117_v2 = vpop.permute.xlu1 %2116 }
 0x523   : > { %v2090_v55 = vmax.f32 %v6810_v12, 0.0  ;;  %v6830_v63 = vadd.f32 %v2065_v25, %v1796_v10  ;;  %v2122_v38 = vpop.permute.xlu0 %2121 }
 0x524   : > { %v2088_v28 = vmax.f32 %v6818_v62, 0.0  ;;  %v6832_v9 = vadd.f32 %v2063_v27, %v1794_v40 }
 0x525   : > { %5115 = vmatpush3.bf16.msra.mxu0 %v2092_v49  ;;  %v2094_v4 = vpack.c.bf16 %v2090_v55, %v2089_v15 }
 0x526   : > { %v2093_v39 = vpack.c.bf16 %v2088_v28, %v2087_v21  ;;  %v2127_v43 = vpop.permute.xlu1 %2126  ;;  %v5580_v21 = vld [vmem:[%s7301_s14 + $0x28] sm:$0xff]   ;;  %v5581_v28 = vld [vmem:[%s7301_s14 + $0x30] sm:$0xff]  }
 0x527   : > { %v2132_v35 = vpop.permute.xlu0 %2131 }
 0x528   : > { %5116 = vmatprep.subr.bf16.mxu0 %v2093_v39 }
 0x529   : > { %5117 = vmatpush3.bf16.msra.mxu0 %v2093_v39  ;;  %v5583_v39 = vld [vmem:[%s7297_s10 + $0x40] sm:$0xff]  }
 0x52a   : > { %5118 = vmatprep.subr.bf16.mxu0 %v2094_v4  ;;  %v2137_v48 = vpop.permute.xlu1 %2136 }
 0x52b   : > { %v2142_v30 = vpop.permute.xlu0 %2141 }
 0x52d   : > { %5119 = vmatpush3.bf16.msra.mxu0 %v2094_v4  ;;  %v5582_v4 = vld [vmem:[%s7301_s14 + $0x38] sm:$0xff]  }
 0x530   : > { %5121 = vmatmul.mubr.msk.bf16.vlgmr.msra.gmra.mrb[16].mxu0 %vm1546_vm6, %v5576_v23  ;;  %v5584_v23 = vld [vmem:[%s7297_s10 + $0x48] sm:$0xff]  }
 0x531   : > { %5124 = vmatprep.mubr.msk.bf16.mxu0 %vm1546_vm6, %v5577_v0  ;;  %v5585_v0 = vld [vmem:[%s7297_s10 + $0x50] sm:$0xff]  }
 0x538   : > { %5125 = vmatmul.mubr.msk.bf16.gmra.mrb[20].mxu0 %vm1546_vm6, %v5578_v42  ;;  %v5586_v42 = vld [vmem:[%s7297_s10 + $0x58] sm:$0xff]  }
 0x539   : > { %5136 = vmatprep.mubr.msk.bf16.mxu0 %vm1546_vm6, %v5579_v57  ;;  %v5587_v57 = vld [vmem:[%s7296_s9 + $0x40] sm:$0xff]  }
 0x603   : > { %v5122_v18 = vpop.f32.mrb[16].mxu0 }
 0x604   : > { %v2219_v19 = vadd.f32 %v5122_v18, %v2117_v2  ;;  %v2210_v60 = vpop.f32.mrb[17].mxu0  ;;  %v2274_v2 = vpop.permute.xlu1 %2273 }
 0x605   : > { %v2211_v49 = vadd.f32 %v2210_v60, %v2107_v26  ;;  %v5123_v36 = vpop.f32.mrb[18].mxu0  ;;  %v5590_v26 = vld [vmem:[%s7296_s9 + $0x58] sm:$0xff]  }
 0x606   : > { %v2222_v47 = vadd.f32 %v5123_v36, %v2122_v38  ;;  %v2213_v5 = vpop.f32.mrb[19].mxu0  ;;  %v2252_v1 = vmax.f32 %v2219_v19, 0.0  ;;  %v2279_v38 = vpop.permute.xlu0 %2278 }
 0x607   : > { %v2214_v56 = vadd.f32 %v2213_v5, %v2112_v31  ;;  %v2250_v22 = vmax.f32 %v2211_v49, 0.0  ;;  %v5591_v31 = vld [vmem:[%s7299_s12 + $0x40] sm:$0xff]  }
 0x608   : > { %v2253_v3 = vmax.f32 %v2222_v47, 0.0  ;;  %5176 = vmatprep.mubr.msk.bf16.mxu1 %vm1546_vm6, %v5591_v31  ;;  %v2284_v18 = vpop.permute.xlu1 %2283 }
 0x609   : > { %v2251_v58 = vmax.f32 %v2214_v56, 0.0  ;;  %v2381_v56 = vadd.f32 nan, %v2279_v38 }
 0x60a   : > { %v2259_v16 = vpack.c.bf16 %v2253_v3, %v2252_v1  ;;  %v2289_v19 = vpop.permute.xlu0 %2288  ;;  %v2386_v3 = vadd.f32 nan, %v2284_v18 }
 0x60b   : > { %v2258_v52 = vpack.c.bf16 %v2251_v58, %v2250_v22  ;;  %v5126_v44 = vpop.f32.mrb[20].mxu0  ;;  %v2389_v1 = vadd.f32 nan, %v2289_v19  ;;  %v5336_v22 = vadd.f32 %v2284_v18, %v6786_v51  ;;  %v2378_v58 = vadd.f32 nan, %v2274_v2 }
 0x60c   : > { %v2235_v34 = vadd.f32 %v5126_v44, %v2137_v48  ;;  %v2226_v13 = vpop.f32.mrb[21].mxu0  ;;  %v2640_v60 = vpop.permute.xlu1 %2639 }
 0x60d   : > { %v2227_v24 = vadd.f32 %v2226_v13, %v2127_v43  ;;  %v5127_v14 = vpop.f32.mrb[22].mxu0  ;;  %5128 = vmatprep.subr.bf16.mxu0 %v2258_v52  ;;  %v2410_v13 = vadd.f32 %v6764_v6, %v2386_v3 }
 0x60e   : > { %v2238_v25 = vadd.f32 %v5127_v14, %v2142_v30  ;;  %v2229_v45 = vpop.f32.mrb[23].mxu0  ;;  %5129 = vmatpush3.bf16.msra.mxu0 %v2258_v52  ;;  %v2256_v32 = vmax.f32 %v2235_v34, 0.0  ;;  %v2645_v43 = vpop.permute.xlu0 %2644  ;;  %v5339_v34 = vadd.f32 %v2274_v2, %v6788_v46 }
 0x60f   : > { %v2230_v8 = vadd.f32 %v2229_v45, %v2132_v35  ;;  %5130 = vmatprep.subr.bf16.mxu0 %v2259_v16  ;;  %v2254_v10 = vmax.f32 %v2227_v24, 0.0  ;;  %v2408_v45 = vadd.f32 %v6768_v59, %v2378_v58  ;;  %v2409_v59 = vadd.f32 %v6778_v20, %v2381_v56 }
 0x610   : > { %v2257_v27 = vmax.f32 %v2238_v25, 0.0  ;;  %v2294_v49 = vpop.permute.xlu1 %2293  ;;  %v5342_v25 = vadd.f32 %v2289_v19, %v6792_v33  ;;  %v2411_v33 = vadd.f32 %v6774_v53, %v2389_v1 }
 0x611   : > { %v2255_v40 = vmax.f32 %v2230_v8, 0.0  ;;  %v6911_v48 = vadd.f32 nan, %v2294_v49 }
 0x612   : > { %v2261_v15 = vpack.c.bf16 %v2257_v27, %v2256_v32  ;;  %5131 = vmatpush3.bf16.msra.mxu0 %v2259_v16  ;;  %v6906_v36 = vpop.permute.xlu0 %2298  ;;  %v5345_v27 = vadd.f32 %v2279_v38, %v6794_v61 }
 0x613   : > { %v2260_v55 = vpack.c.bf16 %v2255_v40, %v2254_v10  ;;  %v5357_v3 = vadd.f32 %v6906_v36, %v6832_v9 }
 0x614   : > { %v2650_v47 = vpop.permute.xlu1 %2649 }
 0x615   : > { %5132 = vmatprep.subr.bf16.mxu0 %v2260_v55 }
 0x616   : > { %5133 = vmatpush3.bf16.msra.mxu0 %v2260_v55  ;;  %v2655_v5 = vpop.permute.xlu0 %2654 }
 0x617   : > { %5134 = vmatprep.subr.bf16.mxu0 %v2261_v15 }
 0x618   : > { %v2304_v35 = vpop.permute.xlu1 %2303 }
 0x619   : > { %v6913_v52 = vadd.f32 nan, %v2304_v35 }
 0x61a   : > { %5135 = vmatpush3.bf16.msra.mxu0 %v2261_v15  ;;  %v6909_v16 = vpop.permute.xlu0 %2308 }
 0x61b   : > { %5144 = vmatprep.subr.bf16.mxu0 %v7370_v37 }
 0x61d   : > { %5137 = vmatmul.mubr.msk.bf16.vlgmr.msra.gmra.mrb[24].mxu0 %vm1546_vm6, %v5580_v21  ;;  %v2660_v21 = vpop.permute.xlu1 %2659 }
 0x61e   : > { %5145 = vmatpush3.bf16.msra.mxu0 %v7370_v37  ;;  %5140 = vmatprep.mubr.msk.bf16.mxu0 %vm1546_vm6, %v5581_v28  ;;  %v2665_v61 = vpop.permute.xlu0 %2664 }
 0x61f   : > { %5154 = vmatprep.subr.bf16.mxu0 %v7371_v17 }
 0x625   : > { %5141 = vmatmul.mubr.msk.bf16.gmra.mrb[28].mxu0 %vm1546_vm6, %v5582_v4 }
 0x626   : > { %5146 = vmatprep.mubr.msk.bf16.mxu0 %vm765_vm0, %v5583_v39 }
 0x62d   : > { %5147 = vmatmul.mubr.msk.bf16.vlgmr.msra.gmra.mrb[24].mxu0 %vm765_vm0, %v5584_v23 }
 0x62e   : > { %5155 = vmatpush3.bf16.msra.mxu0 %v7371_v17  ;;  %5150 = vmatprep.mubr.msk.bf16.mxu0 %vm765_vm0, %v5585_v0  ;;  %v5588_v17 = vld [vmem:[%s7296_s9 + $0x48] sm:$0xff]  }
 0x62f   : > { %5156 = vmatprep.subr.bf16.mxu0 %v7372_v54 }
 0x632   : > { %5157 = vmatpush3.bf16.msra.mxu0 %v7372_v54  ;;  %v5589_v54 = vld [vmem:[%s7296_s9 + $0x50] sm:$0xff]  }
 0x633   : > { %5158 = vmatprep.subr.bf16.mxu0 %v7373_v41 }
 0x635   : > { %5151 = vmatmul.mubr.msk.bf16.gmra.mrb[28].mxu0 %vm765_vm0, %v5586_v42 }
 0x636   : > { %5159 = vmatpush3.bf16.msra.mxu0 %v7373_v41  ;;  %5160 = vmatprep.mubr.msk.bf16.mxu0 %vm1309_vm5, %v5587_v57 }
 0x63d   : > { %5161 = vmatmul.mubr.msk.bf16.vlgmr.msra.gmra.mrb[24].mxu0 %vm1309_vm5, %v5588_v17  ;;  %v5348_v17 = vadd.f32 %v2304_v35, %v6826_v50 }
 0x63e   : > { %5164 = vmatprep.mubr.msk.bf16.mxu0 %vm1309_vm5, %v5589_v54  ;;  %v5351_v54 = vadd.f32 %v2294_v49, %v6828_v7  ;;  %v5354_v49 = vadd.f32 %v6909_v16, %v6830_v63 }
 0x645   : > { %5165 = vmatmul.mubr.msk.bf16.gmra.mrb[28].mxu0 %vm1309_vm5, %v5590_v26 }
 0x710   : > { %v5162_v44 = vpop.f32.mrb[24].mxu0 }
 0x711   : > { %v2606_v30 = vadd.f32 nan, %v5162_v44  ;;  %v5337_v24 = vadd.f32 %v5336_v22, %v5162_v44  ;;  %v2597_v14 = vpop.f32.mrb[25].mxu0 }
 0x712   : > { %v2598_v51 = vadd.f32 nan, %v2597_v14  ;;  %v5340_v8 = vadd.f32 %v5339_v34, %v2597_v14  ;;  %v5163_v32 = vpop.f32.mrb[26].mxu0 }
 0x713   : > { %v2679_v10 = vadd.f32 %v2650_v47, %v2606_v30  ;;  %v6920_v40 = vadd.f32 %v5337_v24, %v2650_v47  ;;  %v2609_v15 = vadd.f32 nan, %v5163_v32  ;;  %v5343_v55 = vadd.f32 %v5342_v25, %v5163_v32  ;;  %v2600_v46 = vpop.f32.mrb[27].mxu0  ;;  %v2675_v24 = vpop.permute.xlu0 %2674 }
 0x714   : > { %v2677_v6 = vadd.f32 %v2640_v60, %v2598_v51  ;;  %v6922_v28 = vadd.f32 %v5340_v8, %v2640_v60  ;;  %v2601_v4 = vadd.f32 nan, %v2600_v46  ;;  %v5346_v39 = vadd.f32 %v5345_v27, %v2600_v46 }
 0x715   : > { %v2680_v23 = vadd.f32 %v2655_v5, %v2609_v15  ;;  %v6926_v0 = vadd.f32 %v5343_v55, %v2655_v5  ;;  %v2704_v26 = vmax.f32 %v6920_v40, 0.0  ;;  %v6934_v2 = vadd.f32 %v2679_v10, %v2410_v13  ;;  %v2670_v5 = vpop.permute.xlu1 %2669 }
 0x716   : > { %v2678_v42 = vadd.f32 %v2645_v43, %v2601_v4  ;;  %v6928_v57 = vadd.f32 %v5346_v39, %v2645_v43  ;;  %v6936_v53 = vadd.f32 %v2677_v6, %v2408_v45  ;;  %v2702_v20 = vmax.f32 %v6922_v28, 0.0 }
 0x717   : > { %v2705_v31 = vmax.f32 %v6926_v0, 0.0  ;;  %v6940_v19 = vadd.f32 %v2680_v23, %v2411_v33  ;;  %v2397_v51 = vadd.f32 nan, %v6906_v36  ;;  %v2405_v8 = vadd.f32 nan, %v6909_v16  ;;  %v5593_v33 = vld [vmem:[%s7299_s12 + $0x50] sm:$0xff]   ;;  %v5595_v23 = vld [vmem:[%s7301_s14 + $0x40] sm:$0xff]  }
 0x718   : > { %v2703_v38 = vmax.f32 %v6928_v57, 0.0  ;;  %v5166_v18 = vpop.f32.mrb[28].mxu0  ;;  %v6942_v60 = vadd.f32 %v2678_v42, %v2409_v59  ;;  %v2414_v27 = vadd.f32 %v6802_v29, %v6913_v52  ;;  %v2412_v10 = vadd.f32 %v6806_v11, %v6911_v48  ;;  %v5594_v59 = vld [vmem:[%s7299_s12 + $0x58] sm:$0xff]   ;;  %v2731_v42 = vpop.permute.xlu0 %2730 }
 0x719   : > { %v2622_v50 = vadd.f32 nan, %v5166_v18  ;;  %v5349_v43 = vadd.f32 %v5348_v17, %v5166_v18  ;;  %v2613_v7 = vpop.f32.mrb[29].mxu0  ;;  %v2711_v47 = vpack.c.bf16 %v2705_v31, %v2704_v26  ;;  %v2415_v46 = vadd.f32 %v6810_v12, %v2405_v8 }
 0x71a   : > { %v2614_v35 = vadd.f32 nan, %v2613_v7  ;;  %v5352_v56 = vadd.f32 %v5351_v54, %v2613_v7  ;;  %v5167_v1 = vpop.f32.mrb[30].mxu0  ;;  %v2710_v22 = vpack.c.bf16 %v2703_v38, %v2702_v20  ;;  %v2413_v36 = vadd.f32 %v6818_v62, %v2397_v51  ;;  %v5592_v62 = vld [vmem:[%s7299_s12 + $0x48] sm:$0xff]  }
 0x71b   : > { %v2683_v58 = vadd.f32 %v2670_v5, %v2622_v50  ;;  %v6948_v44 = vadd.f32 %v5349_v43, %v2670_v5  ;;  %v2625_v34 = vadd.f32 nan, %v5167_v1  ;;  %v5355_v13 = vadd.f32 %v5354_v49, %v5167_v1  ;;  %v2616_v30 = vpop.f32.mrb[31].mxu0 }
 0x71c   : > { %v2681_v14 = vadd.f32 %v2660_v21, %v2614_v35  ;;  %v6950_v25 = vadd.f32 %v5352_v56, %v2660_v21  ;;  %v2617_v63 = vadd.f32 nan, %v2616_v30  ;;  %v5358_v45 = vadd.f32 %v5357_v3, %v2616_v30  ;;  %5168 = vmatprep.subr.bf16.mxu1 %v2710_v22  ;;  %v2741_v54 = vpop.permute.xlu0 %2740 }
 0x71d   : > { %v2684_v32 = vadd.f32 %v2675_v24, %v2625_v34  ;;  %v6954_v9 = vadd.f32 %v5355_v13, %v2675_v24  ;;  %5169 = vmatpush3.bf16.msra.mxu1 %v2710_v22  ;;  %v2708_v16 = vmax.f32 %v6948_v44, 0.0  ;;  %v6968_v29 = vadd.f32 %v2683_v58, %v2414_v27 }
 0x71e   : > { %v2682_v15 = vadd.f32 %v2665_v61, %v2617_v63  ;;  %v6960_v55 = vadd.f32 %v5358_v45, %v2665_v61  ;;  %5170 = vmatprep.subr.bf16.mxu1 %v2711_v47  ;;  %v2706_v6 = vmax.f32 %v6950_v25, 0.0  ;;  %v6970_v52 = vadd.f32 %v2681_v14, %v2412_v10  ;;  %v2726_v61 = vpop.permute.xlu1 %2725 }
 0x71f   : > { %v2709_v21 = vmax.f32 %v6954_v9, 0.0  ;;  %v6972_v48 = vadd.f32 %v2684_v32, %v2415_v46 }
 0x720   : > { %v2707_v4 = vmax.f32 %v6960_v55, 0.0  ;;  %v6974_v39 = vadd.f32 %v2682_v15, %v2413_v36  ;;  %v2751_v49 = vpop.permute.xlu0 %2750 }
 0x721   : > { %5171 = vmatpush3.bf16.msra.mxu1 %v2711_v47  ;;  %v2713_v11 = vpack.c.bf16 %v2709_v21, %v2708_v16  ;;  %v5596_v16 = vld [vmem:[%s7301_s14 + $0x48] sm:$0xff]   ;;  %v5597_v21 = vld [vmem:[%s7301_s14 + $0x50] sm:$0xff]  }
 0x722   : > { %v2712_v12 = vpack.c.bf16 %v2707_v4, %v2706_v6  ;;  %v2736_v17 = vpop.permute.xlu1 %2735  ;;  %v7003_v6 = vld [vmem:[%s5908_s22] sm:$0xff]  }
 0x723   : > { %v5598_v4 = vld [vmem:[%s7301_s14 + $0x58] sm:$0xff]  }
 0x724   : > { %5172 = vmatprep.subr.bf16.mxu1 %v2712_v12  ;;  %v2761_v24 = vpop.permute.xlu0 %2760 }
 0x725   : > { %5173 = vmatpush3.bf16.msra.mxu1 %v2712_v12  ;;  %v5600_v12 = vld [vmem:[%s7297_s10 + $0x68] sm:$0xff]  }
 0x726   : > { %5174 = vmatprep.subr.bf16.mxu1 %v2713_v11  ;;  %v2746_v38 = vpop.permute.xlu1 %2745 }
 0x729   : > { %5175 = vmatpush3.bf16.msra.mxu1 %v2713_v11  ;;  %v5599_v11 = vld [vmem:[%s7297_s10 + $0x60] sm:$0xff]  }
 0x72a   : > { %v2756_v22 = vpop.permute.xlu1 %2755 }
 0x72c   : > { %5177 = vmatmul.mubr.msk.bf16.vlgmr.msra.gmra.mrb[16].mxu1 %vm1546_vm6, %v5592_v62  ;;  %v5601_v62 = vld [vmem:[%s7297_s10 + $0x70] sm:$0xff]  }
 0x72d   : > { %5180 = vmatprep.mubr.msk.bf16.mxu1 %vm1546_vm6, %v5593_v33  ;;  %v7024_v33 = vld [vmem:[%s5908_s22 + $0x8] sm:$0xff]   ;;  %s713_s22 = scalar_lea.vmem [#allocation5], %s5897_s20 }
 0x72e   : > { %s4375_s2 = sshll.u32 %s713_s22, 4  ;;  %s7245_s2 = int_to_ptr.vmem [resolvable:$true] %s4375_s2 }
 0x72f   : > { %s5657_s17 = scalar_lea.vmem %s7245_s2, 16  ;;  %p5664_p3 = scmp.lt.s32.totalorder %s7245_s2, %s5662_s1 }
 0x730   : > { %p5658_p0 = scmp.ne.s32.totalorder %s7245_s2, %s5657_s17  ;;  %p5665_p4 = scmp.lt.s32.totalorder %s5663_s28, %s5657_s17 }
 0x732   : > { %p5659_p1 = pnand %p5658_p0, %p5869_p6  ;;  %p5666_p5 = por %p5665_p4, %p5664_p3 }
 0x734   : > { %5181 = vmatmul.mubr.msk.bf16.gmra.mrb[20].mxu1 %vm1546_vm6, %v5594_v59  ;;  %v5602_v59 = vld [vmem:[%s7297_s10 + $0x78] sm:$0xff]   ;;  %p5660_p2 = pneg %p5659_p1 }
 0x735   : > { %5192 = vmatprep.mubr.msk.bf16.mxu1 %vm1546_vm6, %v5595_v23  ;;  %v5603_v23 = vld [vmem:[%s7296_s9 + $0x60] sm:$0xff]  }
 0x736   : > { %p5667_p7 = pnand %p5666_p5, %p5660_p2 }
 0x7ff   : > { %v5178_v26 = vpop.f32.mrb[16].mxu1 }
 0x800   : > { %v2838_v31 = vadd.f32 %v5178_v26, %v2736_v17  ;;  %v2829_v20 = vpop.f32.mrb[17].mxu1  ;;  %v5606_v17 = vld [vmem:[%s7296_s9 + $0x78] sm:$0xff]   ;;  %v2898_v26 = vpop.permute.xlu0 %2897 }
 0x801   : > { %v2830_v18 = vadd.f32 %v2829_v20, %v2726_v61  ;;  %v5179_v50 = vpop.f32.mrb[18].mxu1  ;;  %v5604_v61 = vld [vmem:[%s7296_s9 + $0x68] sm:$0xff]  }
 0x802   : > { %v2841_v43 = vadd.f32 %v5179_v50, %v2741_v54  ;;  %v2832_v7 = vpop.f32.mrb[19].mxu1  ;;  %v2871_v5 = vmax.f32 %v2838_v31, 0.0  ;;  %v5607_v54 = vld [vmem:[%s7299_s12 + $0x60] sm:$0xff]   ;;  %v2893_v31 = vpop.permute.xlu1 %2892 }
 0x803   : > { %v2833_v47 = vadd.f32 %v2832_v7, %v2731_v42  ;;  %v2869_v56 = vmax.f32 %v2830_v18, 0.0  ;;  %v5605_v42 = vld [vmem:[%s7296_s9 + $0x70] sm:$0xff]   ;;  %5232 = vmatprep.mubr.msk.bf16.mxu0 %vm1546_vm6, %v5607_v54 }
 0x804   : > { %v2872_v35 = vmax.f32 %v2841_v43, 0.0  ;;  %v2908_v20 = vpop.permute.xlu0 %2907 }
 0x805   : > { %v2870_v1 = vmax.f32 %v2833_v47, 0.0 }
 0x806   : > { %v2878_v3 = vpack.c.bf16 %v2872_v35, %v2871_v5  ;;  %v3000_v5 = vadd.f32 nan, %v2898_v26  ;;  %v3008_v35 = vadd.f32 nan, %v2908_v20 }
 0x807   : > { %v2877_v58 = vpack.c.bf16 %v2870_v1, %v2869_v56  ;;  %v5182_v34 = vpop.f32.mrb[20].mxu1  ;;  %v2997_v56 = vadd.f32 nan, %v2893_v31 }
 0x808   : > { %v2854_v13 = vadd.f32 %v5182_v34, %v2756_v22  ;;  %v2845_v30 = vpop.f32.mrb[21].mxu1  ;;  %v3264_v18 = vpop.permute.xlu0 %3263 }
 0x809   : > { %v2846_v14 = vadd.f32 %v2845_v30, %v2746_v38  ;;  %v5183_v63 = vpop.f32.mrb[22].mxu1  ;;  %5184 = vmatprep.subr.bf16.mxu1 %v2877_v58  ;;  %v2903_v38 = vpop.permute.xlu1 %2902 }
 0x80a   : > { %v2857_v45 = vadd.f32 %v5183_v63, %v2761_v24  ;;  %v2848_v51 = vpop.f32.mrb[23].mxu1  ;;  %5185 = vmatpush3.bf16.msra.mxu1 %v2877_v58  ;;  %v2875_v32 = vmax.f32 %v2854_v13, 0.0  ;;  %v5360_v30 = vadd.f32 %v2903_v38, %v6934_v2  ;;  %v3027_v63 = vadd.f32 %v6922_v28, %v2997_v56 }
 0x80b   : > { %v2849_v8 = vadd.f32 %v2848_v51, %v2751_v49  ;;  %5186 = vmatprep.subr.bf16.mxu1 %v2878_v3  ;;  %v2873_v10 = vmax.f32 %v2846_v14, 0.0  ;;  %v5363_v51 = vadd.f32 %v2893_v31, %v6936_v53 }
 0x80c   : > { %v2876_v27 = vmax.f32 %v2857_v45, 0.0  ;;  %v7054_v43 = vpop.permute.xlu0 %2917 }
 0x80d   : > { %v2874_v15 = vmax.f32 %v2849_v8, 0.0  ;;  %v3259_v50 = vpop.permute.xlu1 %3258  ;;  %v7057_v58 = vadd.f32 nan, %v7054_v43  ;;  %v3030_v8 = vadd.f32 %v6926_v0, %v3008_v35 }
 0x80e   : > { %v2880_v46 = vpack.c.bf16 %v2876_v27, %v2875_v32  ;;  %5187 = vmatpush3.bf16.msra.mxu1 %v2878_v3  ;;  %v3005_v3 = vadd.f32 nan, %v2903_v38 }
 0x80f   : > { %v2879_v36 = vpack.c.bf16 %v2874_v15, %v2873_v10  ;;  %v5366_v15 = vadd.f32 %v2908_v20, %v6940_v19 }
 0x810   : > { %v3274_v49 = vpop.permute.xlu0 %3273  ;;  %v3029_v14 = vadd.f32 %v6920_v40, %v3005_v3 }
 0x811   : > { %5188 = vmatprep.subr.bf16.mxu1 %v2879_v36  ;;  %v2913_v7 = vpop.permute.xlu1 %2912 }
 0x812   : > { %5189 = vmatpush3.bf16.msra.mxu1 %v2879_v36  ;;  %v3013_v13 = vadd.f32 nan, %v2913_v7 }
 0x813   : > { %5190 = vmatprep.subr.bf16.mxu1 %v2880_v46 }
 0x814   : > { %v2928_v1 = vpop.permute.xlu0 %2927  ;;  %v3031_v54 = vadd.f32 %v6950_v25, %v3013_v13 }
 0x815   : > { %v3269_v47 = vpop.permute.xlu1 %3268  ;;  %v7059_v34 = vadd.f32 nan, %v2928_v1 }
 0x816   : > { %5191 = vmatpush3.bf16.msra.mxu1 %v2880_v46  ;;  %v3028_v46 = vadd.f32 %v6928_v57, %v3000_v5 }
 0x817   : > { %5200 = vmatprep.subr.bf16.mxu1 %v7370_v37 }
 0x819   : > { %5193 = vmatmul.mubr.msk.bf16.vlgmr.msra.gmra.mrb[24].mxu1 %vm1546_vm6, %v5596_v16  ;;  %v2923_v22 = vpop.permute.xlu1 %2922 }
 0x81a   : > { %5201 = vmatpush3.bf16.msra.mxu1 %v7370_v37  ;;  %5196 = vmatprep.mubr.msk.bf16.mxu1 %vm1546_vm6, %v5597_v21  ;;  %v3021_v24 = vadd.f32 nan, %v2923_v22  ;;  %v5369_v21 = vadd.f32 %v2898_v26, %v6942_v60 }
 0x81b   : > { %5210 = vmatprep.subr.bf16.mxu1 %v7003_v6 }
 0x81d   : > { %v3279_v53 = vpop.permute.xlu1 %3278 }
 0x821   : > { %5197 = vmatmul.mubr.msk.bf16.gmra.mrb[28].mxu1 %vm1546_vm6, %v5598_v4 }
 0x822   : > { %5202 = vmatprep.mubr.msk.bf16.mxu1 %vm765_vm0, %v5599_v11 }
 0x829   : > { %5203 = vmatmul.mubr.msk.bf16.vlgmr.msra.gmra.mrb[24].mxu1 %vm765_vm0, %v5600_v12 }
 0x82a   : > { %5211 = vmatpush3.bf16.msra.mxu1 %v7003_v6  ;;  %5206 = vmatprep.mubr.msk.bf16.mxu1 %vm765_vm0, %v5601_v62 }
 0x82b   : > { %5212 = vmatprep.subr.bf16.mxu1 %v7024_v33 }
 0x82e   : > { %5213 = vmatpush3.bf16.msra.mxu1 %v7024_v33 }
 0x82f   : > { %5214 = vmatprep.subr.bf16.mxu1 %v7373_v41 }
 0x831   : > { %5207 = vmatmul.mubr.msk.bf16.gmra.mrb[28].mxu1 %vm765_vm0, %v5602_v59 }
 0x832   : > { %5215 = vmatpush3.bf16.msra.mxu1 %v7373_v41  ;;  %5216 = vmatprep.mubr.msk.bf16.mxu1 %vm1309_vm5, %v5603_v23 }
 0x839   : > { %5217 = vmatmul.mubr.msk.bf16.vlgmr.msra.gmra.mrb[24].mxu1 %vm1309_vm5, %v5604_v61  ;;  %v3033_v61 = vadd.f32 %v6948_v44, %v3021_v24  ;;  %v3289_v24 = vpop.permute.xlu1 %3288 }
 0x83a   : > { %5220 = vmatprep.mubr.msk.bf16.mxu1 %vm1309_vm5, %v5605_v42 }
 0x841   : > { %5221 = vmatmul.mubr.msk.bf16.gmra.mrb[28].mxu1 %vm1309_vm5, %v5606_v17  ;;  %v3284_v17 = vpop.permute.xlu0 %3283 }
 0x90c   : > { %v5218_v45 = vpop.f32.mrb[24].mxu1 }
 0x90d   : > { %v3225_v32 = vadd.f32 nan, %v5218_v45  ;;  %v5361_v27 = vadd.f32 %v5360_v30, %v5218_v45  ;;  %v3216_v10 = vpop.f32.mrb[25].mxu1 }
 0x90e   : > { %v3217_v36 = vadd.f32 nan, %v3216_v10  ;;  %v5364_v16 = vadd.f32 %v5363_v51, %v3216_v10  ;;  %v5219_v2 = vpop.f32.mrb[26].mxu1 }
 0x90f   : > { %v3298_v40 = vadd.f32 %v3269_v47, %v3225_v32  ;;  %v5362_v4 = vadd.f32 %v5361_v27, %v3269_v47  ;;  %v3228_v28 = vadd.f32 nan, %v5219_v2  ;;  %v5367_v11 = vadd.f32 %v5366_v15, %v5219_v2  ;;  %v3219_v12 = vpop.f32.mrb[27].mxu1  ;;  %v3294_v27 = vpop.permute.xlu0 %3293 }
 0x910   : > { %v3296_v62 = vadd.f32 %v3259_v50, %v3217_v36  ;;  %v5365_v0 = vadd.f32 %v5364_v16, %v3259_v50  ;;  %v3220_v59 = vadd.f32 nan, %v3219_v12  ;;  %v5370_v23 = vadd.f32 %v5369_v21, %v3219_v12 }
 0x911   : > { %v3299_v19 = vadd.f32 %v3274_v49, %v3228_v28  ;;  %v5368_v42 = vadd.f32 %v5367_v11, %v3274_v49  ;;  %v7070_v57 = vadd.f32 %v3298_v40, %v3029_v14  ;;  %v3323_v20 = vmax.f32 %v5362_v4, 0.0 }
 0x912   : > { %v3297_v60 = vadd.f32 %v3264_v18, %v3220_v59  ;;  %v5371_v26 = vadd.f32 %v5370_v23, %v3264_v18  ;;  %v7073_v31 = vadd.f32 %v3296_v62, %v3027_v63  ;;  %v5372_v47 = vadd.f32 %v2923_v22, %v6968_v29  ;;  %v5611_v59 = vld [vmem:[%s7301_s14 + $0x60] sm:$0xff]   ;;  %v3345_v23 = vpop.permute.xlu1 %3344 }
 0x913   : > { %v3324_v38 = vmax.f32 %v5368_v42, 0.0  ;;  %v7076_v50 = vadd.f32 %v3299_v19, %v3030_v8  ;;  %v3321_v5 = vmax.f32 %v5365_v0, 0.0  ;;  %v5375_v49 = vadd.f32 %v2913_v7, %v6970_v52  ;;  %v5610_v0 = vld [vmem:[%s7299_s12 + $0x78] sm:$0xff]  }
 0x914   : > { %v3322_v35 = vmax.f32 %v5371_v26, 0.0  ;;  %v5222_v44 = vpop.f32.mrb[28].mxu1  ;;  %v7079_v56 = vadd.f32 %v3297_v60, %v3028_v46  ;;  %v5378_v18 = vadd.f32 %v2928_v1, %v6972_v48  ;;  %v5381_v29 = vadd.f32 %v7054_v43, %v6974_v39 }
 0x915   : > { %v3241_v3 = vadd.f32 nan, %v5222_v44  ;;  %v5373_v30 = vadd.f32 %v5372_v47, %v5222_v44  ;;  %v3232_v25 = vpop.f32.mrb[29].mxu1  ;;  %v3330_v13 = vpack.c.bf16 %v3324_v38, %v3323_v20  ;;  %v3034_v48 = vadd.f32 %v6954_v9, %v7059_v34 }
 0x916   : > { %v3233_v14 = vadd.f32 nan, %v3232_v25  ;;  %v5376_v63 = vadd.f32 %v5375_v49, %v3232_v25  ;;  %v5223_v45 = vpop.f32.mrb[30].mxu1  ;;  %v3329_v22 = vpack.c.bf16 %v3322_v35, %v3321_v5  ;;  %v3032_v39 = vadd.f32 %v6960_v55, %v7057_v58  ;;  %v5608_v55 = vld [vmem:[%s7299_s12 + $0x68] sm:$0xff]   ;;  %v5609_v58 = vld [vmem:[%s7299_s12 + $0x70] sm:$0xff]   ;;  %v3355_v19 = vpop.permute.xlu1 %3354 }
 0x917   : > { %v3302_v51 = vadd.f32 %v3289_v24, %v3241_v3  ;;  %v5374_v8 = vadd.f32 %v5373_v30, %v3289_v24  ;;  %v3244_v32 = vadd.f32 nan, %v5223_v45  ;;  %v5379_v52 = vadd.f32 %v5378_v18, %v5223_v45  ;;  %v3235_v7 = vpop.f32.mrb[31].mxu1 }
 0x918   : > { %v3300_v10 = vadd.f32 %v3279_v53, %v3233_v14  ;;  %v5377_v15 = vadd.f32 %v5376_v63, %v3279_v53  ;;  %v3236_v46 = vadd.f32 nan, %v3235_v7  ;;  %v5382_v36 = vadd.f32 %v5381_v29, %v3235_v7  ;;  %5224 = vmatprep.subr.bf16.mxu0 %v3329_v22 }
 0x919   : > { %v3303_v1 = vadd.f32 %v3294_v27, %v3244_v32  ;;  %v5380_v16 = vadd.f32 %v5379_v52, %v3294_v27  ;;  %5225 = vmatpush3.bf16.msra.mxu0 %v3329_v22  ;;  %v7086_v2 = vadd.f32 %v3302_v51, %v3033_v61  ;;  %v3327_v4 = vmax.f32 %v5374_v8, 0.0  ;;  %v3350_v61 = vpop.permute.xlu0 %3349 }
 0x91a   : > { %v3301_v43 = vadd.f32 %v3284_v17, %v3236_v46  ;;  %v5383_v21 = vadd.f32 %v5382_v36, %v3284_v17  ;;  %5226 = vmatprep.subr.bf16.mxu0 %v3330_v13  ;;  %v7090_v40 = vadd.f32 %v3300_v10, %v3031_v54  ;;  %v3325_v12 = vmax.f32 %v5377_v15, 0.0  ;;  %v3365_v26 = vpop.permute.xlu1 %3364 }
 0x91b   : > { %v3328_v28 = vmax.f32 %v5380_v16, 0.0  ;;  %v7092_v11 = vadd.f32 %v3303_v1, %v3034_v48  ;;  %v5612_v48 = vld [vmem:[%s7301_s14 + $0x68] sm:$0xff]   ;;  %v5613_v1 = vld [vmem:[%s7301_s14 + $0x70] sm:$0xff]   ;;  %v5614_v16 = vld [vmem:[%s7301_s14 + $0x78] sm:$0xff]  }
 0x91c   : > { %v3326_v53 = vmax.f32 %v5383_v21, 0.0  ;;  %v7094_v9 = vadd.f32 %v3301_v43, %v3032_v39  ;;  %v5615_v39 = vld [vmem:[%s7297_s10 + $0x80] sm:$0xff]   ;;  %v5617_v43 = vld [vmem:[%s7297_s10 + $0x90] sm:$0xff]   ;;  %v5618_v21 = vld [vmem:[%s7297_s10 + $0x98] sm:$0xff]  }
 0x91d   : > { %5227 = vmatpush3.bf16.msra.mxu0 %v3330_v13  ;;  %v3332_v34 = vpack.c.bf16 %v3328_v28, %v3327_v4  ;;  %v3360_v42 = vpop.permute.xlu0 %3359  ;;  %v5619_v4 = vld [vmem:[%s7296_s9 + $0x80] sm:$0xff]   ;;  %v5622_v28 = vld [vmem:[%s7296_s9 + $0x98] sm:$0xff]  }
 0x91e   : > { %v3331_v62 = vpack.c.bf16 %v3326_v53, %v3325_v12  ;;  %v3375_v13 = vpop.permute.xlu1 %3374 }
 0x920   : > { %5228 = vmatprep.subr.bf16.mxu0 %v3331_v62 }
 0x921   : > { %5229 = vmatpush3.bf16.msra.mxu0 %v3331_v62  ;;  %v3370_v35 = vpop.permute.xlu0 %3369 }
 0x922   : > { %5230 = vmatprep.subr.bf16.mxu0 %v3332_v34  ;;  %v3512_v53 = vpop.permute.xlu1 %3511 }
 0x925   : > { %5231 = vmatpush3.bf16.msra.mxu0 %v3332_v34  ;;  %v3380_v29 = vpop.permute.xlu0 %3379 }
 0x926   : > { %v3522_v62 = vpop.permute.xlu1 %3521 }
 0x928   : > { %5233 = vmatmul.mubr.msk.bf16.vlgmr.msra.gmra.mrb[32].mxu0 %vm1546_vm6, %v5608_v55 }
 0x929   : > { %5236 = vmatprep.mubr.msk.bf16.mxu0 %vm1546_vm6, %v5609_v58  ;;  %v3517_v12 = vpop.permute.xlu0 %3516 }
 0x92a   : > { %v3878_v58 = vpop.permute.xlu1 %3877 }
 0x92d   : > { %v3527_v34 = vpop.permute.xlu0 %3526 }
 0x930   : > { %5237 = vmatmul.mubr.msk.bf16.gmra.mrb[36].mxu0 %vm1546_vm6, %v5610_v0 }
 0x931   : > { %5248 = vmatprep.mubr.msk.bf16.mxu0 %vm1546_vm6, %v5611_v59  ;;  %v3883_v55 = vpop.permute.xlu0 %3882  ;;  %v3532_v59 = vpop.permute.xlu1 %3531 }
 0x935   : > { %v3537_v0 = vpop.permute.xlu0 %3536 }
 0x9fb   : > { %v5234_v17 = vpop.f32.mrb[32].mxu0 }
 0x9fc   : > { %v3457_v54 = vadd.f32 %v5234_v17, %v3355_v19  ;;  %v3448_v60 = vpop.f32.mrb[33].mxu0  ;;  %v5384_v19 = vadd.f32 %v3522_v62, %v7070_v57 }
 0x9fd   : > { %v3449_v20 = vadd.f32 %v3448_v60, %v3345_v23  ;;  %v5235_v38 = vpop.f32.mrb[34].mxu0  ;;  %v3893_v23 = vpop.permute.xlu0 %3892 }
 0x9fe   : > { %v3460_v47 = vadd.f32 %v5235_v38, %v3360_v42  ;;  %v3451_v5 = vpop.f32.mrb[35].mxu0  ;;  %v3490_v49 = vmax.f32 %v3457_v54, 0.0  ;;  %v5387_v54 = vadd.f32 %v3512_v53, %v7073_v31  ;;  %v5390_v38 = vadd.f32 %v3527_v34, %v7076_v50 }
 0x9ff   : > { %v3452_v44 = vadd.f32 %v3451_v5, %v3350_v61  ;;  %v3488_v30 = vmax.f32 %v3449_v20, 0.0  ;;  %v3888_v61 = vpop.permute.xlu1 %3887 }
 0xa00   : > { %v3491_v3 = vmax.f32 %v3460_v47, 0.0 }
 0xa01   : > { %v3489_v25 = vmax.f32 %v3452_v44, 0.0  ;;  %v3547_v42 = vpop.permute.xlu0 %3546 }
 0xa02   : > { %v3497_v18 = vpack.c.bf16 %v3491_v3, %v3490_v49 }
 0xa03   : > { %v3496_v24 = vpack.c.bf16 %v3489_v25, %v3488_v30  ;;  %v5238_v14 = vpop.f32.mrb[36].mxu0  ;;  %v3542_v60 = vpop.permute.xlu1 %3541 }
 0xa04   : > { %v3473_v63 = vadd.f32 %v5238_v14, %v3375_v13  ;;  %v3464_v45 = vpop.f32.mrb[37].mxu0 }
 0xa05   : > { %v3465_v22 = vadd.f32 %v3464_v45, %v3365_v26  ;;  %v5239_v51 = vpop.f32.mrb[38].mxu0  ;;  %5240 = vmatprep.subr.bf16.mxu0 %v3496_v24  ;;  %v3903_v57 = vpop.permute.xlu0 %3902  ;;  %v5399_v45 = vadd.f32 %v3532_v59, %v7090_v40 }
 0xa06   : > { %v3476_v8 = vadd.f32 %v5239_v51, %v3380_v29  ;;  %v3467_v32 = vpop.f32.mrb[39].mxu0  ;;  %5241 = vmatpush3.bf16.msra.mxu0 %v3496_v24  ;;  %v3494_v7 = vmax.f32 %v3473_v63, 0.0  ;;  %v5396_v24 = vadd.f32 %v3542_v60, %v7086_v2  ;;  %v5402_v51 = vadd.f32 %v3547_v42, %v7092_v11 }
 0xa07   : > { %v3468_v52 = vadd.f32 %v3467_v32, %v3370_v35  ;;  %5242 = vmatprep.subr.bf16.mxu0 %v3497_v18  ;;  %v3492_v10 = vmax.f32 %v3465_v22, 0.0  ;;  %v5393_v35 = vadd.f32 %v3517_v12, %v7079_v56  ;;  %v3898_v13 = vpop.permute.xlu1 %3897 }
 0xa08   : > { %v3495_v27 = vmax.f32 %v3476_v8, 0.0 }
 0xa09   : > { %v3493_v15 = vmax.f32 %v3468_v52, 0.0 }
 0xa0a   : > { %v3499_v46 = vpack.c.bf16 %v3495_v27, %v3494_v7  ;;  %5243 = vmatpush3.bf16.msra.mxu0 %v3497_v18  ;;  %v5405_v7 = vadd.f32 %v3537_v0, %v7094_v9 }
 0xa0b   : > { %v3498_v36 = vpack.c.bf16 %v3493_v15, %v3492_v10  ;;  %v3913_v15 = vpop.permute.xlu0 %3912  ;;  %v3908_v40 = vpop.permute.xlu1 %3907 }
 0xa0d   : > { %5244 = vmatprep.subr.bf16.mxu0 %v3498_v36 }
 0xa0e   : > { %5245 = vmatpush3.bf16.msra.mxu0 %v3498_v36 }
 0xa0f   : > { %5246 = vmatprep.subr.bf16.mxu0 %v3499_v46  ;;  %v3964_v12 = vpop.permute.xlu1 %3963  ;;  %v3969_v53 = vpop.permute.xlu0 %3968 }
 0xa12   : > { %5247 = vmatpush3.bf16.msra.mxu0 %v3499_v46 }
 0xa13   : > { %5256 = vmatprep.subr.bf16.mxu0 %v7370_v37  ;;  %v3974_v34 = vpop.permute.xlu1 %3973  ;;  %v3979_v62 = vpop.permute.xlu0 %3978 }
 0xa15   : > { %5249 = vmatmul.mubr.msk.bf16.vlgmr.msra.gmra.mrb[40].mxu0 %vm1546_vm6, %v5612_v48 }
 0xa16   : > { %5257 = vmatpush3.bf16.msra.mxu0 %v7370_v37  ;;  %5252 = vmatprep.mubr.msk.bf16.mxu0 %vm1546_vm6, %v5613_v1  ;;  %v5616_v37 = vld [vmem:[%s7297_s10 + $0x88] sm:$0xff]  }
 0xa17   : > { %5266 = vmatprep.subr.bf16.mxu0 %v7003_v6  ;;  %v3984_v59 = vpop.permute.xlu1 %3983 }
 0xa1d   : > { %5253 = vmatmul.mubr.msk.bf16.gmra.mrb[44].mxu0 %vm1546_vm6, %v5614_v16 }
 0xa1e   : > { %5258 = vmatprep.mubr.msk.bf16.mxu0 %vm765_vm0, %v5615_v39 }
 0xa25   : > { %5259 = vmatmul.mubr.msk.bf16.vlgmr.msra.gmra.mrb[40].mxu0 %vm765_vm0, %v5616_v37 }
 0xa26   : > { %5267 = vmatpush3.bf16.msra.mxu0 %v7003_v6  ;;  %5262 = vmatprep.mubr.msk.bf16.mxu0 %vm765_vm0, %v5617_v43  ;;  %v5620_v6 = vld [vmem:[%s7296_s9 + $0x88] sm:$0xff]  }
 0xa27   : > { %5268 = vmatprep.subr.bf16.mxu0 %v7024_v33 }
 0xa2a   : > { %5269 = vmatpush3.bf16.msra.mxu0 %v7024_v33  ;;  %v5621_v33 = vld [vmem:[%s7296_s9 + $0x90] sm:$0xff]  }
 0xa2b   : > { %5270 = vmatprep.subr.bf16.mxu0 %v7373_v41 }
 0xa2d   : > { %5263 = vmatmul.mubr.msk.bf16.gmra.mrb[44].mxu0 %vm765_vm0, %v5618_v21 }
 0xa2e   : > { %5271 = vmatpush3.bf16.msra.mxu0 %v7373_v41  ;;  %5272 = vmatprep.mubr.msk.bf16.mxu0 %vm1309_vm5, %v5619_v4  ;;  %v5623_v41 = vld [vmem:[%s7299_s12 + $0x80] sm:$0xff]  }
 0xa2f   : > { %5288 = vmatprep.mubr.msk.bf16.mxu1 %vm1546_vm6, %v5623_v41  ;;  %v5627_v41 = vld [vmem:[%s7301_s14 + $0x80] sm:$0xff]  }
 0xa35   : > { %5273 = vmatmul.mubr.msk.bf16.vlgmr.msra.gmra.mrb[40].mxu0 %vm1309_vm5, %v5620_v6  ;;  %v5624_v6 = vld [vmem:[%s7299_s12 + $0x88] sm:$0xff]  }
 0xa36   : > { %5276 = vmatprep.mubr.msk.bf16.mxu0 %vm1309_vm5, %v5621_v33  ;;  %v5625_v33 = vld [vmem:[%s7299_s12 + $0x90] sm:$0xff]  }
 0xa3d   : > { %5277 = vmatmul.mubr.msk.bf16.gmra.mrb[44].mxu0 %vm1309_vm5, %v5622_v28  ;;  %v5626_v28 = vld [vmem:[%s7299_s12 + $0x98] sm:$0xff]  }
 0xb08   : > { %v5274_v17 = vpop.f32.mrb[40].mxu0 }
 0xb09   : > { %v5385_v26 = vadd.f32 %v5384_v19, %v5274_v17  ;;  %v3835_v20 = vpop.f32.mrb[41].mxu0  ;;  %v3989_v17 = vpop.permute.xlu0 %3988 }
 0xb0a   : > { %v5388_v47 = vadd.f32 %v5387_v54, %v3835_v20  ;;  %v5275_v5 = vpop.f32.mrb[42].mxu0 }
 0xb0b   : > { %v5391_v44 = vadd.f32 %v5390_v38, %v5275_v5  ;;  %v3838_v49 = vpop.f32.mrb[43].mxu0  ;;  %v7176_v18 = vadd.f32 %v5385_v26, %v3888_v61  ;;  %v3994_v5 = vpop.permute.xlu1 %3993 }
 0xb0c   : > { %v7172_v3 = vadd.f32 %v5388_v47, %v3878_v58  ;;  %v5394_v30 = vadd.f32 %v5393_v35, %v3838_v49 }
 0xb0d   : > { %v7174_v25 = vadd.f32 %v5391_v44, %v3893_v23  ;;  %v3942_v8 = vmax.f32 %v7176_v18, 0.0 }
 0xb0e   : > { %v7178_v31 = vadd.f32 %v5394_v30, %v3883_v55  ;;  %v3940_v50 = vmax.f32 %v7172_v3, 0.0 }
 0xb0f   : > { %v3943_v14 = vmax.f32 %v7174_v25, 0.0 }
 0xb10   : > { %v3941_v56 = vmax.f32 %v7178_v31, 0.0  ;;  %v5278_v63 = vpop.f32.mrb[44].mxu0 }
 0xb11   : > { %v5397_v29 = vadd.f32 %v5396_v24, %v5278_v63  ;;  %v3851_v22 = vpop.f32.mrb[45].mxu0  ;;  %v3949_v48 = vpack.c.bf16 %v3943_v14, %v3942_v8 }
 0xb12   : > { %v5400_v32 = vadd.f32 %v5399_v45, %v3851_v22  ;;  %v5279_v52 = vpop.f32.mrb[46].mxu0  ;;  %v3948_v2 = vpack.c.bf16 %v3941_v56, %v3940_v50 }
 0xb13   : > { %v5403_v27 = vadd.f32 %v5402_v51, %v5279_v52  ;;  %v3854_v10 = vpop.f32.mrb[47].mxu0  ;;  %v7192_v11 = vadd.f32 %v5397_v29, %v3908_v40  ;;  %v5629_v52 = vld [vmem:[%s7301_s14 + $0x90] sm:$0xff]  }
 0xb14   : > { %v7188_v46 = vadd.f32 %v5400_v32, %v3898_v13  ;;  %v5406_v36 = vadd.f32 %v5405_v7, %v3854_v10  ;;  %5280 = vmatprep.subr.bf16.mxu1 %v3948_v2  ;;  %v5628_v32 = vld [vmem:[%s7301_s14 + $0x88] sm:$0xff]   ;;  %v5630_v7 = vld [vmem:[%s7301_s14 + $0x98] sm:$0xff]  }
 0xb15   : > { %v7190_v1 = vadd.f32 %v5403_v27, %v3913_v15  ;;  %5281 = vmatpush3.bf16.msra.mxu1 %v3948_v2  ;;  %v3946_v43 = vmax.f32 %v7192_v11, 0.0  ;;  %v4131_v2 = vpop.permute.xlu1 %4130 }
 0xb16   : > { %v7194_v16 = vadd.f32 %v5406_v36, %v3903_v57  ;;  %5282 = vmatprep.subr.bf16.mxu1 %v3949_v48  ;;  %v3944_v9 = vmax.f32 %v7188_v46, 0.0  ;;  %v3999_v57 = vpop.permute.xlu0 %3998 }
 0xb17   : > { %v3947_v39 = vmax.f32 %v7190_v1, 0.0 }
 0xb18   : > { %v3945_v37 = vmax.f32 %v7194_v16, 0.0 }
 0xb19   : > { %5283 = vmatpush3.bf16.msra.mxu1 %v3949_v48  ;;  %v3951_v4 = vpack.c.bf16 %v3947_v39, %v3946_v43  ;;  %v4141_v10 = vpop.permute.xlu1 %4140 }
 0xb1a   : > { %v3950_v21 = vpack.c.bf16 %v3945_v37, %v3944_v9  ;;  %v4136_v27 = vpop.permute.xlu0 %4135 }
 0xb1c   : > { %5284 = vmatprep.subr.bf16.mxu1 %v3950_v21 }
 0xb1d   : > { %5285 = vmatpush3.bf16.msra.mxu1 %v3950_v21  ;;  %v4151_v36 = vpop.permute.xlu1 %4150 }
 0xb1e   : > { %5286 = vmatprep.subr.bf16.mxu1 %v3951_v4  ;;  %v4146_v15 = vpop.permute.xlu0 %4145 }
 0xb21   : > { %5287 = vmatpush3.bf16.msra.mxu1 %v3951_v4  ;;  %v4297_v40 = vpop.permute.xlu1 %4296 }
 0xb22   : > { %v4292_v48 = vpop.permute.xlu0 %4291 }
 0xb24   : > { %5289 = vmatmul.mubr.msk.bf16.vlgmr.msra.gmra.mrb[32].mxu1 %vm1546_vm6, %v5624_v6 }
 0xb25   : > { %5292 = vmatprep.mubr.msk.bf16.mxu1 %vm1546_vm6, %v5625_v33  ;;  %v4302_v37 = vpop.permute.xlu1 %4301 }
 0xb26   : > { %v4156_v9 = vpop.permute.xlu0 %4155 }
 0xb2a   : > { %v4161_v33 = vpop.permute.xlu0 %4160 }
 0xb2c   : > { %5293 = vmatmul.mubr.msk.bf16.gmra.mrb[36].mxu1 %vm1546_vm6, %v5626_v28 }
 0xb2d   : > { %5304 = vmatprep.mubr.msk.bf16.mxu1 %vm1546_vm6, %v5627_v41 }
 0xbf7   : > { %v5290_v55 = vpop.f32.mrb[32].mxu1 }
 0xbf8   : > { %v4076_v58 = vadd.f32 %v5290_v55, %v3974_v34  ;;  %v4067_v0 = vpop.f32.mrb[33].mxu1 }
 0xbf9   : > { %v4068_v23 = vadd.f32 %v4067_v0, %v3964_v12  ;;  %v5291_v61 = vpop.f32.mrb[34].mxu1  ;;  %v4307_v0 = vpop.permute.xlu1 %4306 }
 0xbfa   : > { %v4079_v19 = vadd.f32 %v5291_v61, %v3979_v62  ;;  %v4070_v42 = vpop.f32.mrb[35].mxu1  ;;  %v4109_v60 = vmax.f32 %v4076_v58, 0.0 }
 0xbfb   : > { %v4071_v54 = vadd.f32 %v4070_v42, %v3969_v53  ;;  %v4107_v20 = vmax.f32 %v4068_v23, 0.0 }
 0xbfc   : > { %v4110_v26 = vmax.f32 %v4079_v19, 0.0  ;;  %v4166_v19 = vpop.permute.xlu0 %4165 }
 0xbfd   : > { %v4108_v38 = vmax.f32 %v4071_v54, 0.0 }
 0xbfe   : > { %v4116_v47 = vpack.c.bf16 %v4110_v26, %v4109_v60 }
 0xbff   : > { %v4115_v35 = vpack.c.bf16 %v4108_v38, %v4107_v20  ;;  %v5294_v44 = vpop.f32.mrb[36].mxu1 }
 0xc00   : > { %v4092_v49 = vadd.f32 %v5294_v44, %v3994_v5  ;;  %v4083_v30 = vpop.f32.mrb[37].mxu1  ;;  %v4312_v44 = vpop.permute.xlu1 %4311 }
 0xc01   : > { %v4084_v13 = vadd.f32 %v4083_v30, %v3984_v59  ;;  %v5295_v24 = vpop.f32.mrb[38].mxu1  ;;  %5296 = vmatprep.subr.bf16.mxu1 %v4115_v35 }
 0xc02   : > { %v4095_v50 = vadd.f32 %v5295_v24, %v3999_v57  ;;  %v4086_v14 = vpop.f32.mrb[39].mxu1  ;;  %5297 = vmatpush3.bf16.msra.mxu1 %v4115_v35  ;;  %v4113_v63 = vmax.f32 %v4092_v49, 0.0 }
 0xc03   : > { %v4087_v56 = vadd.f32 %v4086_v14, %v3989_v17  ;;  %5298 = vmatprep.subr.bf16.mxu1 %v4116_v47  ;;  %v4111_v29 = vmax.f32 %v4084_v13, 0.0 }
 0xc04   : > { %v4114_v45 = vmax.f32 %v4095_v50, 0.0  ;;  %v4317_v50 = vpop.permute.xlu0 %4316 }
 0xc05   : > { %v4112_v22 = vmax.f32 %v4087_v56, 0.0 }
 0xc06   : > { %v4118_v51 = vpack.c.bf16 %v4114_v45, %v4113_v63  ;;  %5299 = vmatpush3.bf16.msra.mxu1 %v4116_v47 }
 0xc07   : > { %v4117_v8 = vpack.c.bf16 %v4112_v22, %v4111_v29 }
 0xc09   : > { %5300 = vmatprep.subr.bf16.mxu1 %v4117_v8 }
 0xc0a   : > { %5301 = vmatpush3.bf16.msra.mxu1 %v4117_v8 }
 0xc0b   : > { %5302 = vmatprep.subr.bf16.mxu1 %v4118_v51 }
 0xc0e   : > { %5303 = vmatpush3.bf16.msra.mxu1 %v4118_v51 }
 0xc11   : > { %5305 = vmatmul.mubr.msk.bf16.vlgmr.msra.gmra.mrb[40].mxu1 %vm1546_vm6, %v5628_v32  ;;  %v4327_v32 = vpop.permute.xlu0 %4326 }
 0xc12   : > { %5308 = vmatprep.mubr.msk.bf16.mxu1 %vm1546_vm6, %v5629_v52 }
 0xc19   : > { %5309 = vmatmul.mubr.msk.bf16.gmra.mrb[44].mxu1 %vm1546_vm6, %v5630_v7 }
 0xce4   : > { %v5306_v39 = vpop.f32.mrb[40].mxu1 }
 0xce5   : > { %v4243_v43 = vadd.f32 %v5306_v39, %v4141_v10  ;;  %v4234_v21 = vpop.f32.mrb[41].mxu1 }
 0xce6   : > { %v4235_v4 = vadd.f32 %v4234_v21, %v4131_v2  ;;  %v5307_v6 = vpop.f32.mrb[42].mxu1 }
 0xce7   : > { %v4267_v28 = vadd.f32 %v7176_v18, %v4243_v43  ;;  %v4246_v41 = vadd.f32 %v5307_v6, %v4146_v15  ;;  %v4237_v12 = vpop.f32.mrb[43].mxu1 }
 0xce8   : > { %v4265_v53 = vadd.f32 %v7172_v3, %v4235_v4  ;;  %v4238_v34 = vadd.f32 %v4237_v12, %v4136_v27 }
 0xce9   : > { %v4268_v62 = vadd.f32 %v7174_v25, %v4246_v41  ;;  %v4275_v59 = vmax.f32 %v4267_v28, 0.0 }
 0xcea   : > { %v4273_v55 = vmax.f32 %v4265_v53, 0.0  ;;  %v4266_v58 = vadd.f32 %v7178_v31, %v4238_v34 }
 0xceb   : > { %v4276_v42 = vmax.f32 %v4268_v62, 0.0  ;;  %v4331_v38 = vmul.f32 %v4302_v37, %v4275_v59 }
 0xcec   : > { %v4274_v23 = vmax.f32 %v4266_v58, 0.0  ;;  %v5310_v61 = vpop.f32.mrb[44].mxu1  ;;  %v4329_v60 = vmul.f32 %v4292_v48, %v4273_v55  ;;  %v7389_v48 = vld [vmem:[#allocation31_spill] sm:$0xff] }
 0xced   : > { %v4259_v17 = vadd.f32 %v5310_v61, %v4161_v33  ;;  %v4250_v54 = vpop.f32.mrb[45].mxu1  ;;  %v4332_v49 = vmul.f32 %v4307_v0, %v4276_v42 }
 0xcee   : > { %v4330_v18 = vmul.f32 %v4297_v40, %v4274_v23  ;;  %v4251_v26 = vadd.f32 %v4250_v54, %v4151_v36  ;;  %v5311_v20 = vpop.f32.mrb[46].mxu1  ;;  %v7390_v40 = vsub.s32 0, %v7389_v48 }
 0xcef   : > { %v4262_v3 = vadd.f32 %v5311_v20, %v4166_v19  ;;  %v4253_v47 = vpop.f32.mrb[47].mxu1  ;;  %v4271_v25 = vadd.f32 %v7192_v11, %v4259_v17 }
 0xcf0   : > { %v4337_v5 = vadd.f32 %v4330_v18, %v4329_v60  ;;  %v4269_v31 = vadd.f32 %v7188_v46, %v4251_v26  ;;  %v4254_v35 = vadd.f32 %v4253_v47, %v4156_v9  ;;  %v4322_v46 = vpop.permute.xlu1 %4321 }
 0xcf1   : > { %v4272_v13 = vadd.f32 %v7190_v1, %v4262_v3  ;;  %v4279_v14 = vmax.f32 %v4271_v25, 0.0 }
 0xcf2   : > { %v4338_v30 = vadd.f32 %v4337_v5, %v4331_v38  ;;  %v4277_v57 = vmax.f32 %v4269_v31, 0.0  ;;  %v4270_v24 = vadd.f32 %v7194_v16, %v4254_v35 }
 0xcf3   : > { %v4280_v22 = vmax.f32 %v4272_v13, 0.0  ;;  %v4335_v51 = vmul.f32 %v4322_v46, %v4279_v14 }
 0xcf4   : > { %v4333_v56 = vmul.f32 %v4312_v44, %v4277_v57  ;;  %v4339_v63 = vadd.f32 %v4338_v30, %v4332_v49  ;;  %v4278_v45 = vmax.f32 %v4270_v24, 0.0  ;;  %v4354_v15 = vpop.permute.xlu1 %4353 }
 0xcf5   : > { %v4336_v52 = vmul.f32 %v4327_v32, %v4280_v22  ;;  %v4359_v9 = vrot.slane %v4354_v15, %v7390_v40 }
 0xcf6   : > { %v4340_v29 = vadd.f32 %v4339_v63, %v4333_v56  ;;  %v4334_v11 = vmul.f32 %v4317_v50, %v4278_v45 }
 0xcf8   : > { %v4341_v8 = vadd.f32 %v4340_v29, %v4334_v11 }
 0xcfa   : > { %v4342_v7 = vadd.f32 %v4341_v8, %v4335_v51 }
 0xcfc   : > { %v4343_v2 = vadd.f32 %v4342_v7, %v4336_v52 }
 0xcfe   : > { %v4344_v1 = vrot.slane %v4343_v2, 4 }
 0xd00   : > { %v4345_v16 = vadd.f32 %v4344_v1, %v4343_v2 }
 0xd02   : > { %v4346_v27 = vrot.slane %v4345_v16, 2 }
 0xd04   : > { %v4347_v10 = vadd.f32 %v4346_v27, %v4345_v16 }
 0xd06   : > { %v4348_v36 = vrot.slane %v4347_v10, 1 }
 0xd08   : > { %v4349_v39 = vadd.f32 %v4348_v36, %v4347_v10 }
 0xd0a   : > { %v4360_v37 = vadd.f32 %v4359_v9, %v4349_v39 }
 0xd0c   : > { %4361 = vst [vmem:[%s713_s22] sm:$0x1] %v4360_v37 }
 0xd0d   : > { %5670 = shalt.err (!%p5667_p7)
}
 0xd0e   : > { %s5671_s20 = scalar_lea.hbm %s7243_s29, 16  ;;  %s5675_s22 = scalar_lea.hbm %s7305_s18, 32 }
 0xd0f   : > { %p5672_p10 = scmp.ne.s32.totalorder %s7243_s29, %s5671_s20  ;;  %p5676_p13 = scmp.lt.u32.totalorder %s7243_s29, %s7305_s18 }
 0xd10   : > { %p5677_p0 = scmp.lt.u32.totalorder %s5675_s22, %s5671_s20  ;;  %p5679_p2 = scmp.lt.u32.totalorder %s5671_s20, %s7243_s29 }
 0xd11   : > { %p5673_p11 = pnand %p5672_p10, %p5869_p6 }
 0xd12   : > { %p5678_p1 = por %p5677_p0, %p5676_p13 }
 0xd13   : > { %p5674_p12 = pneg %p5673_p11 }
 0xd14   : > { %p5680_p3 = por %p5679_p2, %p5678_p1 }
 0xd16   : > { %p5681_p4 = pnand %p5680_p3, %p5674_p12 }
 0xd18   : > { %5684 = shalt.err (!%p5681_p4)
}
 0xd19   : > { %5482 = dma.vmem_to_hbm [thread:$0]  (%p5869_p6), %s7245_s2, 16, %s7243_s29, %s4363_s27  }
 0xd1a PF: > { %s7391_s17 = sld [smem:[#allocation8_spill]]  ;;  %p5485_p5 = pnand %p4468_p9, %p5873_p8 }
 0xd20   : > { %s4387_s1 = sand.u32 1, %s7391_s17  }
 0xd21   : > { %s4388_s28 = scalar_lea.sflag [#allocation6], %s4387_s1 }
 0xd22   : > { %5702 = dma.done.wait (!%p5485_p5), %s4388_s28, 16  }
 0xd23   : > { %5704 = vsyncadd (!%p5485_p5), %s4388_s28, 4294967280  ;;  %s7393_s19 = sld [smem:[#allocation9_spill]]  ;;  %s7394_s20 = sld [smem:[#allocation10_spill]] }
 0xd24   : > { %s7395_s29 = smov %s5711_s30  ;;  %s7396_s30 = smov %s5715_s0 }
 0xd29   : > { %p30_p7 = scmp.ge.s32.totalorder %s7393_s19, 4   ;;  %s7397_s0 = smov %s7394_s20 }
 0xd2b   :  { %32 = sbr.rel (!%p30_p7) target bundleno = 8 (0x8), region = 253 }
 0xd32   :  { %4392 = vsyncpa [#allocation6], 1 }
 0xd33   :  { %4394 = vsyncpa [#allocation6 + $0x1], 1 }

</bundles_post_ra>
